<compile_context>
chip_gen: v7x
topology: tpu7x:2x2x1
jax: 0.10.0
libtpu: 0.0.40
codegen_flags: <defaults>
</compile_context>

<pallas_src>
import functools

import jax
import jax.numpy as jnp
import numpy as np
from jax import lax
from jax.experimental import pallas as pl
from jax.experimental.pallas import tpu as pltpu


# --------------------------------------------------------------------------
# Host-side weight preparation: banded matmul operands per stage.
# --------------------------------------------------------------------------
def _build_stage_operands(params, Hp, Wp, embed_dim, compute_dtype, eps=1e-5):
    """Precompute the banded matmul operands consumed by the fused kernel.

    Per stage (in consumption order):
      Tcat  (W*Cin, 2*Wf*Cout)  deconv, output columns = [even rows | odd rows]
      dbias (1, 2*Wf*Cout) f32
      per conv:
        Gstack (3*Wf*Ci, Wf*Co) three 3x3 kernel rows stacked along K, BN scale
                                folded into the columns
        shift  (1, Wf*Co) f32   conv bias + BN shift
    The final conv of the final stage has its output columns permuted to
    channel-major order (co*Wf + x) so the kernel's last slab is already the
    lane-dense (H_out, C_last*W_out) output.
    """
    operands = []
    stages_meta = []
    H, W = Hp, Wp
    cin = embed_dim
    n_stages = len(params)

    for s, (wt, bt, convs) in enumerate(params):
        wt = np.asarray(wt, np.float64)          # (Cin, Cout, 2, 2) torch layout
        bt = np.asarray(bt, np.float64)          # (Cout,)
        Cin, Cout = wt.shape[0], wt.shape[1]
        assert Cin == cin
        Wf = 2 * W
        is_last = s == n_stages - 1

        # ConvTranspose2d(k=2, s=2): even/odd fine-row outputs packed along N.
        T = np.zeros((2, W * Cin, Wf * Cout), np.float64)
        for dy in range(2):
            for x in range(W):
                for dx in range(2):
                    T[dy, x * Cin:(x + 1) * Cin,
                      (2 * x + dx) * Cout:(2 * x + dx + 1) * Cout] = wt[:, :, dy, dx]
        Tcat = np.concatenate([T[0], T[1]], axis=1)        # (W*Cin, 2*Wf*Cout)
        dbias = np.tile(bt, 2 * Wf)[None, :]               # (1, 2*Wf*Cout)
        operands += [jnp.asarray(Tcat, compute_dtype), jnp.asarray(dbias, jnp.float32)]

        n_convs = len(convs)
        for ci, (wc, bc, gamma, beta, mean, var) in enumerate(convs):
            wc = np.asarray(wc, np.float64)       # (Cout, Cin_c, 3, 3) torch layout
            bc = np.asarray(bc, np.float64)
            gamma = np.asarray(gamma, np.float64)
            beta = np.asarray(beta, np.float64)
            mean = np.asarray(mean, np.float64)
            var = np.asarray(var, np.float64)
            Co, Ci = wc.shape[0], wc.shape[1]
            s_bn = gamma / np.sqrt(var + eps)
            shift = beta - mean * s_bn + bc * s_bn          # conv bias + BN shift

            # Conv2d(3x3, pad=1): banded matmul per kernel row; BN scale folded
            # into the weight columns; x-taps / x-padding baked into the band.
            G = np.zeros((3, Wf * Ci, Wf * Co), np.float64)
            for ky in range(3):
                for x in range(Wf):
                    for kx in range(3):
                        xin = x + kx - 1
                        if 0 <= xin < Wf:
                            G[ky, xin * Ci:(xin + 1) * Ci, x * Co:(x + 1) * Co] = \
                                wc[:, :, ky, kx].T * s_bn[None, :]
            # Stack the 3 kernel rows along K -> single (3K, N) matmul operand.
            Gstack = G.reshape(3 * Wf * Ci, Wf * Co)
            shift_row = np.tile(shift, Wf)[None, :]

            if is_last and ci == n_convs - 1:
                # Permute output columns to channel-major (co*Wf + x) so the final
                # slab is the lane-dense NCHW-friendly output (no per-channel path).
                newcol = np.arange(Wf * Co)
                old = (newcol % Wf) * Co + (newcol // Wf)
                Gstack = Gstack[:, old]
                shift_row = np.repeat(shift, Wf)[None, :]

            operands += [jnp.asarray(Gstack, compute_dtype),
                         jnp.asarray(shift_row, jnp.float32)]

        stages_meta.append((H, W, Cin, Cout, n_convs))
        H, W, cin = 2 * H, 2 * W, Cout

    return operands, tuple(stages_meta), cin, H, W


# --------------------------------------------------------------------------
# The fused Pallas kernel (whole neck, one batch element per grid step).
# --------------------------------------------------------------------------
def _neck_kernel(*refs, stages, compute_dtype):
    x_ref, out_ref = refs[0], refs[-1]
    wrefs = refs[1:-1]
    f32 = jnp.float32
    cd = compute_dtype

    def binmat(mask):                       # 0/1 matrix in the MXU compute dtype
        return mask.astype(f32).astype(cd)

    def interleave_mats(h):                 # (2h, h): rows 2y <- z0[y], 2y+1 <- z1[y]
        r = lax.broadcasted_iota(jnp.int32, (2 * h, h), 0)
        c = lax.broadcasted_iota(jnp.int32, (2 * h, h), 1)
        return binmat(r == 2 * c), binmat(r == 2 * c + 1)

    def shift_mats(n):                      # (n, n): prev[i]=slab[i-1], next[i]=slab[i+1]
        r = lax.broadcasted_iota(jnp.int32, (n, n), 0)
        c = lax.broadcasted_iota(jnp.int32, (n, n), 1)
        return binmat(r == c + 1), binmat(c == r + 1)

    a = x_ref[0].astype(f32)                # (H, W*Cin) "layout L" activation slab
    idx = 0

    for (H, W, Cin, Cout, n_convs) in stages:
        Nf = 2 * W * Cout                   # lanes per fine row (=128 every stage)

        # ---- ConvTranspose2d(2,2): ONE N-packed matmul, columns [even | odd] ----
        t_ref, db_ref = wrefs[idx], wrefs[idx + 1]
        idx += 2
        zcat = jnp.dot(a.astype(cd), t_ref[...],
                       preferred_element_type=f32) + db_ref[...]
        z0 = zcat[:, :Nf]                   # even fine rows   (H, Nf)
        z1 = zcat[:, Nf:]                   # odd  fine rows   (H, Nf)

        # ---- interleave even/odd rows into one (2H, Nf) slab ----
        u0, u1 = interleave_mats(H)
        slab = (jnp.dot(u0, z0.astype(cd), preferred_element_type=f32)
                + jnp.dot(u1, z1.astype(cd), preferred_element_type=f32))

        # ---- Conv3x3 + BN + ReLU blocks: one K=3*Nf matmul per conv ----
        if n_convs:
            pm, nm = shift_mats(2 * H)
        for _ in range(n_convs):
            g_ref, sh_ref = wrefs[idx], wrefs[idx + 1]
            idx += 2
            slab_c = slab.astype(cd)                         # hoisted cast
            prev = jnp.dot(pm, slab_c, preferred_element_type=f32)
            nxt = jnp.dot(nm, slab_c, preferred_element_type=f32)
            acat = jnp.concatenate(                          # (2H, 3*Nf), 128-aligned
                [prev.astype(cd), slab_c, nxt.astype(cd)], axis=-1)
            y = jnp.dot(acat, g_ref[...], preferred_element_type=f32) + sh_ref[...]
            slab = jnp.maximum(y, 0.0)

        a = slab                                              # feeds next stage

    # Final slab has channel-major columns (co*W_out + x): one lane-dense store.
    out_ref[0] = a.astype(out_ref.dtype)


# --------------------------------------------------------------------------
# Wrapper: one pallas_call for the whole neck.
# --------------------------------------------------------------------------
def geospatial_neck_forward(x_tokens, params, Hp, Wp, drop_cls_token=True,
                            compute_dtype=jnp.bfloat16):
    """x_tokens: (B, [1+]Hp*Wp, embed_dim). Returns NCHW (B, C_last, H_out, W_out)."""
    x = x_tokens
    if drop_cls_token:
        x = x[:, 1:, :]
    B, L, E = x.shape
    assert L == Hp * Wp
    # TODO(synk): support num_convs_per_upscale == 0 on the last stage (would need
    # the channel-major permutation baked into the deconv); module default (>=1) ok.
    assert len(params[-1][2]) >= 1

    # Free layout change: (B, L, E) -> (B, Hp, Wp*E) is the same memory order.
    x = x.reshape(B, Hp, Wp * E).astype(jnp.float32)

    operands, stages, c_last, h_out, w_out = _build_stage_operands(
        params, Hp, Wp, E, compute_dtype)

    def _const_map(ndim):
        return lambda b: (0,) * ndim

    in_specs = [pl.BlockSpec((1, Hp, Wp * E), lambda b: (b, 0, 0))]
    # Constant index_map => weights are not re-DMA'd across grid steps.
    in_specs += [pl.BlockSpec(op.shape, _const_map(op.ndim)) for op in operands]

    kernel = functools.partial(_neck_kernel, stages=stages,
                               compute_dtype=compute_dtype)
    out = pl.pallas_call(
        kernel,
        out_shape=jax.ShapeDtypeStruct((B, h_out, c_last * w_out), jnp.float32),
        grid=(B,),
        in_specs=in_specs,
        out_specs=pl.BlockSpec((1, h_out, c_last * w_out), lambda b: (b, 0, 0)),
        compiler_params=pltpu.CompilerParams(dimension_semantics=("parallel",)),
    )(x, *operands)

    # Tiny NCHW fix-up in XLA (32 KB/batch): channel-major lanes -> (B, C, H, W).
    return out.reshape(B, h_out, c_last, w_out).transpose(0, 2, 1, 3)


# --------------------------------------------------------------------------
# Deterministic parameter init (shapes from GeospatialNeck.__init__)
# --------------------------------------------------------------------------
def init_params(key, channels, num_convs_per_upscale):
    params = []
    for i in range(len(channels) - 1):
        cin, cout = channels[i], channels[i + 1]
        key, k1, k2 = jax.random.split(key, 3)
        wt = jax.random.normal(k1, (cin, cout, 2, 2), jnp.float32) * 0.1
        bt = jax.random.normal(k2, (cout,), jnp.float32) * 0.1
        convs = []
        for _ in range(num_convs_per_upscale):
            key, k3, k4, k5, k6, k7, k8 = jax.random.split(key, 7)
            wc = jax.random.normal(k3, (cout, cout, 3, 3), jnp.float32) * 0.1
            bc = jax.random.normal(k4, (cout,), jnp.float32) * 0.1
            gamma = jax.random.uniform(k5, (cout,), jnp.float32, 0.5, 1.5)
            beta = jax.random.normal(k6, (cout,), jnp.float32) * 0.1
            mean = jax.random.normal(k7, (cout,), jnp.float32) * 0.1
            var = jax.random.uniform(k8, (cout,), jnp.float32, 0.5, 1.5)
            convs.append((wc, bc, gamma, beta, mean, var))
        params.append((wt, bt, convs))
    return params


# --------------------------------------------------------------------------
# NumPy reference (NCHW, mirrors the PyTorch module's math, float64)
# --------------------------------------------------------------------------
def ref_forward(x_tokens, params, Hp, Wp):
    x = np.asarray(x_tokens, np.float64)[:, 1:, :]
    B, L, E = x.shape
    x = np.transpose(x, (0, 2, 1)).reshape(B, E, Hp, Wp)
    for (wt, bt, convs) in params:
        wt, bt = np.asarray(wt, np.float64), np.asarray(bt, np.float64)
        Bn, _, H, W = x.shape
        Cout = wt.shape[1]
        y = np.zeros((Bn, Cout, 2 * H, 2 * W), np.float64)
        for di in range(2):
            for dj in range(2):
                y[:, :, di::2, dj::2] = np.einsum("bchw,co->bohw", x, wt[:, :, di, dj])
        y += bt[None, :, None, None]
        for (wc, bc, gamma, beta, mean, var) in convs:
            wc, bc = np.asarray(wc, np.float64), np.asarray(bc, np.float64)
            gamma, beta = np.asarray(gamma, np.float64), np.asarray(beta, np.float64)
            mean, var = np.asarray(mean, np.float64), np.asarray(var, np.float64)
            H2, W2 = y.shape[2], y.shape[3]
            yp = np.pad(y, ((0, 0), (0, 0), (1, 1), (1, 1)))
            z = np.zeros((Bn, wc.shape[0], H2, W2), np.float64)
            for kh in range(3):
                for kw in range(3):
                    z += np.einsum("bchw,oc->bohw",
                                   yp[:, :, kh:kh + H2, kw:kw + W2], wc[:, :, kh, kw])
            z += bc[None, :, None, None]
            z = (z - mean[None, :, None, None]) / np.sqrt(var[None, :, None, None] + 1e-5)
            z = z * gamma[None, :, None, None] + beta[None, :, None, None]
            y = np.maximum(z, 0.0)
        x = y
    return x.astype(np.float32)


# --------------------------------------------------------------------------
if __name__ == "__main__":
    # Config consistent with the module: embed_dim=32, first_conv_channels=16,
    # Hp=Wp=4, channel_reduction_factor=2, num_convs=4, num_convs_per_upscale=1.
    embed_dim = 32
    first_conv_channels = 16
    Hp = Wp = 4
    channel_reduction_factor = 2
    num_convs = 4
    num_convs_per_upscale = 1
    B = 2

    channels = [embed_dim] + [
        first_conv_channels // channel_reduction_factor ** i for i in range(num_convs)
    ]  # [32, 16, 8, 4, 2]
    H_out = Hp * 2 ** num_convs  # 64
    W_out = Wp * 2 ** num_convs  # 64

    key = jax.random.PRNGKey(0)
    key, kx = jax.random.split(key)
    # Input matches x[0] of the PyTorch forward: (B, 1 + Hp*Wp, embed_dim).
    x_tokens = jax.random.normal(kx, (B, 1 + Hp * Wp, embed_dim), jnp.float32)
    params = init_params(key, channels, num_convs_per_upscale)

    ref = ref_forward(np.asarray(x_tokens), params, Hp, Wp)

    # f32 compute path: tight numerical check against the NCHW reference.
    out_f32 = jax.block_until_ready(
        geospatial_neck_forward(x_tokens, params, Hp, Wp, compute_dtype=jnp.float32))
    assert out_f32.shape == (B, channels[-1], H_out, W_out), out_f32.shape
    np.testing.assert_allclose(np.asarray(out_f32), ref, rtol=2e-3, atol=2e-3)

    # bf16 compute path (default): bf16 operands into the MXU with f32 accumulation;
    # loose tolerance accounts for bf16 activation rounding across 8 layers.
    out_bf16 = jax.block_until_ready(
        geospatial_neck_forward(x_tokens, params, Hp, Wp, compute_dtype=jnp.bfloat16))
    assert out_bf16.shape == (B, channels[-1], H_out, W_out), out_bf16.shape
    np.testing.assert_allclose(np.asarray(out_bf16), ref, rtol=2e-1, atol=2e-1)

    print("KERNEL_OK")
</pallas_src>

<mosaic_0001>
module attributes {stable_mosaic.version = 11 : i64} {
  func.func @_neck_kernel(%arg0: i32, %arg1: memref<1x4x128xf32, #tpu.memory_space<vmem>>, %arg2: memref<128x256xf32, #tpu.memory_space<vmem>>, %arg3: memref<1x256xf32, #tpu.memory_space<vmem>>, %arg4: memref<384x128xf32, #tpu.memory_space<vmem>>, %arg5: memref<1x128xf32, #tpu.memory_space<vmem>>, %arg6: memref<128x256xf32, #tpu.memory_space<vmem>>, %arg7: memref<1x256xf32, #tpu.memory_space<vmem>>, %arg8: memref<384x128xf32, #tpu.memory_space<vmem>>, %arg9: memref<1x128xf32, #tpu.memory_space<vmem>>, %arg10: memref<128x256xf32, #tpu.memory_space<vmem>>, %arg11: memref<1x256xf32, #tpu.memory_space<vmem>>, %arg12: memref<384x128xf32, #tpu.memory_space<vmem>>, %arg13: memref<1x128xf32, #tpu.memory_space<vmem>>, %arg14: memref<128x256xf32, #tpu.memory_space<vmem>>, %arg15: memref<1x256xf32, #tpu.memory_space<vmem>>, %arg16: memref<384x128xf32, #tpu.memory_space<vmem>>, %arg17: memref<1x128xf32, #tpu.memory_space<vmem>>, %arg18: memref<1x64x128xf32, #tpu.memory_space<vmem>>) attributes {dimension_semantics = [#tpu.dimension_semantics<parallel>], iteration_bounds = array<i64: 2>, scalar_prefetch = 0 : i64, scratch_operands = 0 : i64, tpu.core_type = #tpu.core_type<tc>, window_params = [{transform_indices = @transform_0, window_bounds = array<i64: 1, 4, 128>}, {pipeline_mode = #tpu.pipeline_mode<synchronous>, transform_indices = @transform_1, window_bounds = array<i64: 128, 256>}, {pipeline_mode = #tpu.pipeline_mode<synchronous>, transform_indices = @transform_2, window_bounds = array<i64: 1, 256>}, {pipeline_mode = #tpu.pipeline_mode<synchronous>, transform_indices = @transform_3, window_bounds = array<i64: 384, 128>}, {pipeline_mode = #tpu.pipeline_mode<synchronous>, transform_indices = @transform_4, window_bounds = array<i64: 1, 128>}, {pipeline_mode = #tpu.pipeline_mode<synchronous>, transform_indices = @transform_5, window_bounds = array<i64: 128, 256>}, {pipeline_mode = #tpu.pipeline_mode<synchronous>, transform_indices = @transform_6, window_bounds = array<i64: 1, 256>}, {pipeline_mode = #tpu.pipeline_mode<synchronous>, transform_indices = @transform_7, window_bounds = array<i64: 384, 128>}, {pipeline_mode = #tpu.pipeline_mode<synchronous>, transform_indices = @transform_8, window_bounds = array<i64: 1, 128>}, {pipeline_mode = #tpu.pipeline_mode<synchronous>, transform_indices = @transform_9, window_bounds = array<i64: 128, 256>}, {pipeline_mode = #tpu.pipeline_mode<synchronous>, transform_indices = @transform_10, window_bounds = array<i64: 1, 256>}, {pipeline_mode = #tpu.pipeline_mode<synchronous>, transform_indices = @transform_11, window_bounds = array<i64: 384, 128>}, {pipeline_mode = #tpu.pipeline_mode<synchronous>, transform_indices = @transform_12, window_bounds = array<i64: 1, 128>}, {pipeline_mode = #tpu.pipeline_mode<synchronous>, transform_indices = @transform_13, window_bounds = array<i64: 128, 256>}, {pipeline_mode = #tpu.pipeline_mode<synchronous>, transform_indices = @transform_14, window_bounds = array<i64: 1, 256>}, {pipeline_mode = #tpu.pipeline_mode<synchronous>, transform_indices = @transform_15, window_bounds = array<i64: 384, 128>}, {pipeline_mode = #tpu.pipeline_mode<synchronous>, transform_indices = @transform_16, window_bounds = array<i64: 1, 128>}, {transform_indices = @transform_17, window_bounds = array<i64: 1, 64, 128>}]} {
    %c0 = arith.constant 0 : index
    %c0_0 = arith.constant 0 : index
    %c0_1 = arith.constant 0 : index
    %0 = vector.load %arg1[%c0, %c0_0, %c0_1] : memref<1x4x128xf32, #tpu.memory_space<vmem>>, vector<1x4x128xf32>
    %1 = vector.shape_cast %0 : vector<1x4x128xf32> to vector<4x128xf32>
    %c0_2 = arith.constant 0 : index
    %c0_3 = arith.constant 0 : index
    %2 = vector.load %arg2[%c0_2, %c0_3] : memref<128x256xf32, #tpu.memory_space<vmem>>, vector<128x256xf32>
    %cst = arith.constant dense<0.000000e+00> : vector<4x256xf32>
    %3 = tpu.matmul %1, %2, %cst {dimension_numbers = #tpu.dot_dimension_numbers<[1], [0], [0], [1], [0, 0, 1, 1], [], []>} : vector<4x128xf32>, vector<128x256xf32>, vector<4x256xf32> -> vector<4x256xf32>
    %c0_4 = arith.constant 0 : index
    %c0_5 = arith.constant 0 : index
    %4 = vector.load %arg3[%c0_4, %c0_5] : memref<1x256xf32, #tpu.memory_space<vmem>>, vector<1x256xf32>
    %5 = vector.broadcast %4 : vector<1x256xf32> to vector<4x256xf32>
    %6 = arith.addf %3, %5 : vector<4x256xf32>
    %7 = vector.extract_strided_slice %6 {offsets = [0, 0], sizes = [4, 128], strides = [1, 1]} : vector<4x256xf32> to vector<4x128xf32>
    %8 = vector.extract_strided_slice %6 {offsets = [0, 128], sizes = [4, 128], strides = [1, 1]} : vector<4x256xf32> to vector<4x128xf32>
    %9 = tpu.iota {dimensions = array<i32: 0>} : vector<8x4xi32>
    %10 = tpu.iota {dimensions = array<i32: 1>} : vector<8x4xi32>
    %c2_i32 = arith.constant 2 : i32
    %11 = vector.broadcast %c2_i32 : i32 to vector<8x4xi32>
    %12 = arith.muli %11, %10 : vector<8x4xi32>
    %13 = arith.cmpi eq, %9, %12 : vector<8x4xi32>
    %14 = arith.extui %13 : vector<8x4xi1> to vector<8x4xi32>
    %15 = arith.sitofp %14 : vector<8x4xi32> to vector<8x4xf32>
    %c2_i32_6 = arith.constant 2 : i32
    %16 = vector.broadcast %c2_i32_6 : i32 to vector<8x4xi32>
    %17 = arith.muli %16, %10 : vector<8x4xi32>
    %c1_i32 = arith.constant 1 : i32
    %18 = vector.broadcast %c1_i32 : i32 to vector<8x4xi32>
    %19 = arith.addi %17, %18 : vector<8x4xi32>
    %20 = arith.cmpi eq, %9, %19 : vector<8x4xi32>
    %21 = arith.extui %20 : vector<8x4xi1> to vector<8x4xi32>
    %22 = arith.sitofp %21 : vector<8x4xi32> to vector<8x4xf32>
    %cst_7 = arith.constant dense<0.000000e+00> : vector<8x128xf32>
    %23 = tpu.matmul %15, %7, %cst_7 {dimension_numbers = #tpu.dot_dimension_numbers<[1], [0], [0], [1], [0, 0, 1, 1], [], []>} : vector<8x4xf32>, vector<4x128xf32>, vector<8x128xf32> -> vector<8x128xf32>
    %cst_8 = arith.constant dense<0.000000e+00> : vector<8x128xf32>
    %24 = tpu.matmul %22, %8, %cst_8 {dimension_numbers = #tpu.dot_dimension_numbers<[1], [0], [0], [1], [0, 0, 1, 1], [], []>} : vector<8x4xf32>, vector<4x128xf32>, vector<8x128xf32> -> vector<8x128xf32>
    %25 = arith.addf %23, %24 : vector<8x128xf32>
    %26 = tpu.iota {dimensions = array<i32: 0>} : vector<8x8xi32>
    %27 = tpu.iota {dimensions = array<i32: 1>} : vector<8x8xi32>
    %c1_i32_9 = arith.constant 1 : i32
    %28 = vector.broadcast %c1_i32_9 : i32 to vector<8x8xi32>
    %29 = arith.addi %27, %28 : vector<8x8xi32>
    %30 = arith.cmpi eq, %26, %29 : vector<8x8xi32>
    %31 = arith.extui %30 : vector<8x8xi1> to vector<8x8xi32>
    %32 = arith.sitofp %31 : vector<8x8xi32> to vector<8x8xf32>
    %c1_i32_10 = arith.constant 1 : i32
    %33 = vector.broadcast %c1_i32_10 : i32 to vector<8x8xi32>
    %34 = arith.addi %26, %33 : vector<8x8xi32>
    %35 = arith.cmpi eq, %27, %34 : vector<8x8xi32>
    %36 = arith.extui %35 : vector<8x8xi1> to vector<8x8xi32>
    %37 = arith.sitofp %36 : vector<8x8xi32> to vector<8x8xf32>
    %cst_11 = arith.constant dense<0.000000e+00> : vector<8x128xf32>
    %38 = tpu.matmul %32, %25, %cst_11 {dimension_numbers = #tpu.dot_dimension_numbers<[1], [0], [0], [1], [0, 0, 1, 1], [], []>} : vector<8x8xf32>, vector<8x128xf32>, vector<8x128xf32> -> vector<8x128xf32>
    %cst_12 = arith.constant dense<0.000000e+00> : vector<8x128xf32>
    %39 = tpu.matmul %37, %25, %cst_12 {dimension_numbers = #tpu.dot_dimension_numbers<[1], [0], [0], [1], [0, 0, 1, 1], [], []>} : vector<8x8xf32>, vector<8x128xf32>, vector<8x128xf32> -> vector<8x128xf32>
    %40 = tpu.concatenate %38, %25, %39 in 1 : vector<8x128xf32>, vector<8x128xf32>, vector<8x128xf32> -> vector<8x384xf32>
    %c0_13 = arith.constant 0 : index
    %c0_14 = arith.constant 0 : index
    %41 = vector.load %arg4[%c0_13, %c0_14] : memref<384x128xf32, #tpu.memory_space<vmem>>, vector<384x128xf32>
    %cst_15 = arith.constant dense<0.000000e+00> : vector<8x128xf32>
    %42 = tpu.matmul %40, %41, %cst_15 {dimension_numbers = #tpu.dot_dimension_numbers<[1], [0], [0], [1], [0, 0, 1, 1], [], []>} : vector<8x384xf32>, vector<384x128xf32>, vector<8x128xf32> -> vector<8x128xf32>
    %c0_16 = arith.constant 0 : index
    %c0_17 = arith.constant 0 : index
    %43 = vector.load %arg5[%c0_16, %c0_17] : memref<1x128xf32, #tpu.memory_space<vmem>>, vector<1x128xf32>
    %44 = vector.broadcast %43 : vector<1x128xf32> to vector<8x128xf32>
    %45 = arith.addf %42, %44 : vector<8x128xf32>
    %cst_18 = arith.constant 0.000000e+00 : f32
    %46 = vector.broadcast %cst_18 : f32 to vector<8x128xf32>
    %47 = arith.maximumf %45, %46 : vector<8x128xf32>
    %c0_19 = arith.constant 0 : index
    %c0_20 = arith.constant 0 : index
    %48 = vector.load %arg6[%c0_19, %c0_20] : memref<128x256xf32, #tpu.memory_space<vmem>>, vector<128x256xf32>
    %cst_21 = arith.constant dense<0.000000e+00> : vector<8x256xf32>
    %49 = tpu.matmul %47, %48, %cst_21 {dimension_numbers = #tpu.dot_dimension_numbers<[1], [0], [0], [1], [0, 0, 1, 1], [], []>} : vector<8x128xf32>, vector<128x256xf32>, vector<8x256xf32> -> vector<8x256xf32>
    %c0_22 = arith.constant 0 : index
    %c0_23 = arith.constant 0 : index
    %50 = vector.load %arg7[%c0_22, %c0_23] : memref<1x256xf32, #tpu.memory_space<vmem>>, vector<1x256xf32>
    %51 = vector.broadcast %50 : vector<1x256xf32> to vector<8x256xf32>
    %52 = arith.addf %49, %51 : vector<8x256xf32>
    %53 = vector.extract_strided_slice %52 {offsets = [0, 0], sizes = [8, 128], strides = [1, 1]} : vector<8x256xf32> to vector<8x128xf32>
    %54 = vector.extract_strided_slice %52 {offsets = [0, 128], sizes = [8, 128], strides = [1, 1]} : vector<8x256xf32> to vector<8x128xf32>
    %55 = tpu.iota {dimensions = array<i32: 0>} : vector<16x8xi32>
    %56 = tpu.iota {dimensions = array<i32: 1>} : vector<16x8xi32>
    %c2_i32_24 = arith.constant 2 : i32
    %57 = vector.broadcast %c2_i32_24 : i32 to vector<16x8xi32>
    %58 = arith.muli %57, %56 : vector<16x8xi32>
    %59 = arith.cmpi eq, %55, %58 : vector<16x8xi32>
    %60 = arith.extui %59 : vector<16x8xi1> to vector<16x8xi32>
    %61 = arith.sitofp %60 : vector<16x8xi32> to vector<16x8xf32>
    %c2_i32_25 = arith.constant 2 : i32
    %62 = vector.broadcast %c2_i32_25 : i32 to vector<16x8xi32>
    %63 = arith.muli %62, %56 : vector<16x8xi32>
    %c1_i32_26 = arith.constant 1 : i32
    %64 = vector.broadcast %c1_i32_26 : i32 to vector<16x8xi32>
    %65 = arith.addi %63, %64 : vector<16x8xi32>
    %66 = arith.cmpi eq, %55, %65 : vector<16x8xi32>
    %67 = arith.extui %66 : vector<16x8xi1> to vector<16x8xi32>
    %68 = arith.sitofp %67 : vector<16x8xi32> to vector<16x8xf32>
    %cst_27 = arith.constant dense<0.000000e+00> : vector<16x128xf32>
    %69 = tpu.matmul %61, %53, %cst_27 {dimension_numbers = #tpu.dot_dimension_numbers<[1], [0], [0], [1], [0, 0, 1, 1], [], []>} : vector<16x8xf32>, vector<8x128xf32>, vector<16x128xf32> -> vector<16x128xf32>
    %cst_28 = arith.constant dense<0.000000e+00> : vector<16x128xf32>
    %70 = tpu.matmul %68, %54, %cst_28 {dimension_numbers = #tpu.dot_dimension_numbers<[1], [0], [0], [1], [0, 0, 1, 1], [], []>} : vector<16x8xf32>, vector<8x128xf32>, vector<16x128xf32> -> vector<16x128xf32>
    %71 = arith.addf %69, %70 : vector<16x128xf32>
    %72 = tpu.iota {dimensions = array<i32: 0>} : vector<16x16xi32>
    %73 = tpu.iota {dimensions = array<i32: 1>} : vector<16x16xi32>
    %c1_i32_29 = arith.constant 1 : i32
    %74 = vector.broadcast %c1_i32_29 : i32 to vector<16x16xi32>
    %75 = arith.addi %73, %74 : vector<16x16xi32>
    %76 = arith.cmpi eq, %72, %75 : vector<16x16xi32>
    %77 = arith.extui %76 : vector<16x16xi1> to vector<16x16xi32>
    %78 = arith.sitofp %77 : vector<16x16xi32> to vector<16x16xf32>
    %c1_i32_30 = arith.constant 1 : i32
    %79 = vector.broadcast %c1_i32_30 : i32 to vector<16x16xi32>
    %80 = arith.addi %72, %79 : vector<16x16xi32>
    %81 = arith.cmpi eq, %73, %80 : vector<16x16xi32>
    %82 = arith.extui %81 : vector<16x16xi1> to vector<16x16xi32>
    %83 = arith.sitofp %82 : vector<16x16xi32> to vector<16x16xf32>
    %cst_31 = arith.constant dense<0.000000e+00> : vector<16x128xf32>
    %84 = tpu.matmul %78, %71, %cst_31 {dimension_numbers = #tpu.dot_dimension_numbers<[1], [0], [0], [1], [0, 0, 1, 1], [], []>} : vector<16x16xf32>, vector<16x128xf32>, vector<16x128xf32> -> vector<16x128xf32>
    %cst_32 = arith.constant dense<0.000000e+00> : vector<16x128xf32>
    %85 = tpu.matmul %83, %71, %cst_32 {dimension_numbers = #tpu.dot_dimension_numbers<[1], [0], [0], [1], [0, 0, 1, 1], [], []>} : vector<16x16xf32>, vector<16x128xf32>, vector<16x128xf32> -> vector<16x128xf32>
    %86 = tpu.concatenate %84, %71, %85 in 1 : vector<16x128xf32>, vector<16x128xf32>, vector<16x128xf32> -> vector<16x384xf32>
    %c0_33 = arith.constant 0 : index
    %c0_34 = arith.constant 0 : index
    %87 = vector.load %arg8[%c0_33, %c0_34] : memref<384x128xf32, #tpu.memory_space<vmem>>, vector<384x128xf32>
    %cst_35 = arith.constant dense<0.000000e+00> : vector<16x128xf32>
    %88 = tpu.matmul %86, %87, %cst_35 {dimension_numbers = #tpu.dot_dimension_numbers<[1], [0], [0], [1], [0, 0, 1, 1], [], []>} : vector<16x384xf32>, vector<384x128xf32>, vector<16x128xf32> -> vector<16x128xf32>
    %c0_36 = arith.constant 0 : index
    %c0_37 = arith.constant 0 : index
    %89 = vector.load %arg9[%c0_36, %c0_37] : memref<1x128xf32, #tpu.memory_space<vmem>>, vector<1x128xf32>
    %90 = vector.broadcast %89 : vector<1x128xf32> to vector<16x128xf32>
    %91 = arith.addf %88, %90 : vector<16x128xf32>
    %cst_38 = arith.constant 0.000000e+00 : f32
    %92 = vector.broadcast %cst_38 : f32 to vector<16x128xf32>
    %93 = arith.maximumf %91, %92 : vector<16x128xf32>
    %c0_39 = arith.constant 0 : index
    %c0_40 = arith.constant 0 : index
    %94 = vector.load %arg10[%c0_39, %c0_40] : memref<128x256xf32, #tpu.memory_space<vmem>>, vector<128x256xf32>
    %cst_41 = arith.constant dense<0.000000e+00> : vector<16x256xf32>
    %95 = tpu.matmul %93, %94, %cst_41 {dimension_numbers = #tpu.dot_dimension_numbers<[1], [0], [0], [1], [0, 0, 1, 1], [], []>} : vector<16x128xf32>, vector<128x256xf32>, vector<16x256xf32> -> vector<16x256xf32>
    %c0_42 = arith.constant 0 : index
    %c0_43 = arith.constant 0 : index
    %96 = vector.load %arg11[%c0_42, %c0_43] : memref<1x256xf32, #tpu.memory_space<vmem>>, vector<1x256xf32>
    %97 = vector.broadcast %96 : vector<1x256xf32> to vector<16x256xf32>
    %98 = arith.addf %95, %97 : vector<16x256xf32>
    %99 = vector.extract_strided_slice %98 {offsets = [0, 0], sizes = [16, 128], strides = [1, 1]} : vector<16x256xf32> to vector<16x128xf32>
    %100 = vector.extract_strided_slice %98 {offsets = [0, 128], sizes = [16, 128], strides = [1, 1]} : vector<16x256xf32> to vector<16x128xf32>
    %101 = tpu.iota {dimensions = array<i32: 0>} : vector<32x16xi32>
    %102 = tpu.iota {dimensions = array<i32: 1>} : vector<32x16xi32>
    %c2_i32_44 = arith.constant 2 : i32
    %103 = vector.broadcast %c2_i32_44 : i32 to vector<32x16xi32>
    %104 = arith.muli %103, %102 : vector<32x16xi32>
    %105 = arith.cmpi eq, %101, %104 : vector<32x16xi32>
    %106 = arith.extui %105 : vector<32x16xi1> to vector<32x16xi32>
    %107 = arith.sitofp %106 : vector<32x16xi32> to vector<32x16xf32>
    %c2_i32_45 = arith.constant 2 : i32
    %108 = vector.broadcast %c2_i32_45 : i32 to vector<32x16xi32>
    %109 = arith.muli %108, %102 : vector<32x16xi32>
    %c1_i32_46 = arith.constant 1 : i32
    %110 = vector.broadcast %c1_i32_46 : i32 to vector<32x16xi32>
    %111 = arith.addi %109, %110 : vector<32x16xi32>
    %112 = arith.cmpi eq, %101, %111 : vector<32x16xi32>
    %113 = arith.extui %112 : vector<32x16xi1> to vector<32x16xi32>
    %114 = arith.sitofp %113 : vector<32x16xi32> to vector<32x16xf32>
    %cst_47 = arith.constant dense<0.000000e+00> : vector<32x128xf32>
    %115 = tpu.matmul %107, %99, %cst_47 {dimension_numbers = #tpu.dot_dimension_numbers<[1], [0], [0], [1], [0, 0, 1, 1], [], []>} : vector<32x16xf32>, vector<16x128xf32>, vector<32x128xf32> -> vector<32x128xf32>
    %cst_48 = arith.constant dense<0.000000e+00> : vector<32x128xf32>
    %116 = tpu.matmul %114, %100, %cst_48 {dimension_numbers = #tpu.dot_dimension_numbers<[1], [0], [0], [1], [0, 0, 1, 1], [], []>} : vector<32x16xf32>, vector<16x128xf32>, vector<32x128xf32> -> vector<32x128xf32>
    %117 = arith.addf %115, %116 : vector<32x128xf32>
    %118 = tpu.iota {dimensions = array<i32: 0>} : vector<32x32xi32>
    %119 = tpu.iota {dimensions = array<i32: 1>} : vector<32x32xi32>
    %c1_i32_49 = arith.constant 1 : i32
    %120 = vector.broadcast %c1_i32_49 : i32 to vector<32x32xi32>
    %121 = arith.addi %119, %120 : vector<32x32xi32>
    %122 = arith.cmpi eq, %118, %121 : vector<32x32xi32>
    %123 = arith.extui %122 : vector<32x32xi1> to vector<32x32xi32>
    %124 = arith.sitofp %123 : vector<32x32xi32> to vector<32x32xf32>
    %c1_i32_50 = arith.constant 1 : i32
    %125 = vector.broadcast %c1_i32_50 : i32 to vector<32x32xi32>
    %126 = arith.addi %118, %125 : vector<32x32xi32>
    %127 = arith.cmpi eq, %119, %126 : vector<32x32xi32>
    %128 = arith.extui %127 : vector<32x32xi1> to vector<32x32xi32>
    %129 = arith.sitofp %128 : vector<32x32xi32> to vector<32x32xf32>
    %cst_51 = arith.constant dense<0.000000e+00> : vector<32x128xf32>
    %130 = tpu.matmul %124, %117, %cst_51 {dimension_numbers = #tpu.dot_dimension_numbers<[1], [0], [0], [1], [0, 0, 1, 1], [], []>} : vector<32x32xf32>, vector<32x128xf32>, vector<32x128xf32> -> vector<32x128xf32>
    %cst_52 = arith.constant dense<0.000000e+00> : vector<32x128xf32>
    %131 = tpu.matmul %129, %117, %cst_52 {dimension_numbers = #tpu.dot_dimension_numbers<[1], [0], [0], [1], [0, 0, 1, 1], [], []>} : vector<32x32xf32>, vector<32x128xf32>, vector<32x128xf32> -> vector<32x128xf32>
    %132 = tpu.concatenate %130, %117, %131 in 1 : vector<32x128xf32>, vector<32x128xf32>, vector<32x128xf32> -> vector<32x384xf32>
    %c0_53 = arith.constant 0 : index
    %c0_54 = arith.constant 0 : index
    %133 = vector.load %arg12[%c0_53, %c0_54] : memref<384x128xf32, #tpu.memory_space<vmem>>, vector<384x128xf32>
    %cst_55 = arith.constant dense<0.000000e+00> : vector<32x128xf32>
    %134 = tpu.matmul %132, %133, %cst_55 {dimension_numbers = #tpu.dot_dimension_numbers<[1], [0], [0], [1], [0, 0, 1, 1], [], []>} : vector<32x384xf32>, vector<384x128xf32>, vector<32x128xf32> -> vector<32x128xf32>
    %c0_56 = arith.constant 0 : index
    %c0_57 = arith.constant 0 : index
    %135 = vector.load %arg13[%c0_56, %c0_57] : memref<1x128xf32, #tpu.memory_space<vmem>>, vector<1x128xf32>
    %136 = vector.broadcast %135 : vector<1x128xf32> to vector<32x128xf32>
    %137 = arith.addf %134, %136 : vector<32x128xf32>
    %cst_58 = arith.constant 0.000000e+00 : f32
    %138 = vector.broadcast %cst_58 : f32 to vector<32x128xf32>
    %139 = arith.maximumf %137, %138 : vector<32x128xf32>
    %c0_59 = arith.constant 0 : index
    %c0_60 = arith.constant 0 : index
    %140 = vector.load %arg14[%c0_59, %c0_60] : memref<128x256xf32, #tpu.memory_space<vmem>>, vector<128x256xf32>
    %cst_61 = arith.constant dense<0.000000e+00> : vector<32x256xf32>
    %141 = tpu.matmul %139, %140, %cst_61 {dimension_numbers = #tpu.dot_dimension_numbers<[1], [0], [0], [1], [0, 0, 1, 1], [], []>} : vector<32x128xf32>, vector<128x256xf32>, vector<32x256xf32> -> vector<32x256xf32>
    %c0_62 = arith.constant 0 : index
    %c0_63 = arith.constant 0 : index
    %142 = vector.load %arg15[%c0_62, %c0_63] : memref<1x256xf32, #tpu.memory_space<vmem>>, vector<1x256xf32>
    %143 = vector.broadcast %142 : vector<1x256xf32> to vector<32x256xf32>
    %144 = arith.addf %141, %143 : vector<32x256xf32>
    %145 = vector.extract_strided_slice %144 {offsets = [0, 0], sizes = [32, 128], strides = [1, 1]} : vector<32x256xf32> to vector<32x128xf32>
    %146 = vector.extract_strided_slice %144 {offsets = [0, 128], sizes = [32, 128], strides = [1, 1]} : vector<32x256xf32> to vector<32x128xf32>
    %147 = tpu.iota {dimensions = array<i32: 0>} : vector<64x32xi32>
    %148 = tpu.iota {dimensions = array<i32: 1>} : vector<64x32xi32>
    %c2_i32_64 = arith.constant 2 : i32
    %149 = vector.broadcast %c2_i32_64 : i32 to vector<64x32xi32>
    %150 = arith.muli %149, %148 : vector<64x32xi32>
    %151 = arith.cmpi eq, %147, %150 : vector<64x32xi32>
    %152 = arith.extui %151 : vector<64x32xi1> to vector<64x32xi32>
    %153 = arith.sitofp %152 : vector<64x32xi32> to vector<64x32xf32>
    %c2_i32_65 = arith.constant 2 : i32
    %154 = vector.broadcast %c2_i32_65 : i32 to vector<64x32xi32>
    %155 = arith.muli %154, %148 : vector<64x32xi32>
    %c1_i32_66 = arith.constant 1 : i32
    %156 = vector.broadcast %c1_i32_66 : i32 to vector<64x32xi32>
    %157 = arith.addi %155, %156 : vector<64x32xi32>
    %158 = arith.cmpi eq, %147, %157 : vector<64x32xi32>
    %159 = arith.extui %158 : vector<64x32xi1> to vector<64x32xi32>
    %160 = arith.sitofp %159 : vector<64x32xi32> to vector<64x32xf32>
    %cst_67 = arith.constant dense<0.000000e+00> : vector<64x128xf32>
    %161 = tpu.matmul %153, %145, %cst_67 {dimension_numbers = #tpu.dot_dimension_numbers<[1], [0], [0], [1], [0, 0, 1, 1], [], []>} : vector<64x32xf32>, vector<32x128xf32>, vector<64x128xf32> -> vector<64x128xf32>
    %cst_68 = arith.constant dense<0.000000e+00> : vector<64x128xf32>
    %162 = tpu.matmul %160, %146, %cst_68 {dimension_numbers = #tpu.dot_dimension_numbers<[1], [0], [0], [1], [0, 0, 1, 1], [], []>} : vector<64x32xf32>, vector<32x128xf32>, vector<64x128xf32> -> vector<64x128xf32>
    %163 = arith.addf %161, %162 : vector<64x128xf32>
    %164 = tpu.iota {dimensions = array<i32: 0>} : vector<64x64xi32>
    %165 = tpu.iota {dimensions = array<i32: 1>} : vector<64x64xi32>
    %c1_i32_69 = arith.constant 1 : i32
    %166 = vector.broadcast %c1_i32_69 : i32 to vector<64x64xi32>
    %167 = arith.addi %165, %166 : vector<64x64xi32>
    %168 = arith.cmpi eq, %164, %167 : vector<64x64xi32>
    %169 = arith.extui %168 : vector<64x64xi1> to vector<64x64xi32>
    %170 = arith.sitofp %169 : vector<64x64xi32> to vector<64x64xf32>
    %c1_i32_70 = arith.constant 1 : i32
    %171 = vector.broadcast %c1_i32_70 : i32 to vector<64x64xi32>
    %172 = arith.addi %164, %171 : vector<64x64xi32>
    %173 = arith.cmpi eq, %165, %172 : vector<64x64xi32>
    %174 = arith.extui %173 : vector<64x64xi1> to vector<64x64xi32>
    %175 = arith.sitofp %174 : vector<64x64xi32> to vector<64x64xf32>
    %cst_71 = arith.constant dense<0.000000e+00> : vector<64x128xf32>
    %176 = tpu.matmul %170, %163, %cst_71 {dimension_numbers = #tpu.dot_dimension_numbers<[1], [0], [0], [1], [0, 0, 1, 1], [], []>} : vector<64x64xf32>, vector<64x128xf32>, vector<64x128xf32> -> vector<64x128xf32>
    %cst_72 = arith.constant dense<0.000000e+00> : vector<64x128xf32>
    %177 = tpu.matmul %175, %163, %cst_72 {dimension_numbers = #tpu.dot_dimension_numbers<[1], [0], [0], [1], [0, 0, 1, 1], [], []>} : vector<64x64xf32>, vector<64x128xf32>, vector<64x128xf32> -> vector<64x128xf32>
    %178 = tpu.concatenate %176, %163, %177 in 1 : vector<64x128xf32>, vector<64x128xf32>, vector<64x128xf32> -> vector<64x384xf32>
    %c0_73 = arith.constant 0 : index
    %c0_74 = arith.constant 0 : index
    %179 = vector.load %arg16[%c0_73, %c0_74] : memref<384x128xf32, #tpu.memory_space<vmem>>, vector<384x128xf32>
    %cst_75 = arith.constant dense<0.000000e+00> : vector<64x128xf32>
    %180 = tpu.matmul %178, %179, %cst_75 {dimension_numbers = #tpu.dot_dimension_numbers<[1], [0], [0], [1], [0, 0, 1, 1], [], []>} : vector<64x384xf32>, vector<384x128xf32>, vector<64x128xf32> -> vector<64x128xf32>
    %c0_76 = arith.constant 0 : index
    %c0_77 = arith.constant 0 : index
    %181 = vector.load %arg17[%c0_76, %c0_77] : memref<1x128xf32, #tpu.memory_space<vmem>>, vector<1x128xf32>
    %182 = vector.broadcast %181 : vector<1x128xf32> to vector<64x128xf32>
    %183 = arith.addf %180, %182 : vector<64x128xf32>
    %cst_78 = arith.constant 0.000000e+00 : f32
    %184 = vector.broadcast %cst_78 : f32 to vector<64x128xf32>
    %185 = arith.maximumf %183, %184 : vector<64x128xf32>
    %c0_79 = arith.constant 0 : index
    %c0_80 = arith.constant 0 : index
    %c0_81 = arith.constant 0 : index
    %186 = vector.load %arg18[%c0_79, %c0_80, %c0_81] : memref<1x64x128xf32, #tpu.memory_space<vmem>>, vector<1x64x128xf32>
    %187 = vector.shape_cast %186 : vector<1x64x128xf32> to vector<64x128xf32>
    %188 = vector.shape_cast %185 : vector<64x128xf32> to vector<1x64x128xf32>
    tpu.vector_store %arg18[%c0_79, %c0_80, %c0_81], %188 {strides = array<i32>} : memref<1x64x128xf32, #tpu.memory_space<vmem>>, vector<1x64x128xf32>,
    return
  }
  func.func @transform_0(%arg0: i32) -> (i32, i32, i32) {
    %c0_i32 = arith.constant 0 : i32
    %c0_i32_0 = arith.constant 0 : i32
    %c0_i32_1 = arith.constant 0 : i32
    return %arg0, %c0_i32, %c0_i32_0 : i32, i32, i32
  }
  func.func @transform_1(%arg0: i32) -> (i32, i32) {
    %c0_i32 = arith.constant 0 : i32
    %c0_i32_0 = arith.constant 0 : i32
    %c0_i32_1 = arith.constant 0 : i32
    return %c0_i32, %c0_i32_0 : i32, i32
  }
  func.func @transform_2(%arg0: i32) -> (i32, i32) {
    %c0_i32 = arith.constant 0 : i32
    %c0_i32_0 = arith.constant 0 : i32
    %c0_i32_1 = arith.constant 0 : i32
    return %c0_i32, %c0_i32_0 : i32, i32
  }
  func.func @transform_3(%arg0: i32) -> (i32, i32) {
    %c0_i32 = arith.constant 0 : i32
    %c0_i32_0 = arith.constant 0 : i32
    %c0_i32_1 = arith.constant 0 : i32
    return %c0_i32, %c0_i32_0 : i32, i32
  }
  func.func @transform_4(%arg0: i32) -> (i32, i32) {
    %c0_i32 = arith.constant 0 : i32
    %c0_i32_0 = arith.constant 0 : i32
    %c0_i32_1 = arith.constant 0 : i32
    return %c0_i32, %c0_i32_0 : i32, i32
  }
  func.func @transform_5(%arg0: i32) -> (i32, i32) {
    %c0_i32 = arith.constant 0 : i32
    %c0_i32_0 = arith.constant 0 : i32
    %c0_i32_1 = arith.constant 0 : i32
    return %c0_i32, %c0_i32_0 : i32, i32
  }
  func.func @transform_6(%arg0: i32) -> (i32, i32) {
    %c0_i32 = arith.constant 0 : i32
    %c0_i32_0 = arith.constant 0 : i32
    %c0_i32_1 = arith.constant 0 : i32
    return %c0_i32, %c0_i32_0 : i32, i32
  }
  func.func @transform_7(%arg0: i32) -> (i32, i32) {
    %c0_i32 = arith.constant 0 : i32
    %c0_i32_0 = arith.constant 0 : i32
    %c0_i32_1 = arith.constant 0 : i32
    return %c0_i32, %c0_i32_0 : i32, i32
  }
  func.func @transform_8(%arg0: i32) -> (i32, i32) {
    %c0_i32 = arith.constant 0 : i32
    %c0_i32_0 = arith.constant 0 : i32
    %c0_i32_1 = arith.constant 0 : i32
    return %c0_i32, %c0_i32_0 : i32, i32
  }
  func.func @transform_9(%arg0: i32) -> (i32, i32) {
    %c0_i32 = arith.constant 0 : i32
    %c0_i32_0 = arith.constant 0 : i32
    %c0_i32_1 = arith.constant 0 : i32
    return %c0_i32, %c0_i32_0 : i32, i32
  }
  func.func @transform_10(%arg0: i32) -> (i32, i32) {
    %c0_i32 = arith.constant 0 : i32
    %c0_i32_0 = arith.constant 0 : i32
    %c0_i32_1 = arith.constant 0 : i32
    return %c0_i32, %c0_i32_0 : i32, i32
  }
  func.func @transform_11(%arg0: i32) -> (i32, i32) {
    %c0_i32 = arith.constant 0 : i32
    %c0_i32_0 = arith.constant 0 : i32
    %c0_i32_1 = arith.constant 0 : i32
    return %c0_i32, %c0_i32_0 : i32, i32
  }
  func.func @transform_12(%arg0: i32) -> (i32, i32) {
    %c0_i32 = arith.constant 0 : i32
    %c0_i32_0 = arith.constant 0 : i32
    %c0_i32_1 = arith.constant 0 : i32
    return %c0_i32, %c0_i32_0 : i32, i32
  }
  func.func @transform_13(%arg0: i32) -> (i32, i32) {
    %c0_i32 = arith.constant 0 : i32
    %c0_i32_0 = arith.constant 0 : i32
    %c0_i32_1 = arith.constant 0 : i32
    return %c0_i32, %c0_i32_0 : i32, i32
  }
  func.func @transform_14(%arg0: i32) -> (i32, i32) {
    %c0_i32 = arith.constant 0 : i32
    %c0_i32_0 = arith.constant 0 : i32
    %c0_i32_1 = arith.constant 0 : i32
    return %c0_i32, %c0_i32_0 : i32, i32
  }
  func.func @transform_15(%arg0: i32) -> (i32, i32) {
    %c0_i32 = arith.constant 0 : i32
    %c0_i32_0 = arith.constant 0 : i32
    %c0_i32_1 = arith.constant 0 : i32
    return %c0_i32, %c0_i32_0 : i32, i32
  }
  func.func @transform_16(%arg0: i32) -> (i32, i32) {
    %c0_i32 = arith.constant 0 : i32
    %c0_i32_0 = arith.constant 0 : i32
    %c0_i32_1 = arith.constant 0 : i32
    return %c0_i32, %c0_i32_0 : i32, i32
  }
  func.func @transform_17(%arg0: i32) -> (i32, i32, i32) {
    %c0_i32 = arith.constant 0 : i32
    %c0_i32_0 = arith.constant 0 : i32
    %c0_i32_1 = arith.constant 0 : i32
    return %arg0, %c0_i32, %c0_i32_0 : i32, i32, i32
  }
}

</mosaic_0001>

<bundles_post_ra>
// kernel: tpu_custom_call.1
= control target key start
LH: loop header
LB: loop body
LE: loop exit
PB: predicated region body
PF: predicated region fallthrough
CT: control target
= control target key end

     0   :  { %s6536_s0 = inlined_call_operand.hbm [shape: f32[2,4,128], index: 0, kind: input, shape index: {}]   ;;  %s6537_s1 = inlined_call_operand.hbm [shape: f32[128,256], index: 1, kind: input, shape index: {}]   ;;  %s6538_s2 = inlined_call_operand.vmem [shape: f32[1,256], index: 2, kind: input, shape index: {}]   ;;  %s6539_s3 = inlined_call_operand.hbm [shape: f32[384,128], index: 3, kind: input, shape index: {}]   ;;  %s6540_s4 = inlined_call_operand.vmem [shape: f32[1,128], index: 4, kind: input, shape index: {}]   ;;  %s6541_s5 = inlined_call_operand.hbm [shape: f32[128,256], index: 5, kind: input, shape index: {}]   ;;  %s6542_s6 = inlined_call_operand.vmem [shape: f32[1,256], index: 6, kind: input, shape index: {}]   ;;  %s6543_s7 = inlined_call_operand.hbm [shape: f32[384,128], index: 7, kind: input, shape index: {}]   ;;  %s6544_s8 = inlined_call_operand.vmem [shape: f32[1,128], index: 8, kind: input, shape index: {}]   ;;  %s6545_s9 = inlined_call_operand.hbm [shape: f32[128,256], index: 9, kind: input, shape index: {}]   ;;  %s6546_s10 = inlined_call_operand.vmem [shape: f32[1,256], index: 10, kind: input, shape index: {}]   ;;  %s6547_s11 = inlined_call_operand.hbm [shape: f32[384,128], index: 11, kind: input, shape index: {}]   ;;  %s6548_s12 = inlined_call_operand.vmem [shape: f32[1,128], index: 12, kind: input, shape index: {}]   ;;  %s6549_s13 = inlined_call_operand.hbm [shape: f32[128,256], index: 13, kind: input, shape index: {}]   ;;  %s6550_s14 = inlined_call_operand.vmem [shape: f32[1,256], index: 14, kind: input, shape index: {}]   ;;  %s6551_s15 = inlined_call_operand.hbm [shape: f32[384,128], index: 15, kind: input, shape index: {}]   ;;  %s6552_s16 = inlined_call_operand.vmem [shape: f32[1,128], index: 16, kind: input, shape index: {}]   ;;  %s6553_s17 = inlined_call_operand.hbm [shape: f32[2,64,128], index: 17, kind: output, shape index: {}]  }
   0x1   :  { %6560 = sst [smem:[#allocation24_spill]] %s6536_s0 }
   0x2   :  { %6561 = sst [smem:[#allocation25_spill]] %s6537_s1 }
   0x3   :  { %6562 = sst [smem:[#allocation26_spill]] %s6540_s4 }
   0x4   :  { %6563 = sst [smem:[#allocation27_spill]] %s6541_s5 }
   0x5   :  { %6564 = sst [smem:[#allocation28_spill]] %s6542_s6 }
   0x6   :  { %6565 = sst [smem:[#allocation29_spill]] %s6544_s8 }
   0x7   :  { %6566 = sst [smem:[#allocation30_spill]] %s6545_s9 }
   0x8   :  { %6567 = sst [smem:[#allocation31_spill]] %s6546_s10 }
   0x9   :  { %6568 = sst [smem:[#allocation32_spill]] %s6548_s12 }
   0xa   :  { %6569 = sst [smem:[#allocation33_spill]] %s6550_s14 }
   0xb   :  { %6570 = sst [smem:[#allocation34_spill]] %s6552_s16 }
   0xc   :  { %6571 = sst [smem:[#allocation35_spill]] %s6553_s17 }
   0xd   :  { %22 = vsyncpa [#allocation3], 0 }
   0xe   :  { %24 = vsyncpa [#allocation3 + $0x1], 0 }
   0xf   :  { %25 = vsyncpa [#allocation6], 0 }
  0x10   :  { %26 = vsyncpa [#allocation9], 0 }
  0x11   :  { %27 = vsyncpa [#allocation12], 0 }
  0x12   :  { %28 = vsyncpa [#allocation15], 0 }
  0x13   :  { %29 = vsyncpa [#allocation4], 0 }
  0x14   :  { %31 = vsyncpa [#allocation4 + $0x1], 0  ;;  %s5743_s24 = smov 0   ;;  %s5745_s25 = smov 0  }
  0x15   :  { %s5747_s26 = smov 0   ;;  %s5749_s27 = smov 0  }
  0x16 LB: > { %s5634_s28 = smov [#allocation5]   ;;  %s5764_s0 = sadd.s32 4294967295, %s5632_s27   ;;  %s5632_s27 = sphi %s5749_s27, %s6608_s27   ;;  %s5628_s26 = sphi %s5747_s26, %s6607_s26   ;;  %s5624_s25 = sphi %s5745_s25, %s6606_s25   ;;  %s5620_s24 = sphi %s5743_s24, %s6605_s24  }
  0x17   : > { %s442_s29 = sshll.u32 %s5634_s28, 4  ;;  %p3864_p0 = scmp.ge.s32.totalorder %s5632_s27, 1  ;;  %s5769_s29 = int_to_ptr.vmem [resolvable:$true] %s442_s29 }
  0x18   : > { %p6557_p1 = scmp.eq.s32.totalorder %s5764_s0, 0  ;;  %p430_p2 = scmp.lt.s32.totalorder %s5632_s27, 3 }
  0x19   : > { %s5635_s18 = smov [#allocation8]   ;;  %s5636_s20 = smov [#allocation11]  }
  0x1a   : > { %p5771_p3 = pnand %p3864_p0, %p430_p2  ;;  %s474_s19 = sshll.u32 %s5635_s18, 4  ;;  %s5784_s19 = int_to_ptr.vmem [resolvable:$true] %s474_s19 }
  0x1b   : > { %s506_s21 = sshll.u32 %s5636_s20, 4  ;;  %s6574_s28 = sld [smem:[#allocation25_spill]]  ;;  %s5786_s21 = int_to_ptr.vmem [resolvable:$true] %s506_s21 }
  0x1c   : > { %s6572_s30 = scalar_select %p5771_p3, 1, 0 }
  0x1d   : > { %p5196_p5 = pneg %p5771_p3 }
  0x1f   : > { %p5780_p6 = pnand %p5196_p5, %p6557_p1 }
  0x21   : > { %s5296_s17 = scalar_lea.hbm %s6574_s28, 4096  ;;  %p5796_p8 = pneg %p5780_p6 }
  0x22   : > { %p5297_p7 = scmp.ne.s32.totalorder %s6574_s28, %s5296_s17  ;;  %p5303_p11 = scmp.lt.u32.totalorder %s5296_s17, %s6574_s28 }
  0x24   : > { %p5299_p9 = pnand %p5796_p8, %p5297_p7 }
  0x26   : > { %p5300_p10 = pneg %p5299_p9 }
  0x28   : > { %p5305_p12 = pnand %p5303_p11, %p5300_p10 }
  0x2a   : > { %5308 = shalt.err (!%p5305_p12)
}
  0x2b   : > { %s5309_s14 = scalar_lea.vmem %s5769_s29, 4096  ;;  %p5317_p5 = scmp.lt.s32.totalorder %s5769_s29, %s5769_s29 }
  0x2c   : > { %p5310_p13 = scmp.ne.s32.totalorder %s5769_s29, %s5309_s14  ;;  %p5318_p4 = scmp.lt.s32.totalorder %s5309_s14, %s5309_s14 }
  0x2e   : > { %p5312_p0 = pnand %p5310_p13, %p5796_p8  ;;  %p5319_p7 = por %p5318_p4, %p5317_p5 }
  0x30   : > { %p5313_p2 = pneg %p5312_p0 }
  0x32   : > { %p5320_p9 = pnand %p5319_p7, %p5313_p2 }
  0x34   : > { %5323 = shalt.err (!%p5320_p9)
}
  0x35   : > { %s5637_s16 = smov 256   ;;  %s5638_s12 = smov 16  }
  0x36   : > { %5199 = dma.hbm_to_vmem [thread:$0]  (!%p5780_p6), %s6574_s28, 4096, %s5769_s29, [#allocation6], %s5637_s16, %s5637_s16, %s5638_s12  }
  0x37   : > { %s6576_s5 = sld [smem:[#allocation27_spill]] }
  0x3d   : > { %s5324_s14 = scalar_lea.hbm %s6576_s5, 4096 }
  0x3e   : > { %p5325_p4 = scmp.ne.s32.totalorder %s6576_s5, %s5324_s14  ;;  %p5331_p12 = scmp.lt.u32.totalorder %s5324_s14, %s6576_s5 }
  0x40   : > { %p5327_p10 = pnand %p5325_p4, %p5796_p8 }
  0x42   : > { %p5328_p11 = pneg %p5327_p10 }
  0x44   : > { %p5333_p13 = pnand %p5331_p12, %p5328_p11 }
  0x46   : > { %5336 = shalt.err (!%p5333_p13)
}
  0x47   : > { %s5337_s29 = scalar_lea.vmem %s5784_s19, 4096  ;;  %p5345_p7 = scmp.lt.s32.totalorder %s5784_s19, %s5784_s19 }
  0x48   : > { %p5338_p0 = scmp.ne.s32.totalorder %s5784_s19, %s5337_s29  ;;  %p5346_p9 = scmp.lt.s32.totalorder %s5337_s29, %s5337_s29 }
  0x4a   : > { %p5340_p2 = pnand %p5338_p0, %p5796_p8  ;;  %p5347_p4 = por %p5346_p9, %p5345_p7 }
  0x4c   : > { %p5341_p5 = pneg %p5340_p2 }
  0x4e   : > { %p5348_p10 = pnand %p5347_p4, %p5341_p5 }
  0x50   : > { %5351 = shalt.err (!%p5348_p10)
}
  0x51   : > { %5205 = dma.hbm_to_vmem [thread:$0]  (!%p5780_p6), %s6576_s5, 4096, %s5784_s19, [#allocation9], %s5637_s16, %s5637_s16, %s5638_s12  }
  0x52   : > { %s6577_s9 = sld [smem:[#allocation30_spill]] }
  0x58   : > { %s5352_s17 = scalar_lea.hbm %s6577_s9, 4096 }
  0x59   : > { %p5353_p11 = scmp.ne.s32.totalorder %s6577_s9, %s5352_s17  ;;  %p5359_p0 = scmp.lt.u32.totalorder %s5352_s17, %s6577_s9 }
  0x5b   : > { %p5355_p12 = pnand %p5353_p11, %p5796_p8 }
  0x5d   : > { %p5356_p13 = pneg %p5355_p12 }
  0x5f   : > { %p5361_p2 = pnand %p5359_p0, %p5356_p13 }
  0x61   : > { %5364 = shalt.err (!%p5361_p2)
}
  0x62   : > { %s5365_s19 = scalar_lea.vmem %s5786_s21, 4096  ;;  %p5373_p4 = scmp.lt.s32.totalorder %s5786_s21, %s5786_s21 }
  0x63   : > { %p5366_p5 = scmp.ne.s32.totalorder %s5786_s21, %s5365_s19  ;;  %p5374_p10 = scmp.lt.s32.totalorder %s5365_s19, %s5365_s19 }
  0x65   : > { %p5368_p7 = pnand %p5366_p5, %p5796_p8  ;;  %p5375_p11 = por %p5374_p10, %p5373_p4 }
  0x67   : > { %p5369_p9 = pneg %p5368_p7 }
  0x69   : > { %p5376_p12 = pnand %p5375_p11, %p5369_p9 }
  0x6b   : > { %5379 = shalt.err (!%p5376_p12)
}
  0x6c   : > { %5211 = dma.hbm_to_vmem [thread:$0]  (!%p5780_p6), %s6577_s9, 4096, %s5786_s21, [#allocation12], %s5637_s16, %s5637_s16, %s5638_s12  }
  0x6d   : > { %s5639_s6 = smov [#allocation14]   ;;  %s5640_s10 = smov [#allocation7]  }
  0x6e   : > { %s538_s8 = sshll.u32 %s5639_s6, 4  ;;  %s458_s17 = sshll.u32 %s5640_s10, 4  ;;  %s539_s8 = int_to_ptr.vmem [resolvable:$true] %s538_s8  ;;  %s459_s17 = int_to_ptr.vmem [resolvable:$true] %s458_s17 }
  0x6f   : > { %s5380_s20 = scalar_lea.hbm %s6549_s13, 4096 }
  0x70   : > { %p5381_p13 = scmp.ne.s32.totalorder %s6549_s13, %s5380_s20  ;;  %p5387_p5 = scmp.lt.u32.totalorder %s5380_s20, %s6549_s13 }
  0x72   : > { %p5383_p0 = pnand %p5381_p13, %p5796_p8 }
  0x74   : > { %p5384_p2 = pneg %p5383_p0 }
  0x76   : > { %p5389_p7 = pnand %p5387_p5, %p5384_p2 }
  0x78   : > { %5392 = shalt.err (!%p5389_p7)
}
  0x79   : > { %s5393_s21 = scalar_lea.vmem %s539_s8, 4096  ;;  %p5401_p11 = scmp.lt.s32.totalorder %s539_s8, %s539_s8 }
  0x7a   : > { %p5394_p9 = scmp.ne.s32.totalorder %s539_s8, %s5393_s21  ;;  %p5402_p12 = scmp.lt.s32.totalorder %s5393_s21, %s5393_s21 }
  0x7c   : > { %p5396_p4 = pnand %p5394_p9, %p5796_p8  ;;  %p5403_p1 = por %p5402_p12, %p5401_p11 }
  0x7e   : > { %p5397_p10 = pneg %p5396_p4 }
  0x80   : > { %p5404_p3 = pnand %p5403_p1, %p5397_p10 }
  0x82   : > { %5407 = shalt.err (!%p5404_p3)
}
  0x83   : > { %5217 = dma.hbm_to_vmem [thread:$0]  (!%p5780_p6), %s6549_s13, 4096, %s539_s8, [#allocation15], %s5637_s16, %s5637_s16, %s5638_s12  }
  0x84   : > { %s5408_s22 = scalar_lea.hbm %s6539_s3, 6144 }
  0x85   : > { %p5409_p1 = scmp.ne.s32.totalorder %s6539_s3, %s5408_s22  ;;  %p5415_p0 = scmp.lt.u32.totalorder %s5408_s22, %s6539_s3 }
  0x87   : > { %p5411_p3 = pnand %p5409_p1, %p5796_p8 }
  0x89   : > { %p5412_p13 = pneg %p5411_p3 }
  0x8b   : > { %p5417_p2 = pnand %p5415_p0, %p5412_p13 }
  0x8d   : > { %5420 = shalt.err (!%p5417_p2)
}
  0x8e   : > { %s5421_s29 = scalar_lea.vmem %s459_s17, 6144  ;;  %p5429_p4 = scmp.lt.s32.totalorder %s459_s17, %s459_s17 }
  0x8f   : > { %p5422_p5 = scmp.ne.s32.totalorder %s459_s17, %s5421_s29  ;;  %p5430_p10 = scmp.lt.s32.totalorder %s5421_s29, %s5421_s29 }
  0x91   : > { %p5424_p7 = pnand %p5422_p5, %p5796_p8  ;;  %p5431_p11 = por %p5430_p10, %p5429_p4 }
  0x93   : > { %p5425_p9 = pneg %p5424_p7 }
  0x95   : > { %p5432_p12 = pnand %p5431_p11, %p5425_p9 }
  0x97   : > { %5435 = shalt.err (!%p5432_p12)
}
  0x98   : > { %s5641_s16 = smov 128   ;;  %s5642_s12 = smov 8  }
  0x99   : > { %5202 = dma.hbm_to_vmem [thread:$0]  (!%p5780_p6), %s6539_s3, 6144, %s459_s17, [#allocation6], %s5641_s16, %s5641_s16, %s5642_s12  }
  0x9a   : > { %s5643_s5 = smov [#allocation10]   ;;  %s5644_s6 = smov [#allocation13]  }
  0x9b   : > { %s490_s4 = sshll.u32 %s5643_s5, 4  ;;  %s522_s10 = sshll.u32 %s5644_s6, 4  ;;  %s491_s4 = int_to_ptr.vmem [resolvable:$true] %s490_s4  ;;  %s523_s10 = int_to_ptr.vmem [resolvable:$true] %s522_s10 }
  0x9c   : > { %s5436_s20 = scalar_lea.hbm %s6543_s7, 6144 }
  0x9d   : > { %p5437_p1 = scmp.ne.s32.totalorder %s6543_s7, %s5436_s20  ;;  %p5443_p0 = scmp.lt.u32.totalorder %s5436_s20, %s6543_s7 }
  0x9f   : > { %p5439_p3 = pnand %p5437_p1, %p5796_p8 }
  0xa1   : > { %p5440_p13 = pneg %p5439_p3 }
  0xa3   : > { %p5445_p2 = pnand %p5443_p0, %p5440_p13 }
  0xa5   : > { %5448 = shalt.err (!%p5445_p2)
}
  0xa6   : > { %s5449_s17 = scalar_lea.vmem %s491_s4, 6144  ;;  %p5457_p4 = scmp.lt.s32.totalorder %s491_s4, %s491_s4 }
  0xa7   : > { %p5450_p5 = scmp.ne.s32.totalorder %s491_s4, %s5449_s17  ;;  %p5458_p10 = scmp.lt.s32.totalorder %s5449_s17, %s5449_s17 }
  0xa9   : > { %p5452_p7 = pnand %p5450_p5, %p5796_p8  ;;  %p5459_p11 = por %p5458_p10, %p5457_p4 }
  0xab   : > { %p5453_p9 = pneg %p5452_p7 }
  0xad   : > { %p5460_p12 = pnand %p5459_p11, %p5453_p9 }
  0xaf   : > { %5463 = shalt.err (!%p5460_p12)
}
  0xb0   : > { %5208 = dma.hbm_to_vmem [thread:$0]  (!%p5780_p6), %s6543_s7, 6144, %s491_s4, [#allocation9], %s5641_s16, %s5641_s16, %s5642_s12  }
  0xb1   : > { %s5464_s6 = scalar_lea.hbm %s6547_s11, 6144 }
  0xb2   : > { %p5465_p1 = scmp.ne.s32.totalorder %s6547_s11, %s5464_s6  ;;  %p5471_p0 = scmp.lt.u32.totalorder %s5464_s6, %s6547_s11 }
  0xb4   : > { %p5467_p3 = pnand %p5465_p1, %p5796_p8 }
  0xb6   : > { %p5468_p13 = pneg %p5467_p3 }
  0xb8   : > { %p5473_p2 = pnand %p5471_p0, %p5468_p13 }
  0xba   : > { %5476 = shalt.err (!%p5473_p2)
}
  0xbb   : > { %s5477_s19 = scalar_lea.vmem %s523_s10, 6144  ;;  %p5485_p4 = scmp.lt.s32.totalorder %s523_s10, %s523_s10 }
  0xbc   : > { %p5478_p5 = scmp.ne.s32.totalorder %s523_s10, %s5477_s19  ;;  %p5486_p10 = scmp.lt.s32.totalorder %s5477_s19, %s5477_s19 }
  0xbe   : > { %p5480_p7 = pnand %p5478_p5, %p5796_p8  ;;  %p5487_p11 = por %p5486_p10, %p5485_p4 }
  0xc0   : > { %p5481_p9 = pneg %p5480_p7 }
  0xc2   : > { %p5488_p12 = pnand %p5487_p11, %p5481_p9 }
  0xc4   : > { %5491 = shalt.err (!%p5488_p12)
}
  0xc5   : > { %5214 = dma.hbm_to_vmem [thread:$0]  (!%p5780_p6), %s6547_s11, 6144, %s523_s10, [#allocation12], %s5641_s16, %s5641_s16, %s5642_s12  }
  0xc6   : > { %s5645_s17 = smov [#allocation16]   ;;  %s5492_s5 = scalar_lea.hbm %s6551_s15, 6144 }
  0xc7   : > { %s554_s9 = sshll.u32 %s5645_s17, 4  ;;  %p5493_p1 = scmp.ne.s32.totalorder %s6551_s15, %s5492_s5  ;;  %s555_s9 = int_to_ptr.vmem [resolvable:$true] %s554_s9 }
  0xc8   : > { %p5499_p0 = scmp.lt.u32.totalorder %s5492_s5, %s6551_s15 }
  0xc9   : > { %p5495_p3 = pnand %p5493_p1, %p5796_p8 }
  0xcb   : > { %p5496_p13 = pneg %p5495_p3 }
  0xcd   : > { %p5501_p2 = pnand %p5499_p0, %p5496_p13 }
  0xcf   : > { %5504 = shalt.err (!%p5501_p2)
}
  0xd0   : > { %s5505_s10 = scalar_lea.vmem %s555_s9, 6144  ;;  %p5513_p4 = scmp.lt.s32.totalorder %s555_s9, %s555_s9 }
  0xd1   : > { %p5506_p5 = scmp.ne.s32.totalorder %s555_s9, %s5505_s10  ;;  %p5514_p10 = scmp.lt.s32.totalorder %s5505_s10, %s5505_s10 }
  0xd3   : > { %p5508_p7 = pnand %p5506_p5, %p5796_p8  ;;  %p5515_p11 = por %p5514_p10, %p5513_p4 }
  0xd5   : > { %p5509_p9 = pneg %p5508_p7 }
  0xd7   : > { %p5516_p12 = pnand %p5515_p11, %p5509_p9 }
  0xd9   : > { %5519 = shalt.err (!%p5516_p12)
}
  0xda   : > { %5220 = dma.hbm_to_vmem [thread:$0]  (!%p5780_p6), %s6551_s15, 6144, %s555_s9, [#allocation15], %s5641_s16, %s5641_s16, %s5642_s12  }
  0xdb   : > { %s3863_s1 = sadd.s32 4294967294, %s5632_s27   ;;  %s5979_s18 = sadd.s32 1, %s5632_s27  }
  0xdc   : > { %s41_s4 = ssub.s32 %s5632_s27, %s5979_s18  ;;  %s44_s29 = sadd.s32 1, %s5628_s26 }
  0xdd   : > { %p42_p8 = scmp.eq.s32.totalorder %s41_s4, 0  ;;  %p51_p1 = scmp.ne.s32.totalorder %s5628_s26, %s5624_s25 }
  0xde   : > { %p52_p3 = scmp.eq.s32.totalorder %s5632_s27, 0  ;;  %p57_p13 = scmp.ne.s32.totalorder %s5624_s25, %s5620_s24 }
  0xdf   : > { %s5990_s17 = scalar_select %p42_p8, %s5628_s26, %s44_s29  }
  0xe0   : > { %p5992_p0 = por %p52_p3, %p51_p1  ;;  %p6579_p2 = scmp.eq.s32.totalorder %s5764_s0, 0 }
  0xe1   : > { %p417_p5 = scmp.eq.s32.totalorder %s5764_s0, 1  ;;  %p423_p7 = scmp.eq.s32.totalorder %s3863_s1, 1 }
  0xe2   : > { %p5998_p6 = por %p6579_p2, %p57_p13  ;;  %p5237_p9 = scmp.lt.s32.totalorder %s5632_s27, 2 }
  0xe3   : > { %s571_s12 = sand.u32 1, %s5628_s26   ;;  %p6005_p4 = por %p417_p5, %p51_p1 }
  0xe4   : > { %p6009_p10 = por %p423_p7, %p57_p13  ;;  %s3874_s5 = sshll.u32 %s571_s12, 2 }
  0xe5   : > { %s6581_s9 = scalar_select %p6005_p4, 1, 0 }
  0xe6   : > { %s6582_s21 = scalar_select %p6009_p10, 1, 0 }
  0xe7   : > { %s3875_s6 = sshll.u32 %s5632_s27, 6  ;;  %s6583_s20 = sld [smem:[#allocation24_spill]] }
  0xe8   : > { %s575_s14 = scalar_lea.vmem [#allocation2], %s3874_s5  ;;  %p6023_p11 = pnand %p5237_p9, %p5992_p0 }
  0xe9   : > { %s582_s19 = sshll.u32 %s575_s14, 4  ;;  %s572_s4 = scalar_lea.sflag [#allocation3], %s571_s12  ;;  %s6019_s19 = int_to_ptr.vmem [resolvable:$true] %s582_s19 }
  0xea   : > { %p5522_p8 = pneg %p6023_p11 }
  0xed   : > { %s6017_s10 = scalar_lea.hbm %s6583_s20, %s3875_s6  ;;  %s5525_s22 = scalar_lea.hbm %s6583_s20, 128 }
  0xee   : > { %s5520_s29 = scalar_lea.hbm %s6017_s10, 64  ;;  %p5526_p13 = scmp.lt.u32.totalorder %s6017_s10, %s6583_s20 }
  0xef   : > { %p5521_p12 = scmp.ne.s32.totalorder %s6017_s10, %s5520_s29  ;;  %p5527_p0 = scmp.lt.u32.totalorder %s5525_s22, %s5520_s29 }
  0xf0   : > { %p5529_p5 = scmp.lt.u32.totalorder %s5520_s29, %s6017_s10 }
  0xf1   : > { %p5523_p1 = pnand %p5522_p8, %p5521_p12  ;;  %p5528_p2 = por %p5527_p0, %p5526_p13 }
  0xf3   : > { %p5524_p3 = pneg %p5523_p1  ;;  %p5530_p7 = por %p5529_p5, %p5528_p2 }
  0xf5   : > { %p5531_p9 = pnand %p5530_p7, %p5524_p3 }
  0xf7   : > { %5534 = shalt.err (!%p5531_p9)
}
  0xf8   : > { %s5535_s12 = scalar_lea.vmem %s6019_s19, 64  ;;  %s5646_s14 = smov [#allocation2]  }
  0xf9   : > { %p5536_p12 = scmp.ne.s32.totalorder %s6019_s19, %s5535_s12  ;;  %s5540_s5 = sshll.u32 %s5646_s14, 4  ;;  %s5541_s5 = int_to_ptr.vmem [resolvable:$false] %s5540_s5 }
  0xfa   : > { %s5542_s6 = scalar_lea.vmem %s5541_s5, 128  ;;  %p5543_p4 = scmp.lt.s32.totalorder %s6019_s19, %s5541_s5 }
  0xfb   : > { %p5538_p1 = pnand %p5536_p12, %p5522_p8  ;;  %p5544_p13 = scmp.lt.s32.totalorder %s5542_s6, %s5535_s12 }
  0xfd   : > { %p5539_p10 = pneg %p5538_p1  ;;  %p5545_p0 = por %p5544_p13, %p5543_p4 }
  0xff   : > { %p5546_p2 = pnand %p5545_p0, %p5539_p10 }
 0x101   : > { %5549 = shalt.err (!%p5546_p2)
}
 0x102   : > { %5224 = dma.hbm_to_vmem [thread:$0]  (!%p6023_p11), %s6017_s10, 64, %s6019_s19, %s572_s4  }
 0x103   : > { %p6585_p3 = scmp.ne.s32.totalorder %s6572_s30, 0 }
 0x104   : > { %s6055_s29 = sand.u32 (!%p6585_p3), 1, %s5624_s25  }
 0x105   : > { %591 = sbr.rel (%p6585_p3) target bundleno = 3911 (0xf47), region = 88  ;;  %s3877_s22 = sshll.u32 (!%p6585_p3), %s6055_s29, 2 }
 0x106   : > { %s594_s8 = scalar_lea.sflag (!%p6585_p3), [#allocation3], %s6055_s29  ;;  %s6059_s23 = scalar_lea.vmem (!%p6585_p3), [#allocation2], %s3877_s22 }
 0x10c   : > { %5595 = dma.done.wait (%p5998_p6), %s594_s8, 64  }
 0x10d   : > { %5597 = vsyncadd (%p5998_p6), %s594_s8, 4294967232  ;;  %p6586_p4 = scmp.eq.s32.totalorder %s5764_s0, 0 }
 0x10f   : > { %5599 = dma.done.wait (%p6586_p4), [#allocation6], 10240   ;;  %p6587_p10 = pmov %p6586_p4 }
 0x110   : > { %p6588_p11 = pmov %p6586_p4 }
 0x111   : > { %5601 = vsyncadd (%p6587_p10), [#allocation6], 4294957056 }
 0x112   : > { %5603 = dma.done.wait (%p6588_p11), [#allocation9], 10240   ;;  %p6589_p8 = pmov %p6586_p4 }
 0x113   : > { %p6590_p5 = pmov %p6586_p4 }
 0x114   : > { %5605 = vsyncadd (%p6589_p8), [#allocation9], 4294957056 }
 0x115   : > { %5607 = dma.done.wait (%p6590_p5), [#allocation12], 10240   ;;  %p6591_p7 = pmov %p6586_p4 }
 0x116   : > { %p6592_p6 = pmov %p6586_p4 }
 0x117   : > { %5609 = vsyncadd (%p6591_p7), [#allocation12], 4294957056 }
 0x118   : > { %5611 = dma.done.wait (%p6592_p6), [#allocation15], 10240   ;;  %p6593_p9 = pmov %p6586_p4 }
 0x119   : > { %v5647_v0 = vmov 0.0   ;;  %v682_v1 = vld [vmem:[#allocation5 + $0x8] sm:$0xff]  ;;  %v684_v2 = vld [vmem:[#allocation5 + $0x18] sm:$0xff]  ;;  %v681_v3 = vld [vmem:[#allocation5] sm:$0xff]  ;;  %vm5648_vm0 = vmmov 0   ;;  %v715_v50 = vlaneseq  ;;  %vm812_vm3 = vcmask 1043456  }
 0x11a   : > { %5613 = vsyncadd (%p6593_p9), [#allocation15], 4294957056  ;;  %789 = vmatprep.mubr.f32.mxu0 %v5647_v0  ;;  %4354 = vmatprep.subr.mxu1 %v5647_v0  ;;  %v4689_v4 = vpack.c.bf16 %v684_v2, %v682_v1  ;;  %v683_v5 = vld [vmem:[#allocation5 + $0x10] sm:$0xff]  ;;  %v686_v6 = vld [vmem:[#allocation5 + $0x28] sm:$0xff]  ;;  %vm808_vm4 = vcmask 31744   ;;  %vm970_vm6 = vcmask 64512  }
 0x11b   : > { %v688_v7 = vld [vmem:[#allocation5 + $0x38] sm:$0xff]  ;;  %v4691_v8 = vpack.c.bf16 %v683_v5, %v681_v3  ;;  %v685_v10 = vld [vmem:[#allocation5 + $0x20] sm:$0xff]  ;;  %v687_v11 = vld [vmem:[#allocation5 + $0x30] sm:$0xff]  ;;  %4356 = vmatprep.mubr.msk.f32.mxu1 %vm5648_vm0, %v5647_v0  ;;  %v6089_v51 = vand.u32 127, %v715_v50  ;;  %v6091_v52 = vshrl.u32 %v715_v50, 7  ;;  %v5649_v3 = vmov 0.0|0.0  }
 0x11c   : > { %v4693_v9 = vpack.c.bf16 %v688_v7, %v686_v6  ;;  %v690_v12 = vld [vmem:[#allocation5 + $0x48] sm:$0xff]  ;;  %4690 = vmatprep.subr.bf16.mxu0 %v4689_v4  ;;  %v692_v13 = vld [vmem:[#allocation5 + $0x58] sm:$0xff]  ;;  %v4695_v14 = vpack.c.bf16 %v687_v11, %v685_v10  ;;  %v689_v16 = vld [vmem:[#allocation5 + $0x40] sm:$0xff]  ;;  %s6594_s1 = sld [smem:[#allocation26_spill]]  ;;  %s6595_s14 = sld [smem:[#allocation28_spill]]  ;;  %vm1602_vm10 = vcmask 130048  }
 0x11d   : > { %4692 = vmatpush1.bf16.msra.mxu0 %v4691_v8  ;;  %v4697_v15 = vpack.c.bf16 %v692_v13, %v690_v12  ;;  %v691_v17 = vld [vmem:[#allocation5 + $0x50] sm:$0xff]  ;;  %v694_v18 = vld [vmem:[#allocation5 + $0x68] sm:$0xff]  ;;  %v696_v19 = vld [vmem:[#allocation5 + $0x78] sm:$0xff]  ;;  %v6094_v53 = vmul.u32 2, %v6089_v51  ;;  %v6097_v54 = vsub.s32 0, %v6091_v52  ;;  %v6103_v56 = vsub.s32 1, %v6091_v52 }
 0x11e   : > { %4694 = vmatprep.subr.bf16.mxu0 %v4693_v9  ;;  %v4699_v20 = vpack.c.bf16 %v691_v17, %v689_v16  ;;  %v4701_v21 = vpack.c.bf16 %v696_v19, %v694_v18  ;;  %v693_v22 = vld [vmem:[#allocation5 + $0x60] sm:$0xff]  ;;  %v695_v23 = vld [vmem:[#allocation5 + $0x70] sm:$0xff]  ;;  %v698_v24 = vld [vmem:[#allocation5 + $0x88] sm:$0xff]  ;;  %s6596_s22 = sld [smem:[#allocation29_spill]]  ;;  %s6597_s30 = sld [smem:[#allocation31_spill]] }
 0x11f   : > { %v700_v25 = vld [vmem:[#allocation5 + $0x98] sm:$0xff]  ;;  %v4703_v26 = vpack.c.bf16 %v695_v23, %v693_v22  ;;  %v697_v28 = vld [vmem:[#allocation5 + $0x80] sm:$0xff]  ;;  %v699_v29 = vld [vmem:[#allocation5 + $0x90] sm:$0xff]  ;;  %v6106_v57 = vadd.s32 1, %v6094_v53  ;;  %vm801_vm1 = vcmp.eq.s32.totalorder %v6091_v52, %v6094_v53  ;;  %s6598_s19 = sld [smem:[#allocation32_spill]]  ;;  %s6599_s12 = sld [smem:[#allocation33_spill]] }
 0x120   : > { %v4705_v27 = vpack.c.bf16 %v700_v25, %v698_v24  ;;  %v702_v30 = vld [vmem:[#allocation5 + $0xa8] sm:$0xff]  ;;  %v704_v31 = vld [vmem:[#allocation5 + $0xb8] sm:$0xff]  ;;  %v4707_v32 = vpack.c.bf16 %v699_v29, %v697_v28  ;;  %v701_v34 = vld [vmem:[#allocation5 + $0xa0] sm:$0xff]  ;;  %v6115_v63 = vsel %vm801_vm1, 1.0, %v5647_v0  ;;  %v6128_v25 = vadd.s32 1, %v6089_v51  ;;  %s6600_s6 = sld [smem:[#allocation34_spill]] }
 0x121   : > { %4696 = vmatpush1.bf16.msra.mxu0 %v4695_v14  ;;  %v4709_v33 = vpack.c.bf16 %v704_v31, %v702_v30  ;;  %v703_v35 = vld [vmem:[#allocation5 + $0xb0] sm:$0xff]  ;;  %v706_v36 = vld [vmem:[#allocation5 + $0xc8] sm:$0xff]  ;;  %v708_v37 = vld [vmem:[#allocation5 + $0xd8] sm:$0xff]  ;;  %vm805_vm2 = vcmp.eq.s32.totalorder %v6091_v52, %v6106_v57  ;;  %vm2309_vm1 = vcmask 261120   ;;  %s3701_s4 = scalar_lea.sflag [#allocation4], %s6055_s29  ;;  %p6602_p1 = scmp.ne.s32.totalorder %s6581_s9, 0 }
 0x122   : > { %4698 = vmatprep.subr.bf16.mxu0 %v4697_v15  ;;  %v4711_v38 = vpack.c.bf16 %v703_v35, %v701_v34  ;;  %v4713_v39 = vpack.c.bf16 %v708_v37, %v706_v36  ;;  %v705_v40 = vld [vmem:[#allocation5 + $0xc0] sm:$0xff]  ;;  %v707_v41 = vld [vmem:[#allocation5 + $0xd0] sm:$0xff]  ;;  %v710_v42 = vld [vmem:[#allocation5 + $0xe8] sm:$0xff]  ;;  %v6118_v2 = vsel %vm805_vm2, 1.0, %v5647_v0  ;;  %vm963_vm5 = vcmp.eq.s32.totalorder %v6091_v52, %v6128_v25 }
 0x123   : > { %v712_v43 = vld [vmem:[#allocation5 + $0xf8] sm:$0xff]  ;;  %v4715_v44 = vpack.c.bf16 %v707_v41, %v705_v40  ;;  %v709_v46 = vld [vmem:[#allocation5 + $0xe0] sm:$0xff]  ;;  %v711_v47 = vld [vmem:[#allocation5 + $0xf0] sm:$0xff]  ;;  %v6134_v34 = vsel %vm963_vm5, 1.0, %v5647_v0 }
 0x124   : > { %v4717_v45 = vpack.c.bf16 %v712_v43, %v710_v42  ;;  %v4719_v48 = vpack.c.bf16 %v711_v47, %v709_v46  ;;  %v680_v49 = vld [vmem:[%s6059_s23] sm:$0xf]  ;;  %v1149_v4 = vld [vmem:[#allocation7 + $0x100] sm:$0xff]  ;;  %v1150_v5 = vld [vmem:[#allocation7 + $0x108] sm:$0xff] }
 0x125   : > { %4700 = vmatpush1.bf16.msra.mxu0 %v4699_v20  ;;  %v713_v55 = vld [vmem:[%s6538_s2] sm:$0x3]  ;;  %v4754_v6 = vpack.c.bf16 %v1150_v5, %v1149_v4  ;;  %v1151_v7 = vld [vmem:[#allocation7 + $0x110] sm:$0xff]  ;;  %v1153_v10 = vld [vmem:[#allocation7 + $0x120] sm:$0xff] }
 0x126   : > { %4702 = vmatprep.subr.bf16.mxu0 %v4701_v21  ;;  %v718_v58 = vrot.slane %v713_v55, %v6097_v54  ;;  %v722_v59 = vrot.slane %v713_v55, %v6103_v56  ;;  %v1152_v8 = vld [vmem:[#allocation7 + $0x118] sm:$0xff]  ;;  %v1154_v11 = vld [vmem:[#allocation7 + $0x128] sm:$0xff]  ;;  %v1155_v13 = vld [vmem:[#allocation7 + $0x130] sm:$0xff] }
 0x127   : > { %v4757_v9 = vpack.c.bf16 %v1152_v8, %v1151_v7  ;;  %v4760_v12 = vpack.c.bf16 %v1154_v11, %v1153_v10  ;;  %v1156_v14 = vld [vmem:[#allocation7 + $0x138] sm:$0xff]  ;;  %v1157_v16 = vld [vmem:[#allocation7 + $0x140] sm:$0xff]  ;;  %v1158_v17 = vld [vmem:[#allocation7 + $0x148] sm:$0xff] }
 0x128   : > { %v4763_v15 = vpack.c.bf16 %v1156_v14, %v1155_v13  ;;  %v4766_v18 = vpack.c.bf16 %v1158_v17, %v1157_v16  ;;  %v1159_v19 = vld [vmem:[#allocation7 + $0x150] sm:$0xff]  ;;  %v1160_v20 = vld [vmem:[#allocation7 + $0x158] sm:$0xff]  ;;  %v1161_v22 = vld [vmem:[#allocation7 + $0x160] sm:$0xff] }
 0x129   : > { %4704 = vmatpush1.bf16.msra.mxu0 %v4703_v26  ;;  %v4769_v21 = vpack.c.bf16 %v1160_v20, %v1159_v19  ;;  %v1162_v23 = vld [vmem:[#allocation7 + $0x168] sm:$0xff]  ;;  %v966_v26 = vadd.s32 1, %v6091_v52  ;;  %v1133_v28 = vld [vmem:[#allocation7 + $0x80] sm:$0xff]  ;;  %v1119_v43 = vld [vmem:[#allocation7 + $0x10] sm:$0xff] }
 0x12a   : > { %4706 = vmatprep.subr.bf16.mxu0 %v4705_v27  ;;  %v4772_v24 = vpack.c.bf16 %v1162_v23, %v1161_v22  ;;  %v1134_v29 = vld [vmem:[#allocation7 + $0x88] sm:$0xff]  ;;  %v1117_v36 = vld [vmem:[#allocation7] sm:$0xff]  ;;  %v1139_v55 = vld [vmem:[#allocation7 + $0xb0] sm:$0xff] }
 0x12b   : > { %vm967_vm7 = vcmp.eq.s32.totalorder %v6089_v51, %v966_v26  ;;  %v4721_v35 = vpack.c.bf16 %v1134_v29, %v1133_v28  ;;  %v1118_v37 = vld [vmem:[#allocation7 + $0x8] sm:$0xff]  ;;  %v1143_v8 = vld [vmem:[#allocation7 + $0xd0] sm:$0xff]  ;;  %v1128_v13 = vld [vmem:[#allocation7 + $0x58] sm:$0xff] }
 0x12c   : > { %v6143_v40 = vsel %vm967_vm7, 1.0, %v5647_v0  ;;  %v4723_v41 = vpack.c.bf16 %v1118_v37, %v1117_v36  ;;  %v1138_v46 = vld [vmem:[#allocation7 + $0xa8] sm:$0xff]  ;;  %v1145_v14 = vld [vmem:[#allocation7 + $0xe0] sm:$0xff]  ;;  %v1147_v20 = vld [vmem:[#allocation7 + $0xf0] sm:$0xff] }
 0x12d   : > { %4708 = vmatpush1.bf16.msra.mxu0 %v4707_v32  ;;  %v1122_v50 = vld [vmem:[#allocation7 + $0x28] sm:$0xff]  ;;  %v1132_v26 = vld [vmem:[#allocation7 + $0x78] sm:$0xff]  ;;  %v1163_v28 = vld [vmem:[#allocation7 + $0x170] sm:$0xff] }
 0x12e   : > { %4710 = vmatprep.subr.bf16.mxu0 %v4709_v33  ;;  %v1126_v7 = vld [vmem:[#allocation7 + $0x48] sm:$0xff]  ;;  %v1164_v29 = vld [vmem:[#allocation7 + $0x178] sm:$0xff]  ;;  %v1315_v36 = vld [vmem:[#allocation8 + $0x10] sm:$0xff] }
 0x12f   : > { %v1130_v19 = vld [vmem:[#allocation7 + $0x68] sm:$0xff] }
 0x130   : > { %v1318_v37 = vld [vmem:[#allocation8 + $0x28] sm:$0xff] }
 0x131   : > { %4712 = vmatpush1.bf16.msra.mxu0 %v4711_v38  ;;  %v1135_v38 = vld [vmem:[#allocation7 + $0x90] sm:$0xff] }
 0x132   : > { %4714 = vmatprep.subr.bf16.mxu0 %v4713_v39  ;;  %v1136_v39 = vld [vmem:[#allocation7 + $0x98] sm:$0xff] }
 0x133   : > { %v4725_v42 = vpack.c.bf16 %v1136_v39, %v1135_v38  ;;  %v1320_v38 = vld [vmem:[#allocation8 + $0x38] sm:$0xff] }
 0x135   : > { %4716 = vmatpush1.bf16.msra.mxu0 %v4715_v44  ;;  %v1120_v44 = vld [vmem:[#allocation7 + $0x18] sm:$0xff] }
 0x136   : > { %4718 = vmatprep.subr.bf16.mxu0 %v4717_v45  ;;  %v1137_v45 = vld [vmem:[#allocation7 + $0xa0] sm:$0xff]  ;;  %v4727_v47 = vpack.c.bf16 %v1120_v44, %v1119_v43  ;;  %v1319_v43 = vld [vmem:[#allocation8 + $0x30] sm:$0xff] }
 0x139   : > { %4720 = vmatpush1.bf16.msra.mxu0 %v4719_v48  ;;  %v4729_v48 = vpack.c.bf16 %v1138_v46, %v1137_v45  ;;  %v1322_v45 = vld [vmem:[#allocation8 + $0x48] sm:$0xff]  ;;  %v1324_v46 = vld [vmem:[#allocation8 + $0x58] sm:$0xff] }
 0x13a   : > { %4349 = vmatprep.subr.mxu0 %v5647_v0 }
 0x13c   : > { %790 = vmatmul.mubr.f32.vlgmr.msra.gmra.mrb[0].mxu0 %v680_v49  ;;  %v1121_v49 = vld [vmem:[#allocation7 + $0x20] sm:$0xff] }
 0x13d   : > { %4351 = vmatprep.mubr.msk.f32.mxu0 %vm5648_vm0, %v5647_v0 }
 0x20f   : > { %v791_v60 = vpop.f32.mrb[0].mxu0 }
 0x210   : > { %v792_v61 = vadd.f32 %v791_v60, %v718_v58  ;;  %v793_v62 = vpop.f32.mrb[1].mxu0  ;;  %v1140_v58 = vld [vmem:[#allocation7 + $0xb8] sm:$0xff] }
 0x211   : > { %v794_v1 = vadd.f32 %v793_v62, %v722_v59  ;;  %v4731_v59 = vpack.c.bf16 %v1122_v50, %v1121_v49  ;;  %v4733_v60 = vpack.c.bf16 %v1140_v58, %v1139_v55  ;;  %v1124_v62 = vld [vmem:[#allocation7 + $0x38] sm:$0xff]  ;;  %v4785_v49 = vpack.c.bf16 %v1324_v46, %v1322_v45  ;;  %v1321_v50 = vld [vmem:[#allocation8 + $0x40] sm:$0xff]  ;;  %v1323_v55 = vld [vmem:[#allocation8 + $0x50] sm:$0xff] }
 0x212   : > { %4355 = vmatpush3.msk.msra.mxu1 %vm812_vm3, %v792_v61  ;;  %v1123_v61 = vld [vmem:[#allocation7 + $0x30] sm:$0xff] }
 0x213   : > { %4350 = vmatpush3.msk.msra.mxu0 %vm812_vm3, %v794_v1  ;;  %4357 = vmatmul.mubr.msk.f32.vlgmr.msra.gmra.mrb[0].mxu1 %vm808_vm4, %v6115_v63  ;;  %v1141_v1 = vld [vmem:[#allocation7 + $0xc0] sm:$0xff]  ;;  %v4735_v4 = vpack.c.bf16 %v1124_v62, %v1123_v61  ;;  %v4787_v62 = vpack.c.bf16 %v1323_v55, %v1321_v50 }
 0x214   : > { %4352 = vmatmul.mubr.msk.f32.vlgmr.msra.gmra.mrb[2].mxu0 %vm808_vm4, %v6118_v2  ;;  %4359 = vmatprep.subr.mxu1 %v5647_v0 }
 0x215   : > { %4361 = vmatprep.mubr.msk.f32.mxu1 %vm5648_vm0, %v5647_v0  ;;  %4401 = vmatprep.mubr.msk.f32.mxu0 %vm5648_vm0, %v5647_v0 }
 0x216   : > { %4753 = vmatprep.subr.bf16.mxu0 %v5649_v3 }
 0x217   : > { %4755 = vmatpush3.bf16.msra.mxu0 %v4754_v6  ;;  %v1125_v6 = vld [vmem:[#allocation7 + $0x40] sm:$0xff] }
 0x218   : > { %4756 = vmatprep.subr.bf16.mxu0 %v5649_v3  ;;  %v4739_v10 = vpack.c.bf16 %v1126_v7, %v1125_v6  ;;  %v1332_v6 = vld [vmem:[#allocation8 + $0x98] sm:$0xff] }
 0x21b   : > { %4758 = vmatpush3.bf16.msra.mxu0 %v4757_v9  ;;  %v1144_v9 = vld [vmem:[#allocation7 + $0xd8] sm:$0xff] }
 0x21c   : > { %4759 = vmatprep.subr.bf16.mxu0 %v5649_v3  ;;  %v4741_v11 = vpack.c.bf16 %v1144_v9, %v1143_v8  ;;  %v1329_v9 = vld [vmem:[#allocation8 + $0x80] sm:$0xff] }
 0x21f   : > { %4761 = vmatpush3.bf16.msra.mxu0 %v4760_v12  ;;  %v1127_v12 = vld [vmem:[#allocation7 + $0x50] sm:$0xff] }
 0x220   : > { %4762 = vmatprep.subr.bf16.mxu0 %v5649_v3  ;;  %v4743_v16 = vpack.c.bf16 %v1128_v13, %v1127_v12  ;;  %v1336_v12 = vld [vmem:[#allocation8 + $0xb8] sm:$0xff] }
 0x223   : > { %4764 = vmatpush3.bf16.msra.mxu0 %v4763_v15  ;;  %v1146_v15 = vld [vmem:[#allocation7 + $0xe8] sm:$0xff] }
 0x224   : > { %4765 = vmatprep.subr.bf16.mxu0 %v5649_v3  ;;  %v4745_v17 = vpack.c.bf16 %v1146_v15, %v1145_v14  ;;  %v1333_v15 = vld [vmem:[#allocation8 + $0xa0] sm:$0xff] }
 0x227   : > { %4767 = vmatpush3.bf16.msra.mxu0 %v4766_v18  ;;  %v1129_v18 = vld [vmem:[#allocation7 + $0x60] sm:$0xff] }
 0x228   : > { %4768 = vmatprep.subr.bf16.mxu0 %v5649_v3  ;;  %v4747_v22 = vpack.c.bf16 %v1130_v19, %v1129_v18  ;;  %v1338_v18 = vld [vmem:[#allocation8 + $0xc8] sm:$0xff]  ;;  %v1340_v19 = vld [vmem:[#allocation8 + $0xd8] sm:$0xff] }
 0x22b   : > { %4770 = vmatpush3.bf16.msra.mxu0 %v4769_v21  ;;  %v1148_v21 = vld [vmem:[#allocation7 + $0xf8] sm:$0xff] }
 0x22c   : > { %4771 = vmatprep.subr.bf16.mxu0 %v5649_v3  ;;  %v4749_v23 = vpack.c.bf16 %v1148_v21, %v1147_v20  ;;  %v4801_v20 = vpack.c.bf16 %v1340_v19, %v1338_v18  ;;  %v1337_v21 = vld [vmem:[#allocation8 + $0xc0] sm:$0xff]  ;;  %v1769_v18 = vld [vmem:[#allocation10 + $0x30] sm:$0xff]  ;;  %v1770_v19 = vld [vmem:[#allocation10 + $0x38] sm:$0xff] }
 0x22f   : > { %4773 = vmatpush3.bf16.msra.mxu0 %v4772_v24  ;;  %v1131_v24 = vld [vmem:[#allocation7 + $0x70] sm:$0xff] }
 0x230   : > { %4774 = vmatprep.subr.bf16.mxu0 %v5649_v3  ;;  %v1142_v3 = vld [vmem:[#allocation7 + $0xc8] sm:$0xff] }
 0x231   : > { %v4737_v5 = vpack.c.bf16 %v1142_v3, %v1141_v1  ;;  %v1325_v3 = vld [vmem:[#allocation8 + $0x60] sm:$0xff] }
 0x2e6   : > { %v958_v27 = vpop.f32.mrb[0].mxu1 }
 0x2e7   : > { %v882_v30 = vpop.f32.mrb[2].mxu0  ;;  %v4358_v31 = vpop.f32.mrb[1].mxu1 }
 0x2e8   : > { %v959_v32 = vadd.f32 %v958_v27, %v882_v30  ;;  %v4353_v33 = vpop.f32.mrb[3].mxu0  ;;  %v4751_v27 = vpack.c.bf16 %v1132_v26, %v1131_v24  ;;  %v4775_v30 = vpack.c.bf16 %v1164_v29, %v1163_v28  ;;  %v1314_v31 = vld [vmem:[#allocation8 + $0x8] sm:$0xff]  ;;  %v1344_v26 = vld [vmem:[#allocation8 + $0xf8] sm:$0xff]  ;;  %v1341_v28 = vld [vmem:[#allocation8 + $0xe0] sm:$0xff] }
 0x2e9   : > { %v1342_v24 = vld [vmem:[#allocation8 + $0xe8] sm:$0xff]  ;;  %v1343_v29 = vld [vmem:[#allocation8 + $0xf0] sm:$0xff] }
 0x2ea   : > { %4360 = vmatpush3.msra.mxu1 %v959_v32  ;;  %4776 = vmatpush3.bf16.msra.mxu0 %v4775_v30  ;;  %v4807_v30 = vpack.c.bf16 %v1343_v29, %v1341_v28  ;;  %v1790_v28 = vld [vmem:[#allocation10 + $0xd8] sm:$0xff] }
 0x2eb   : > { %4362 = vmatmul.mubr.msk.f32.vlgmr.msra.gmra.mrb[2].mxu1 %vm970_vm6, %v6134_v34  ;;  %4364 = vmatprep.subr.mxu1 %v5647_v0 }
 0x2ec   : > { %4365 = vmatpush3.msra.mxu1 %v959_v32  ;;  %4366 = vmatprep.mubr.msk.f32.mxu1 %vm5648_vm0, %v5647_v0 }
 0x2ed   : > { %4722 = vmatprep.subr.bf16.mxu1 %v4721_v35  ;;  %v1313_v35 = vld [vmem:[#allocation8] sm:$0xff] }
 0x2ee   : > { %v4779_v39 = vpack.c.bf16 %v1315_v36, %v1313_v35 }
 0x2ef   : > { %4367 = vmatmul.mubr.msk.f32.vlgmr.msra.gmra.mrb[4].mxu1 %vm970_vm6, %v6143_v40 }
 0x2f0   : > { %1236 = vmatprep.mubr.f32.mxu1 %v959_v32  ;;  %4724 = vmatpush3.bf16.msra.mxu1 %v4723_v41  ;;  %v1316_v32 = vld [vmem:[#allocation8 + $0x18] sm:$0xff]  ;;  %v4781_v41 = vpack.c.bf16 %v1320_v38, %v1318_v37 }
 0x2f1   : > { %4726 = vmatprep.subr.bf16.mxu1 %v4725_v42  ;;  %v4777_v33 = vpack.c.bf16 %v1316_v32, %v1314_v31  ;;  %v1317_v42 = vld [vmem:[#allocation8 + $0x20] sm:$0xff] }
 0x2f4   : > { %4728 = vmatpush3.bf16.msra.mxu1 %v4727_v47 }
 0x2f5   : > { %4730 = vmatprep.subr.bf16.mxu1 %v4729_v48  ;;  %v4783_v48 = vpack.c.bf16 %v1319_v43, %v1317_v42  ;;  %v1345_v42 = vld [vmem:[%s6595_s14] sm:$0x3]  ;;  %v6157_v43 = vadd.s32 8, %v6091_v52 }
 0x2f6   : > { %v1350_v45 = vrot.slane %v1345_v42, %v6097_v54 }
 0x2f7   : > { %vm1432_vm8 = vcmp.eq.s32.totalorder %v6157_v43, %v6106_v57  ;;  %vm1429_vm9 = vcmp.eq.s32.totalorder %v6157_v43, %v6094_v53  ;;  %vm1595_vm11 = vcmp.eq.s32.totalorder %v6157_v43, %v6128_v25 }
 0x2f8   : > { %4732 = vmatpush3.bf16.msra.mxu1 %v4731_v59  ;;  %v1326_v59 = vld [vmem:[#allocation8 + $0x68] sm:$0xff]  ;;  %v6173_v55 = vsel %vm1429_vm9, 1.0, %v5647_v0 }
 0x2f9   : > { %4734 = vmatprep.subr.bf16.mxu1 %v4733_v60  ;;  %v1328_v60 = vld [vmem:[#allocation8 + $0x78] sm:$0xff] }
 0x2fa   : > { %v4789_v1 = vpack.c.bf16 %v1328_v60, %v1326_v59  ;;  %v1780_v59 = vld [vmem:[#allocation10 + $0x88] sm:$0xff]  ;;  %v1763_v60 = vld [vmem:[#allocation10] sm:$0xff] }
 0x2fc   : > { %4736 = vmatpush3.bf16.msra.mxu1 %v4735_v4  ;;  %v1327_v4 = vld [vmem:[#allocation8 + $0x70] sm:$0xff] }
 0x2fd   : > { %4738 = vmatprep.subr.bf16.mxu1 %v4737_v5  ;;  %v1330_v5 = vld [vmem:[#allocation8 + $0x88] sm:$0xff]  ;;  %v4791_v7 = vpack.c.bf16 %v1327_v4, %v1325_v3  ;;  %v1782_v3 = vld [vmem:[#allocation10 + $0x98] sm:$0xff] }
 0x2fe   : > { %v4793_v8 = vpack.c.bf16 %v1332_v6, %v1330_v5  ;;  %v1765_v6 = vld [vmem:[#allocation10 + $0x10] sm:$0xff] }
 0x300   : > { %4740 = vmatpush3.bf16.msra.mxu1 %v4739_v10  ;;  %v1331_v10 = vld [vmem:[#allocation8 + $0x90] sm:$0xff] }
 0x301   : > { %4742 = vmatprep.subr.bf16.mxu1 %v4741_v11  ;;  %v1334_v11 = vld [vmem:[#allocation8 + $0xa8] sm:$0xff]  ;;  %v4795_v13 = vpack.c.bf16 %v1331_v10, %v1329_v9 }
 0x302   : > { %v4797_v14 = vpack.c.bf16 %v1336_v12, %v1334_v11  ;;  %v1784_v9 = vld [vmem:[#allocation10 + $0xa8] sm:$0xff]  ;;  %v1767_v12 = vld [vmem:[#allocation10 + $0x20] sm:$0xff] }
 0x304   : > { %4744 = vmatpush3.bf16.msra.mxu1 %v4743_v16  ;;  %v1335_v16 = vld [vmem:[#allocation8 + $0xb0] sm:$0xff] }
 0x305   : > { %4746 = vmatprep.subr.bf16.mxu1 %v4745_v17  ;;  %v4799_v17 = vpack.c.bf16 %v1335_v16, %v1333_v15  ;;  %v1786_v15 = vld [vmem:[#allocation10 + $0xb8] sm:$0xff] }
 0x308   : > { %4748 = vmatpush3.bf16.msra.mxu1 %v4747_v22  ;;  %v1339_v22 = vld [vmem:[#allocation8 + $0xd0] sm:$0xff] }
 0x309   : > { %4750 = vmatprep.subr.bf16.mxu1 %v4749_v23  ;;  %v4803_v23 = vpack.c.bf16 %v1339_v22, %v1337_v21  ;;  %v1788_v21 = vld [vmem:[#allocation10 + $0xc8] sm:$0xff]  ;;  %v4831_v22 = vpack.c.bf16 %v1770_v19, %v1769_v18  ;;  %v1807_v19 = vld [vmem:[#allocation10 + $0x160] sm:$0xff] }
 0x30c   : > { %4752 = vmatpush3.bf16.msra.mxu1 %v4751_v27  ;;  %v4805_v27 = vpack.c.bf16 %v1344_v26, %v1342_v24  ;;  %v1771_v24 = vld [vmem:[#allocation10 + $0x40] sm:$0xff]  ;;  %v1772_v26 = vld [vmem:[#allocation10 + $0x48] sm:$0xff] }
 0x30d   : > { %4778 = vmatprep.subr.bf16.mxu1 %v4777_v33  ;;  %v3897_v33 = vld [vmem:[%s6594_s1] ss:$0 sm:$0xff]  ;;  %v4835_v29 = vpack.c.bf16 %v1772_v26, %v1771_v24  ;;  %v1971_v26 = vld [vmem:[#allocation11 + $0x8] sm:$0xff] }
 0x3be   : > { %v1040_v44 = vpop.f32.mrb[2].mxu1 }
 0x3bf   : > { %v4363_v47 = vpop.f32.mrb[3].mxu1  ;;  %1237 = vmatmul.mubr.f32.vlgmr.msra.gmra.mrb[6].mxu1 %v1040_v44  ;;  %v1354_v44 = vrot.slane %v1345_v42, %v6103_v56  ;;  %v1794_v42 = vld [vmem:[#allocation10 + $0xf8] sm:$0xff] }
 0x3c0   : > { %4780 = vmatpush1.bf16.msra.mxu1 %v4779_v39  ;;  %1421 = vmatprep.mubr.f32.mxu1 %v5647_v0 }
 0x3c1   : > { %4782 = vmatprep.subr.bf16.mxu1 %v4781_v41 }
 0x3c2   : > { %v1113_v58 = vpop.f32.mrb[4].mxu1 }
 0x3c3   : > { %v4368_v61 = vpop.f32.mrb[5].mxu1  ;;  %4402 = vmatmul.mubr.f32.vlgmr.msra.gmra.mrb[4].mxu0 %v1113_v58  ;;  %v1779_v58 = vld [vmem:[#allocation10 + $0x80] sm:$0xff] }
 0x3c4   : > { %4784 = vmatpush1.bf16.msra.mxu1 %v4783_v48  ;;  %4406 = vmatprep.mubr.msk.f32.mxu0 %vm970_vm6, %v6118_v2  ;;  %v4817_v61 = vpack.c.bf16 %v1780_v59, %v1779_v58 }
 0x3c5   : > { %4786 = vmatprep.subr.bf16.mxu1 %v4785_v49  ;;  %v6164_v49 = vsel %vm1432_vm8, 1.0, %v5647_v0 }
 0x3c8   : > { %4788 = vmatpush1.bf16.msra.mxu1 %v4787_v62  ;;  %v1764_v62 = vld [vmem:[#allocation10 + $0x8] sm:$0xff] }
 0x3c9   : > { %4790 = vmatprep.subr.bf16.mxu1 %v4789_v1  ;;  %v1781_v1 = vld [vmem:[#allocation10 + $0x90] sm:$0xff]  ;;  %v4819_v4 = vpack.c.bf16 %v1764_v62, %v1763_v60  ;;  %v1598_v60 = vadd.s32 1, %v6157_v43  ;;  %v1796_v62 = vld [vmem:[#allocation10 + $0x108] sm:$0xff] }
 0x3ca   : > { %v4821_v5 = vpack.c.bf16 %v1782_v3, %v1781_v1  ;;  %v6186_v1 = vsel %vm1595_vm11, 1.0, %v5647_v0 }
 0x3cb   : > { %vm1599_vm12 = vcmp.eq.s32.totalorder %v6089_v51, %v1598_v60  ;;  %v1985_v60 = vld [vmem:[#allocation11 + $0x78] sm:$0xff] }
 0x3cc   : > { %4792 = vmatpush1.bf16.msra.mxu1 %v4791_v7  ;;  %v1766_v7 = vld [vmem:[#allocation10 + $0x18] sm:$0xff]  ;;  %v6194_v43 = vsel %vm1599_vm12, 1.0, %v5647_v0 }
 0x3cd   : > { %4794 = vmatprep.subr.bf16.mxu1 %v4793_v8  ;;  %v1783_v8 = vld [vmem:[#allocation10 + $0xa0] sm:$0xff]  ;;  %v4823_v10 = vpack.c.bf16 %v1766_v7, %v1765_v6 }
 0x3ce   : > { %v4825_v11 = vpack.c.bf16 %v1784_v9, %v1783_v8  ;;  %v1799_v7 = vld [vmem:[#allocation10 + $0x120] sm:$0xff]  ;;  %v1800_v8 = vld [vmem:[#allocation10 + $0x128] sm:$0xff] }
 0x3cf   : > { %v4857_v9 = vpack.c.bf16 %v1800_v8, %v1799_v7  ;;  %v1986_v8 = vld [vmem:[#allocation11 + $0x80] sm:$0xff] }
 0x3d0   : > { %4796 = vmatpush1.bf16.msra.mxu1 %v4795_v13  ;;  %v1768_v13 = vld [vmem:[#allocation10 + $0x28] sm:$0xff] }
 0x3d1   : > { %4798 = vmatprep.subr.bf16.mxu1 %v4797_v14  ;;  %v1785_v14 = vld [vmem:[#allocation10 + $0xb0] sm:$0xff]  ;;  %v4827_v16 = vpack.c.bf16 %v1768_v13, %v1767_v12  ;;  %v1803_v13 = vld [vmem:[#allocation10 + $0x140] sm:$0xff] }
 0x3d4   : > { %4800 = vmatpush1.bf16.msra.mxu1 %v4799_v17  ;;  %v4829_v17 = vpack.c.bf16 %v1786_v15, %v1785_v14  ;;  %v1804_v14 = vld [vmem:[#allocation10 + $0x148] sm:$0xff] }
 0x3d5   : > { %4802 = vmatprep.subr.bf16.mxu1 %v4801_v20  ;;  %v1787_v20 = vld [vmem:[#allocation10 + $0xc0] sm:$0xff]  ;;  %v4865_v15 = vpack.c.bf16 %v1804_v14, %v1803_v13 }
 0x3d6   : > { %v1990_v14 = vld [vmem:[#allocation11 + $0xa0] sm:$0xff] }
 0x3d8   : > { %4804 = vmatpush1.bf16.msra.mxu1 %v4803_v23  ;;  %v4833_v23 = vpack.c.bf16 %v1788_v21, %v1787_v20  ;;  %v1808_v20 = vld [vmem:[#allocation10 + $0x168] sm:$0xff] }
 0x3d9   : > { %4806 = vmatprep.subr.bf16.mxu1 %v4805_v27  ;;  %v1789_v27 = vld [vmem:[#allocation10 + $0xd0] sm:$0xff]  ;;  %v4873_v21 = vpack.c.bf16 %v1808_v20, %v1807_v19  ;;  %v1994_v20 = vld [vmem:[#allocation11 + $0xc0] sm:$0xff] }
 0x3dc   : > { %4808 = vmatpush1.bf16.msra.mxu1 %v4807_v30  ;;  %v4837_v30 = vpack.c.bf16 %v1790_v28, %v1789_v27  ;;  %v1973_v27 = vld [vmem:[#allocation11 + $0x18] sm:$0xff] }
 0x3dd   : > { %4818 = vmatprep.subr.bf16.mxu1 %v4817_v61  ;;  %v1795_v61 = vld [vmem:[#allocation10 + $0x100] sm:$0xff]  ;;  %v4881_v28 = vpack.c.bf16 %v1973_v27, %v1971_v26 }
 0x3de   : > { %v4849_v3 = vpack.c.bf16 %v1796_v62, %v1795_v61  ;;  %v1998_v27 = vld [vmem:[#allocation11 + $0xe0] sm:$0xff] }
 0x492   : > { %v4031_v31 = vpop.f32.mrb[6].mxu1 }
 0x493   : > { %v4032_v32 = vpop.f32.mrb[7].mxu1 }
 0x494   : > { %v4033_v35 = vadd.f32 %v4032_v32, %v4031_v31  ;;  %v1773_v31 = vld [vmem:[#allocation10 + $0x50] sm:$0xff]  ;;  %v1774_v32 = vld [vmem:[#allocation10 + $0x58] sm:$0xff] }
 0x496   : > { %v1239_v36 = vadd.f32 %v4033_v35, %v3897_v33  ;;  %v1308_v37 = vpop.f32.mrb[4].mxu0  ;;  %v1791_v33 = vld [vmem:[#allocation10 + $0xe0] sm:$0xff]  ;;  %v1792_v35 = vld [vmem:[#allocation10 + $0xe8] sm:$0xff] }
 0x497   : > { %v4403_v38 = vpop.f32.mrb[5].mxu0 }
 0x498   : > { %v1309_v39 = vadd.f32 %v1308_v37, %v1239_v36  ;;  %v4839_v36 = vpack.c.bf16 %v1774_v32, %v1773_v31  ;;  %v4841_v37 = vpack.c.bf16 %v1792_v35, %v1791_v33  ;;  %v1775_v38 = vld [vmem:[#allocation10 + $0x60] sm:$0xff]  ;;  %v1975_v31 = vld [vmem:[#allocation11 + $0x28] sm:$0xff]  ;;  %v1977_v32 = vld [vmem:[#allocation11 + $0x38] sm:$0xff] }
 0x49a   : > { %v1312_v41 = vmax.f32 %v1309_v39, 0.0  ;;  %v1776_v39 = vld [vmem:[#allocation10 + $0x68] sm:$0xff] }
 0x49c   : > { %1422 = vmatmul.mubr.f32.vlgmr.msra.gmra.mrb[8].mxu1 %v1312_v41  ;;  %v1793_v41 = vld [vmem:[#allocation10 + $0xf0] sm:$0xff] }
 0x49d   : > { %4820 = vmatpush3.bf16.msra.mxu1 %v4819_v4  ;;  %v1797_v4 = vld [vmem:[#allocation10 + $0x110] sm:$0xff] }
 0x49e   : > { %4822 = vmatprep.subr.bf16.mxu1 %v4821_v5  ;;  %v1798_v5 = vld [vmem:[#allocation10 + $0x118] sm:$0xff] }
 0x49f   : > { %v4853_v6 = vpack.c.bf16 %v1798_v5, %v1797_v4  ;;  %v1984_v4 = vld [vmem:[#allocation11 + $0x70] sm:$0xff]  ;;  %v1989_v5 = vld [vmem:[#allocation11 + $0x98] sm:$0xff] }
 0x4a1   : > { %4824 = vmatpush3.bf16.msra.mxu1 %v4823_v10  ;;  %v1801_v10 = vld [vmem:[#allocation10 + $0x130] sm:$0xff] }
 0x4a2   : > { %4826 = vmatprep.subr.bf16.mxu1 %v4825_v11  ;;  %v1802_v11 = vld [vmem:[#allocation10 + $0x138] sm:$0xff] }
 0x4a3   : > { %v4861_v12 = vpack.c.bf16 %v1802_v11, %v1801_v10  ;;  %v1991_v10 = vld [vmem:[#allocation11 + $0xa8] sm:$0xff]  ;;  %v1993_v11 = vld [vmem:[#allocation11 + $0xb8] sm:$0xff] }
 0x4a4   : > { %v4901_v13 = vpack.c.bf16 %v1993_v11, %v1991_v10  ;;  %v6215_v10 = vadd.s32 24, %v6091_v52 }
 0x4a5   : > { %4828 = vmatpush3.bf16.msra.mxu1 %v4827_v16  ;;  %v1805_v16 = vld [vmem:[#allocation10 + $0x150] sm:$0xff] }
 0x4a6   : > { %4830 = vmatprep.subr.bf16.mxu1 %v4829_v17  ;;  %v1806_v17 = vld [vmem:[#allocation10 + $0x158] sm:$0xff]  ;;  %vm2100_vm14 = vcmp.eq.s32.totalorder %v6215_v10, %v6106_v57  ;;  %vm2094_vm0 = vcmp.eq.s32.totalorder %v6215_v10, %v6094_v53  ;;  %vm2296_vm3 = vcmp.eq.s32.totalorder %v6215_v10, %v6128_v25 }
 0x4a7   : > { %v4869_v18 = vpack.c.bf16 %v1806_v17, %v1805_v16  ;;  %v1995_v17 = vld [vmem:[#allocation11 + $0xc8] sm:$0xff] }
 0x4a9   : > { %4832 = vmatpush3.bf16.msra.mxu1 %v4831_v22  ;;  %v1809_v22 = vld [vmem:[#allocation10 + $0x170] sm:$0xff] }
 0x4aa   : > { %4834 = vmatprep.subr.bf16.mxu1 %v4833_v23  ;;  %v1810_v23 = vld [vmem:[#allocation10 + $0x178] sm:$0xff] }
 0x4ab   : > { %v4877_v24 = vpack.c.bf16 %v1810_v23, %v1809_v22  ;;  %v1999_v23 = vld [vmem:[#allocation11 + $0xe8] sm:$0xff] }
 0x4ad   : > { %4836 = vmatpush3.bf16.msra.mxu1 %v4835_v29  ;;  %v1970_v29 = vld [vmem:[#allocation11] sm:$0xff] }
 0x4ae   : > { %4838 = vmatprep.subr.bf16.mxu1 %v4837_v30  ;;  %v1972_v30 = vld [vmem:[#allocation11 + $0x10] sm:$0xff] }
 0x4af   : > { %v4883_v33 = vpack.c.bf16 %v1972_v30, %v1970_v29 }
 0x4b1   : > { %4840 = vmatpush3.bf16.msra.mxu1 %v4839_v36  ;;  %v4885_v36 = vpack.c.bf16 %v1977_v32, %v1975_v31  ;;  %v3910_v32 = vld [vmem:[%s6596_s22] ss:$0 sm:$0xff]  ;;  %s3886_s22 = sshll.u32 %s6055_s29, 6 }
 0x4b2   : > { %4842 = vmatprep.subr.bf16.mxu1 %v4841_v37  ;;  %v1974_v37 = vld [vmem:[#allocation11 + $0x20] sm:$0xff]  ;;  %s6475_s8 = scalar_lea.vmem [#allocation17], %s3886_s22 }
 0x4b3   : > { %s3714_s23 = sshll.u32 %s6475_s8, 4  ;;  %s6485_s23 = int_to_ptr.vmem [resolvable:$true] %s3714_s23 }
 0x56f   : > { %v1423_v46 = vpop.f32.mrb[8].mxu1 }
 0x570   : > { %v1425_v47 = vpop.f32.mrb[9].mxu1  ;;  %v1424_v50 = vadd.f32 %v1423_v46, %v1350_v45  ;;  %v4845_v45 = vpack.c.bf16 %v1794_v42, %v1793_v41  ;;  %v1777_v46 = vld [vmem:[#allocation10 + $0x70] sm:$0xff]  ;;  %v1979_v41 = vld [vmem:[#allocation11 + $0x48] sm:$0xff]  ;;  %v1981_v42 = vld [vmem:[#allocation11 + $0x58] sm:$0xff] }
 0x571   : > { %v1426_v48 = vadd.f32 %v1425_v47, %v1354_v44  ;;  %v4843_v44 = vpack.c.bf16 %v1776_v39, %v1775_v38  ;;  %v1778_v47 = vld [vmem:[#allocation10 + $0x78] sm:$0xff]  ;;  %v1976_v38 = vld [vmem:[#allocation11 + $0x30] sm:$0xff] }
 0x573   : > { %4404 = vmatprep.subr.mxu0 %v1426_v48  ;;  %4844 = vmatpush3.bf16.msra.mxu1 %v4843_v44  ;;  %v4887_v44 = vpack.c.bf16 %v1976_v38, %v1974_v37 }
 0x574   : > { %4405 = vmatpush3.msra.mxu0 %v1426_v48  ;;  %v4847_v48 = vpack.c.bf16 %v1778_v47, %v1777_v46  ;;  %4846 = vmatprep.subr.bf16.mxu1 %v4845_v45  ;;  %v4889_v46 = vpack.c.bf16 %v1981_v42, %v1979_v41  ;;  %v1978_v47 = vld [vmem:[#allocation11 + $0x40] sm:$0xff] }
 0x575   : > { %4407 = vmatmul.mubr.msk.f32.vlgmr.msra.gmra.mrb[6].mxu0 %vm970_vm6, %v6164_v49  ;;  %4409 = vmatprep.subr.mxu0 %v1424_v50 }
 0x576   : > { %4410 = vmatpush3.msra.mxu0 %v1424_v50  ;;  %4411 = vmatprep.mubr.msk.f32.mxu0 %vm970_vm6, %v6115_v63 }
 0x577   : > { %4848 = vmatpush3.bf16.msra.mxu1 %v4847_v48  ;;  %v1980_v48 = vld [vmem:[#allocation11 + $0x50] sm:$0xff] }
 0x578   : > { %4882 = vmatprep.subr.bf16.mxu1 %v4881_v28  ;;  %v4891_v61 = vpack.c.bf16 %v1980_v48, %v1978_v47  ;;  %v2000_v28 = vld [vmem:[#allocation11 + $0xf0] sm:$0xff]  ;;  %v2002_v48 = vld [vmem:[%s6597_s30] sm:$0x3]  ;;  %s3990_s30 = sshll.u32 %s5764_s0, 10  ;;  %s5650_s0 = smov [#allocation17]  }
 0x579   : > { %v4911_v29 = vpack.c.bf16 %v2000_v28, %v1998_v27  ;;  %v2540_v28 = vld [vmem:[#allocation13 + $0x140] sm:$0xff]  ;;  %s5554_s14 = sshll.u32 %s5650_s0, 4  ;;  %s5555_s14 = int_to_ptr.vmem [resolvable:$false] %s5554_s14 }
 0x57a   : > { %s5556_s5 = scalar_lea.vmem %s5555_s14, 2048  ;;  %p5557_p2 = scmp.lt.s32.totalorder %s6485_s23, %s5555_s14 }
 0x57d   : > { %4412 = vmatmul.mubr.msk.f32.vlgmr.msra.gmra.mrb[6].mxu0 %vm970_vm6, %v6173_v55 }
 0x57e   : > { %4418 = vmatprep.mubr.msk.f32.mxu0 %vm1602_vm10, %v6134_v34 }
 0x650   : > { %v6179_v50 = vpop.f32.mrb[6].mxu0 }
 0x651   : > { %v1586_v58 = vpop.f32.mrb[7].mxu0 }
 0x652   : > { %v4809_v59 = vpack.c.bf16 %v6179_v50, %v1586_v58  ;;  %1882 = vmatprep.mubr.f32.mxu1 %v1586_v58 }
 0x654   : > { %4810 = vmatprep.subr.bf16.mxu0 %v4809_v59 }
 0x655   : > { %4812 = vmatpush3.bf16.msra.mxu0 %v4809_v59 }
 0x656   : > { %4814 = vmatprep.subr.bf16.mxu0 %v4809_v59 }
 0x658   : > { %4419 = vmatmul.mubr.msk.f32.vlgmr.msra.gmra.mrb[8].mxu0 %vm1602_vm10, %v6186_v1 }
 0x659   : > { %4816 = vmatpush3.bf16.msra.mxu0 %v4809_v59  ;;  %4425 = vmatprep.mubr.msk.f32.mxu0 %vm1602_vm10, %v6143_v40  ;;  %v1983_v59 = vld [vmem:[#allocation11 + $0x68] sm:$0xff] }
 0x65a   : > { %4850 = vmatprep.subr.bf16.mxu0 %v4849_v3  ;;  %v4893_v62 = vpack.c.bf16 %v1985_v60, %v1983_v59  ;;  %v2007_v59 = vrot.slane %v2002_v48, %v6097_v54 }
 0x65c   : > { %4426 = vmatmul.mubr.msk.f32.vlgmr.msra.gmra.mrb[10].mxu0 %vm1602_vm10, %v6194_v43 }
 0x65d   : > { %4852 = vmatpush3.bf16.msra.mxu0 %v4849_v3  ;;  %v1982_v3 = vld [vmem:[#allocation11 + $0x60] sm:$0xff] }
 0x65e   : > { %4854 = vmatprep.subr.bf16.mxu0 %v4853_v6 }
 0x661   : > { %4856 = vmatpush3.bf16.msra.mxu0 %v4853_v6  ;;  %v4895_v6 = vpack.c.bf16 %v1984_v4, %v1982_v3 }
 0x662   : > { %4858 = vmatprep.subr.bf16.mxu0 %v4857_v9 }
 0x665   : > { %4860 = vmatpush3.bf16.msra.mxu0 %v4857_v9  ;;  %v1988_v9 = vld [vmem:[#allocation11 + $0x90] sm:$0xff] }
 0x666   : > { %4862 = vmatprep.subr.bf16.mxu0 %v4861_v12 }
 0x669   : > { %4864 = vmatpush3.bf16.msra.mxu0 %v4861_v12  ;;  %v4899_v12 = vpack.c.bf16 %v1988_v9, %v1986_v8 }
 0x66a   : > { %4866 = vmatprep.subr.bf16.mxu0 %v4865_v15 }
 0x66d   : > { %4868 = vmatpush3.bf16.msra.mxu0 %v4865_v15  ;;  %v1992_v15 = vld [vmem:[#allocation11 + $0xb0] sm:$0xff] }
 0x66e   : > { %4870 = vmatprep.subr.bf16.mxu0 %v4869_v18  ;;  %v4903_v16 = vpack.c.bf16 %v1992_v15, %v1990_v14  ;;  %v6247_v14 = vsel %vm2094_vm0, 1.0, %v5647_v0  ;;  %v2532_v15 = vld [vmem:[#allocation13 + $0x100] sm:$0xff] }
 0x671   : > { %4872 = vmatpush3.bf16.msra.mxu0 %v4869_v18  ;;  %v1997_v18 = vld [vmem:[#allocation11 + $0xd8] sm:$0xff] }
 0x672   : > { %4874 = vmatprep.subr.bf16.mxu0 %v4873_v21  ;;  %v4905_v19 = vpack.c.bf16 %v1997_v18, %v1995_v17  ;;  %v2534_v18 = vld [vmem:[#allocation13 + $0x110] sm:$0xff] }
 0x675   : > { %4876 = vmatpush3.bf16.msra.mxu0 %v4873_v21  ;;  %v1996_v21 = vld [vmem:[#allocation11 + $0xd0] sm:$0xff] }
 0x676   : > { %4878 = vmatprep.subr.bf16.mxu0 %v4877_v24  ;;  %v4907_v22 = vpack.c.bf16 %v1996_v21, %v1994_v20  ;;  %v2536_v21 = vld [vmem:[#allocation13 + $0x120] sm:$0xff] }
 0x679   : > { %4880 = vmatpush3.bf16.msra.mxu0 %v4877_v24  ;;  %v2001_v24 = vld [vmem:[#allocation11 + $0xf8] sm:$0xff] }
 0x67a   : > { %v4909_v26 = vpack.c.bf16 %v2001_v24, %v1999_v23  ;;  %v2538_v24 = vld [vmem:[#allocation13 + $0x130] sm:$0xff] }
 0x72b   : > { %v4420_v35 = vpop.f32.mrb[8].mxu0 }
 0x72c   : > { %v1674_v39 = vpop.f32.mrb[9].mxu0 }
 0x72d   : > { %1883 = vmatmul.mubr.f32.vlgmr.msra.gmra.mrb[10].mxu1 %v1674_v39 }
 0x72e   : > { %1887 = vmatprep.mubr.f32.mxu1 %v6179_v50  ;;  %4884 = vmatpush1.bf16.msra.mxu1 %v4883_v33  ;;  %v1987_v50 = vld [vmem:[#allocation11 + $0x88] sm:$0xff] }
 0x72f   : > { %v4427_v45 = vpop.f32.mrb[10].mxu0  ;;  %4886 = vmatprep.subr.bf16.mxu1 %v4885_v36  ;;  %v4897_v7 = vpack.c.bf16 %v1989_v5, %v1987_v50  ;;  %v6212_v5 = vadd.s32 16, %v6091_v52 }
 0x730   : > { %v1754_v58 = vpop.f32.mrb[11].mxu0 }
 0x731   : > { %1888 = vmatmul.mubr.f32.gmra.mrb[12].mxu1 %v4420_v35  ;;  %4460 = vmatprep.mubr.f32.mxu0 %v1754_v58  ;;  %vm2099_vm13 = vcmp.eq.s32.totalorder %v6212_v5, %v6106_v57  ;;  %vm2093_vm15 = vcmp.eq.s32.totalorder %v6212_v5, %v6094_v53  ;;  %vm2295_vm2 = vcmp.eq.s32.totalorder %v6212_v5, %v6128_v25 }
 0x732   : > { %4461 = vmatmul.mubr.f32.vlgmr.msra.gmra.mrb[12].mxu0 %v4427_v45  ;;  %4888 = vmatpush1.bf16.msra.mxu1 %v4887_v44  ;;  %v6220_v11 = vsel %vm2099_vm13, 1.0, %v5647_v0 }
 0x733   : > { %4890 = vmatprep.subr.bf16.mxu1 %v4889_v46  ;;  %2078 = vmatprep.mubr.f32.mxu1 %v5647_v0 }
 0x734   : > { %4467 = vmatprep.mubr.msk.f32.mxu0 %vm1602_vm10, %v6118_v2 }
 0x736   : > { %4892 = vmatpush1.bf16.msra.mxu1 %v4891_v61  ;;  %v2011_v61 = vrot.slane %v2002_v48, %v6103_v56  ;;  %v2302_v48 = vadd.s32 1, %v6215_v10 }
 0x737   : > { %4894 = vmatprep.subr.bf16.mxu1 %v4893_v62 }
 0x738   : > { %vm2304_vm5 = vcmp.eq.s32.totalorder %v6089_v51, %v2302_v48 }
 0x73a   : > { %4896 = vmatpush1.bf16.msra.mxu1 %v4895_v6 }
 0x73b   : > { %4898 = vmatprep.subr.bf16.mxu1 %v4897_v7 }
 0x73e   : > { %4900 = vmatpush1.bf16.msra.mxu1 %v4899_v12  ;;  %v6229_v12 = vsel %vm2100_vm14, 1.0, %v5647_v0  ;;  %vm3168_vm14 = vcmask 523264  }
 0x73f   : > { %4902 = vmatprep.subr.bf16.mxu1 %v4901_v13  ;;  %v6238_v13 = vsel %vm2093_vm15, 1.0, %v5647_v0 }
 0x742   : > { %4904 = vmatpush1.bf16.msra.mxu1 %v4903_v16  ;;  %v2533_v16 = vld [vmem:[#allocation13 + $0x108] sm:$0xff] }
 0x743   : > { %4906 = vmatprep.subr.bf16.mxu1 %v4905_v19  ;;  %v4969_v17 = vpack.c.bf16 %v2533_v16, %v2532_v15  ;;  %v2535_v19 = vld [vmem:[#allocation13 + $0x118] sm:$0xff]  ;;  %v2504_v16 = vld [vmem:[#allocation13 + $0x20] sm:$0xff] }
 0x744   : > { %v4973_v20 = vpack.c.bf16 %v2535_v19, %v2534_v18  ;;  %v2522_v18 = vld [vmem:[#allocation13 + $0xb0] sm:$0xff]  ;;  %v2523_v19 = vld [vmem:[#allocation13 + $0xb8] sm:$0xff] }
 0x746   : > { %4908 = vmatpush1.bf16.msra.mxu1 %v4907_v22  ;;  %v2537_v22 = vld [vmem:[#allocation13 + $0x128] sm:$0xff] }
 0x747   : > { %4910 = vmatprep.subr.bf16.mxu1 %v4909_v26  ;;  %v4977_v23 = vpack.c.bf16 %v2537_v22, %v2536_v21  ;;  %v2539_v26 = vld [vmem:[#allocation13 + $0x138] sm:$0xff]  ;;  %v4949_v21 = vpack.c.bf16 %v2523_v19, %v2522_v18  ;;  %v2506_v22 = vld [vmem:[#allocation13 + $0x30] sm:$0xff]  ;;  %v2730_v18 = vld [vmem:[#allocation14 + $0x8] sm:$0xff] }
 0x748   : > { %v4981_v27 = vpack.c.bf16 %v2539_v26, %v2538_v24  ;;  %v2524_v24 = vld [vmem:[#allocation13 + $0xc0] sm:$0xff]  ;;  %v2525_v26 = vld [vmem:[#allocation13 + $0xc8] sm:$0xff]  ;;  %v2732_v19 = vld [vmem:[#allocation14 + $0x18] sm:$0xff] }
 0x74a   : > { %4912 = vmatpush1.bf16.msra.mxu1 %v4911_v29  ;;  %v2541_v29 = vld [vmem:[#allocation13 + $0x148] sm:$0xff] }
 0x74b   : > { %4970 = vmatprep.subr.bf16.mxu1 %v4969_v17 }
 0x800   : > { %v4097_v30 = vpop.f32.mrb[10].mxu1 }
 0x801   : > { %v4098_v31 = vpop.f32.mrb[11].mxu1 }
 0x802   : > { %v4099_v33 = vadd.f32 %v4098_v31, %v4097_v30  ;;  %v4985_v30 = vpack.c.bf16 %v2541_v29, %v2540_v28  ;;  %v2542_v31 = vld [vmem:[#allocation13 + $0x150] sm:$0xff]  ;;  %v4953_v28 = vpack.c.bf16 %v2525_v26, %v2524_v24  ;;  %v2508_v29 = vld [vmem:[#allocation13 + $0x40] sm:$0xff]  ;;  %v2736_v24 = vld [vmem:[#allocation14 + $0x38] sm:$0xff] }
 0x804   : > { %v4100_v35 = vpop.f32.mrb[12].mxu1  ;;  %v1885_v36 = vadd.f32 %v4099_v33, %v3910_v32 }
 0x805   : > { %v4101_v37 = vpop.f32.mrb[13].mxu1  ;;  %v4462_v38 = vpop.f32.mrb[12].mxu0 }
 0x806   : > { %v4102_v39 = vadd.f32 %v4101_v37, %v4100_v35  ;;  %v1959_v41 = vpop.f32.mrb[13].mxu0 }
 0x807   : > { %v1960_v42 = vadd.f32 %v1959_v41, %v1885_v36 }
 0x808   : > { %v1890_v44 = vadd.f32 %v4102_v39, %v3910_v32  ;;  %v2543_v32 = vld [vmem:[#allocation13 + $0x158] sm:$0xff] }
 0x809   : > { %v1968_v45 = vmax.f32 %v1960_v42, 0.0  ;;  %v4989_v33 = vpack.c.bf16 %v2543_v32, %v2542_v31  ;;  %v6265_v42 = vsel %vm2295_vm2, 1.0, %v5647_v0  ;;  %v2526_v31 = vld [vmem:[#allocation13 + $0xd0] sm:$0xff]  ;;  %v2527_v32 = vld [vmem:[#allocation13 + $0xd8] sm:$0xff] }
 0x80a   : > { %v1965_v46 = vadd.f32 %v4462_v38, %v1890_v44  ;;  %v2301_v44 = vadd.s32 1, %v6212_v5  ;;  %v2502_v5 = vld [vmem:[#allocation13 + $0x10] sm:$0xff] }
 0x80b   : > { %2079 = vmatmul.mubr.f32.vlgmr.msra.gmra.mrb[14].mxu1 %v1968_v45  ;;  %v2516_v45 = vld [vmem:[#allocation13 + $0x80] sm:$0xff] }
 0x80c   : > { %v1969_v47 = vmax.f32 %v1965_v46, 0.0  ;;  %2084 = vmatprep.mubr.f32.mxu1 %v5647_v0  ;;  %4972 = vmatpush3.bf16.msra.mxu1 %v4969_v17  ;;  %v2517_v46 = vld [vmem:[#allocation13 + $0x88] sm:$0xff]  ;;  %vm2303_vm4 = vcmp.eq.s32.totalorder %v6089_v51, %v2301_v44  ;;  %v2528_v44 = vld [vmem:[#allocation13 + $0xe0] sm:$0xff] }
 0x80d   : > { %4974 = vmatprep.subr.bf16.mxu1 %v4973_v20  ;;  %v2505_v17 = vld [vmem:[#allocation13 + $0x28] sm:$0xff] }
 0x80f   : > { %2085 = vmatmul.mubr.f32.gmra.mrb[16].mxu1 %v1969_v47  ;;  %v6275_v47 = vsel %vm2296_vm3, 1.0, %v5647_v0 }
 0x810   : > { %4976 = vmatpush3.bf16.msra.mxu1 %v4973_v20  ;;  %v4947_v20 = vpack.c.bf16 %v2505_v17, %v2504_v16  ;;  %v2547_v16 = vld [vmem:[#allocation13 + $0x178] sm:$0xff] }
 0x811   : > { %4978 = vmatprep.subr.bf16.mxu1 %v4977_v23 }
 0x814   : > { %4980 = vmatpush3.bf16.msra.mxu1 %v4977_v23  ;;  %v2507_v23 = vld [vmem:[#allocation13 + $0x38] sm:$0xff] }
 0x815   : > { %4982 = vmatprep.subr.bf16.mxu1 %v4981_v27 }
 0x818   : > { %4984 = vmatpush3.bf16.msra.mxu1 %v4981_v27  ;;  %v4951_v27 = vpack.c.bf16 %v2507_v23, %v2506_v22  ;;  %v2731_v22 = vld [vmem:[#allocation14 + $0x10] sm:$0xff]  ;;  %v2734_v23 = vld [vmem:[#allocation14 + $0x28] sm:$0xff] }
 0x819   : > { %4986 = vmatprep.subr.bf16.mxu1 %v4985_v30 }
 0x81c   : > { %4988 = vmatpush3.bf16.msra.mxu1 %v4985_v30  ;;  %v2509_v30 = vld [vmem:[#allocation13 + $0x48] sm:$0xff] }
 0x81d   : > { %4990 = vmatprep.subr.bf16.mxu1 %v4989_v33 }
 0x820   : > { %4992 = vmatpush3.bf16.msra.mxu1 %v4989_v33  ;;  %v4955_v33 = vpack.c.bf16 %v2509_v30, %v2508_v29  ;;  %v2733_v29 = vld [vmem:[#allocation14 + $0x20] sm:$0xff]  ;;  %v2735_v30 = vld [vmem:[#allocation14 + $0x30] sm:$0xff] }
 0x8de   : > { %v2080_v58 = vpop.f32.mrb[14].mxu1 }
 0x8df   : > { %v2082_v60 = vpop.f32.mrb[15].mxu1  ;;  %v2081_v3 = vadd.f32 %v2080_v58, %v2007_v59  ;;  %v4937_v58 = vpack.c.bf16 %v2517_v46, %v2516_v45  ;;  %v2529_v45 = vld [vmem:[#allocation13 + $0xe8] sm:$0xff] }
 0x8e0   : > { %v2083_v6 = vadd.f32 %v2082_v60, %v2011_v61  ;;  %v2501_v60 = vld [vmem:[#allocation13 + $0x8] sm:$0xff]  ;;  %v4961_v48 = vpack.c.bf16 %v2529_v45, %v2528_v44  ;;  %v2737_v45 = vld [vmem:[#allocation14 + $0x40] sm:$0xff] }
 0x8e2   : > { %v2086_v62 = vpop.f32.mrb[16].mxu1 }
 0x8e3   : > { %v2087_v4 = vadd.f32 %v2086_v62, %v2007_v59  ;;  %v2088_v50 = vpop.f32.mrb[17].mxu1  ;;  %v2500_v59 = vld [vmem:[#allocation13] sm:$0xff]  ;;  %v2519_v62 = vld [vmem:[#allocation13 + $0x98] sm:$0xff] }
 0x8e4   : > { %v2089_v7 = vadd.f32 %v2088_v50, %v2011_v61  ;;  %v2518_v61 = vld [vmem:[#allocation13 + $0x90] sm:$0xff] }
 0x8e5   : > { %v4917_v8 = vpack.c.bf16 %v2087_v4, %v2081_v3  ;;  %v4939_v3 = vpack.c.bf16 %v2501_v60, %v2500_v59  ;;  %v6284_v4 = vsel %vm2303_vm4, 1.0, %v5647_v0  ;;  %v4941_v50 = vpack.c.bf16 %v2519_v62, %v2518_v61  ;;  %v2513_v59 = vld [vmem:[#allocation13 + $0x68] sm:$0xff]  ;;  %v2530_v60 = vld [vmem:[#allocation13 + $0xf0] sm:$0xff]  ;;  %v2531_v61 = vld [vmem:[#allocation13 + $0xf8] sm:$0xff] }
 0x8e6   : > { %v4913_v9 = vpack.c.bf16 %v2089_v7, %v2083_v6  ;;  %v2503_v6 = vld [vmem:[#allocation13 + $0x18] sm:$0xff]  ;;  %v2520_v7 = vld [vmem:[#allocation13 + $0xa0] sm:$0xff] }
 0x8e7   : > { %v4943_v10 = vpack.c.bf16 %v2503_v6, %v2502_v5  ;;  %v2515_v5 = vld [vmem:[#allocation13 + $0x78] sm:$0xff] }
 0x8e8   : > { %4914 = vmatprep.subr.bf16.mxu0 %v4913_v9 }
 0x8e9   : > { %4916 = vmatpush3.bf16.msra.mxu0 %v4913_v9  ;;  %v6292_v9 = vsel %vm2304_vm5, 1.0, %v5647_v0 }
 0x8ea   : > { %4918 = vmatprep.subr.bf16.mxu0 %v4917_v8 }
 0x8ec   : > { %4468 = vmatmul.mubr.msk.f32.vlgmr.msra.gmra.mrb[14].mxu0 %vm1602_vm10, %v6164_v49 }
 0x8ed   : > { %4920 = vmatpush3.bf16.msra.mxu0 %v4917_v8  ;;  %4470 = vmatprep.mubr.msk.f32.mxu0 %vm1602_vm10, %v6220_v11  ;;  %v2521_v8 = vld [vmem:[#allocation13 + $0xa8] sm:$0xff] }
 0x8ee   : > { %v4945_v15 = vpack.c.bf16 %v2521_v8, %v2520_v7  ;;  %v2544_v7 = vld [vmem:[#allocation13 + $0x160] sm:$0xff]  ;;  %v2545_v8 = vld [vmem:[#allocation13 + $0x168] sm:$0xff] }
 0x8f0   : > { %4471 = vmatmul.mubr.msk.f32.gmra.mrb[16].mxu0 %vm1602_vm10, %v6229_v12 }
 0x8f1   : > { %4477 = vmatprep.mubr.msk.f32.mxu0 %vm1602_vm10, %v6115_v63 }
 0x8f4   : > { %4478 = vmatmul.mubr.msk.f32.vlgmr.msra.gmra.mrb[14].mxu0 %vm1602_vm10, %v6173_v55 }
 0x8f5   : > { %4480 = vmatprep.mubr.msk.f32.mxu0 %vm1602_vm10, %v6238_v13 }
 0x8f8   : > { %4481 = vmatmul.mubr.msk.f32.gmra.mrb[16].mxu0 %vm1602_vm10, %v6247_v14 }
 0x8f9   : > { %4491 = vmatprep.mubr.msk.f32.mxu0 %vm2309_vm1, %v6134_v34 }
 0x9c7   : > { %v6253_v35 = vpop.f32.mrb[14].mxu0 }
 0x9c8   : > { %v2276_v36 = vpop.f32.mrb[15].mxu0 }
 0x9c9   : > { %v4921_v37 = vpack.c.bf16 %v6253_v35, %v2276_v36 }
 0x9cb   : > { %v6256_v38 = vpop.f32.mrb[16].mxu0  ;;  %4922 = vmatprep.subr.bf16.mxu0 %v4921_v37 }
 0x9cc   : > { %v6258_v39 = vpop.f32.mrb[17].mxu0  ;;  %4924 = vmatpush3.bf16.msra.mxu0 %v4921_v37 }
 0x9cd   : > { %v4925_v41 = vpack.c.bf16 %v6256_v38, %v6258_v39 }
 0x9cf   : > { %4926 = vmatprep.subr.bf16.mxu0 %v4925_v41 }
 0x9d0   : > { %4928 = vmatpush3.bf16.msra.mxu0 %v4925_v41 }
 0x9d1   : > { %4930 = vmatprep.subr.bf16.mxu0 %v4921_v37 }
 0x9d3   : > { %4492 = vmatmul.mubr.msk.f32.vlgmr.msra.gmra.mrb[18].mxu0 %vm2309_vm1, %v6186_v1 }
 0x9d4   : > { %4932 = vmatpush3.bf16.msra.mxu0 %v4921_v37  ;;  %4494 = vmatprep.mubr.msk.f32.mxu0 %vm2309_vm1, %v6265_v42  ;;  %v2510_v37 = vld [vmem:[#allocation13 + $0x50] sm:$0xff] }
 0x9d5   : > { %4934 = vmatprep.subr.bf16.mxu0 %v4925_v41 }
 0x9d7   : > { %4495 = vmatmul.mubr.msk.f32.gmra.mrb[20].mxu0 %vm2309_vm1, %v6275_v47 }
 0x9d8   : > { %4936 = vmatpush3.bf16.msra.mxu0 %v4925_v41  ;;  %4505 = vmatprep.mubr.msk.f32.mxu0 %vm2309_vm1, %v6143_v40  ;;  %v2511_v41 = vld [vmem:[#allocation13 + $0x58] sm:$0xff] }
 0x9d9   : > { %4938 = vmatprep.subr.bf16.mxu0 %v4937_v58  ;;  %v4959_v46 = vpack.c.bf16 %v2511_v41, %v2510_v37  ;;  %v2512_v58 = vld [vmem:[#allocation13 + $0x60] sm:$0xff] }
 0x9da   : > { %v4963_v62 = vpack.c.bf16 %v2513_v59, %v2512_v58  ;;  %v2744_v58 = vld [vmem:[#allocation14 + $0x78] sm:$0xff] }
 0x9db   : > { %4506 = vmatmul.mubr.msk.f32.vlgmr.msra.gmra.mrb[22].mxu0 %vm2309_vm1, %v6194_v43 }
 0x9dc   : > { %4508 = vmatprep.mubr.msk.f32.mxu0 %vm2309_vm1, %v6284_v4  ;;  %4940 = vmatpush3.bf16.msra.mxu0 %v4939_v3  ;;  %v4965_v3 = vpack.c.bf16 %v2531_v61, %v2530_v60 }
 0x9dd   : > { %4942 = vmatprep.subr.bf16.mxu0 %v4941_v50  ;;  %v2514_v50 = vld [vmem:[#allocation13 + $0x70] sm:$0xff] }
 0x9de   : > { %v4967_v6 = vpack.c.bf16 %v2515_v5, %v2514_v50  ;;  %v2746_v50 = vld [vmem:[#allocation14 + $0x88] sm:$0xff]  ;;  %v2748_v5 = vld [vmem:[#allocation14 + $0x98] sm:$0xff] }
 0x9df   : > { %4509 = vmatmul.mubr.msk.f32.gmra.mrb[24].mxu0 %vm2309_vm1, %v6292_v9 }
 0x9e0   : > { %2619 = vmatprep.mubr.f32.mxu0 %v2276_v36  ;;  %4944 = vmatpush3.bf16.msra.mxu0 %v4943_v10  ;;  %v4957_v36 = vpack.c.bf16 %v2527_v32, %v2526_v31  ;;  %v4993_v10 = vpack.c.bf16 %v2545_v8, %v2544_v7  ;;  %v2738_v32 = vld [vmem:[#allocation14 + $0x48] sm:$0xff] }
 0x9e1   : > { %4946 = vmatprep.subr.bf16.mxu0 %v4945_v15  ;;  %v2546_v15 = vld [vmem:[#allocation13 + $0x170] sm:$0xff] }
 0x9e2   : > { %4994 = vmatprep.subr.bf16.mxu1 %v4993_v10  ;;  %v4997_v17 = vpack.c.bf16 %v2547_v16, %v2546_v15  ;;  %v2747_v15 = vld [vmem:[#allocation14 + $0x90] sm:$0xff]  ;;  %v2750_v16 = vld [vmem:[#allocation14 + $0xa8] sm:$0xff] }
 0x9e3   : > { %4996 = vmatpush3.bf16.msra.mxu1 %v4993_v10  ;;  %v2745_v10 = vld [vmem:[#allocation14 + $0x80] sm:$0xff] }
 0x9e4   : > { %4948 = vmatpush3.bf16.msra.mxu0 %v4947_v20  ;;  %4998 = vmatprep.subr.bf16.mxu1 %v4997_v17  ;;  %v5001_v20 = vpack.c.bf16 %v2732_v19, %v2730_v18  ;;  %v2749_v19 = vld [vmem:[#allocation14 + $0xa0] sm:$0xff] }
 0x9e5   : > { %4950 = vmatprep.subr.bf16.mxu0 %v4949_v21  ;;  %v2729_v21 = vld [vmem:[#allocation14] sm:$0xff] }
 0x9e6   : > { %v5003_v26 = vpack.c.bf16 %v2731_v22, %v2729_v21  ;;  %v2754_v22 = vld [vmem:[#allocation14 + $0xc8] sm:$0xff] }
 0x9e7   : > { %5000 = vmatpush3.bf16.msra.mxu1 %v4997_v17  ;;  %v2752_v17 = vld [vmem:[#allocation14 + $0xb8] sm:$0xff] }
 0x9e8   : > { %4952 = vmatpush3.bf16.msra.mxu0 %v4951_v27  ;;  %v5021_v18 = vpack.c.bf16 %v2752_v17, %v2750_v16 }
 0x9e9   : > { %4954 = vmatprep.subr.bf16.mxu0 %v4953_v28  ;;  %v5005_v28 = vpack.c.bf16 %v2736_v24, %v2734_v23  ;;  %v2756_v23 = vld [vmem:[#allocation14 + $0xd8] sm:$0xff] }
 0x9ea   : > { %v5025_v24 = vpack.c.bf16 %v2756_v23, %v2754_v22  ;;  %v2761_v22 = vld [vmem:[%s6599_s12] sm:$0x3]  ;;  %s5550_s12 = scalar_lea.vmem %s6485_s23, 1024 }
 0x9eb   : > { %p5551_p12 = scmp.ne.s32.totalorder %s6485_s23, %s5550_s12  ;;  %p5558_p3 = scmp.lt.s32.totalorder %s5556_s5, %s5550_s12 }
 0x9ec   : > { %4956 = vmatpush3.bf16.msra.mxu0 %v4955_v33  ;;  %v2740_v33 = vld [vmem:[#allocation14 + $0x58] sm:$0xff] }
 0x9ed   : > { %4958 = vmatprep.subr.bf16.mxu0 %v4957_v36  ;;  %v5007_v36 = vpack.c.bf16 %v2735_v30, %v2733_v29  ;;  %v5009_v41 = vpack.c.bf16 %v2740_v33, %v2738_v32  ;;  %v2760_v29 = vld [vmem:[#allocation14 + $0xf8] sm:$0xff]  ;;  %v2759_v32 = vld [vmem:[#allocation14 + $0xf0] sm:$0xff]  ;;  %p5552_p13 = pnand %p5551_p12, %p6602_p1  ;;  %p5559_p4 = por %p5558_p3, %p5557_p2 }
 0x9ef   : > { %p5553_p0 = pneg %p5552_p13 }
 0x9f0   : > { %4960 = vmatpush3.bf16.msra.mxu0 %v4959_v46  ;;  %v2739_v46 = vld [vmem:[#allocation14 + $0x50] sm:$0xff] }
 0x9f1   : > { %4962 = vmatprep.subr.bf16.mxu0 %v4961_v48  ;;  %v2742_v48 = vld [vmem:[#allocation14 + $0x68] sm:$0xff]  ;;  %v5011_v60 = vpack.c.bf16 %v2739_v46, %v2737_v45  ;;  %p5560_p10 = pnand %p5559_p4, %p5553_p0 }
 0x9f4   : > { %4964 = vmatpush3.bf16.msra.mxu0 %v4963_v62  ;;  %v5013_v62 = vpack.c.bf16 %v2744_v58, %v2742_v48  ;;  %v3935_v48 = vld [vmem:[%s6598_s19] ss:$0 sm:$0xff]  ;;  %s6601_s19 = sld [smem:[#allocation35_spill]] }
 0x9f5   : > { %4966 = vmatprep.subr.bf16.mxu0 %v4965_v3  ;;  %v2743_v3 = vld [vmem:[#allocation14 + $0x70] sm:$0xff] }
 0x9f8   : > { %4968 = vmatpush3.bf16.msra.mxu0 %v4967_v6 }
 0x9f9   : > { %5002 = vmatprep.subr.bf16.mxu0 %v5001_v20  ;;  %v2751_v20 = vld [vmem:[#allocation14 + $0xb0] sm:$0xff] }
 0x9fa   : > { %v5023_v21 = vpack.c.bf16 %v2751_v20, %v2749_v19  ;;  %s6491_s1 = scalar_lea.hbm %s6601_s19, %s3990_s30 }
 0xaa6   : > { %v4493_v27 = vpop.f32.mrb[18].mxu0 }
 0xaa7   : > { %v2386_v31 = vpop.f32.mrb[19].mxu0 }
 0xaa8   : > { %2620 = vmatmul.mubr.f32.vlgmr.msra.gmra.mrb[26].mxu0 %v2386_v31  ;;  %v2757_v31 = vld [vmem:[#allocation14 + $0xe0] sm:$0xff] }
 0xaa9   : > { %2624 = vmatprep.mubr.f32.mxu0 %v6253_v35  ;;  %5004 = vmatpush1.bf16.msra.mxu0 %v5003_v26  ;;  %v2741_v35 = vld [vmem:[#allocation14 + $0x60] sm:$0xff]  ;;  %v5031_v33 = vpack.c.bf16 %v2759_v32, %v2757_v31 }
 0xaaa   : > { %v4496_v37 = vpop.f32.mrb[20].mxu0  ;;  %5006 = vmatprep.subr.bf16.mxu0 %v5005_v28  ;;  %v5015_v7 = vpack.c.bf16 %v2743_v3, %v2741_v35  ;;  %v2753_v26 = vld [vmem:[#allocation14 + $0xc0] sm:$0xff] }
 0xaab   : > { %v2396_v44 = vpop.f32.mrb[21].mxu0 }
 0xaac   : > { %2625 = vmatmul.mubr.f32.gmra.mrb[28].mxu0 %v4493_v27  ;;  %v2755_v27 = vld [vmem:[#allocation14 + $0xd0] sm:$0xff] }
 0xaad   : > { %2629 = vmatprep.mubr.f32.mxu0 %v6258_v39  ;;  %5008 = vmatpush1.bf16.msra.mxu0 %v5007_v36  ;;  %v5017_v39 = vpack.c.bf16 %v2748_v5, %v2746_v50  ;;  %v5027_v28 = vpack.c.bf16 %v2755_v27, %v2753_v26  ;;  %v2770_v27 = vrot.slane %v2761_v22, %v6103_v56 }
 0xaae   : > { %v4507_v59 = vpop.f32.mrb[22].mxu0  ;;  %5010 = vmatprep.subr.bf16.mxu0 %v5009_v41 }
 0xaaf   : > { %v2481_v61 = vpop.f32.mrb[23].mxu0 }
 0xab0   : > { %2630 = vmatmul.mubr.f32.gmra.mrb[30].mxu0 %v2396_v44  ;;  %4543 = vmatprep.mubr.f32.mxu1 %v2481_v61 }
 0xab1   : > { %2634 = vmatprep.mubr.f32.mxu0 %v6256_v38  ;;  %4544 = vmatmul.mubr.f32.vlgmr.msra.gmra.mrb[18].mxu1 %v4507_v59  ;;  %v5019_v38 = vpack.c.bf16 %v2747_v15, %v2745_v10 }
 0xab2   : > { %v4510_v6 = vpop.f32.mrb[24].mxu0  ;;  %5012 = vmatpush1.bf16.msra.mxu0 %v5011_v60 }
 0xab3   : > { %v2491_v8 = vpop.f32.mrb[25].mxu0  ;;  %5014 = vmatprep.subr.bf16.mxu0 %v5013_v62 }
 0xab4   : > { %2635 = vmatmul.mubr.f32.gmra.mrb[32].mxu0 %v4496_v37  ;;  %4546 = vmatprep.mubr.f32.mxu1 %v2491_v8 }
 0xab5   : > { %4547 = vmatmul.mubr.f32.gmra.mrb[20].mxu1 %v4510_v6  ;;  %2837 = vmatprep.mubr.f32.mxu0 %v5647_v0 }
 0xab6   : > { %5016 = vmatpush1.bf16.msra.mxu0 %v5015_v7  ;;  %4557 = vmatprep.mubr.msk.f32.mxu1 %vm2309_vm1, %v6118_v2  ;;  %v2758_v2 = vld [vmem:[#allocation14 + $0xe8] sm:$0xff] }
 0xab7   : > { %5018 = vmatprep.subr.bf16.mxu0 %v5017_v39  ;;  %v5029_v30 = vpack.c.bf16 %v2760_v29, %v2758_v2 }
 0xaba   : > { %5020 = vmatpush1.bf16.msra.mxu0 %v5019_v38 }
 0xabb   : > { %5022 = vmatprep.subr.bf16.mxu0 %v5021_v18 }
 0xabe   : > { %5024 = vmatpush1.bf16.msra.mxu0 %v5023_v21 }
 0xabf   : > { %5026 = vmatprep.subr.bf16.mxu0 %v5025_v24  ;;  %v2766_v24 = vrot.slane %v2761_v22, %v6097_v54  ;;  %v3420_v22 = vld [vmem:[#allocation16 + $0x8] sm:$0xff] }
 0xac2   : > { %5028 = vmatpush1.bf16.msra.mxu0 %v5027_v28 }
 0xac3   : > { %5030 = vmatprep.subr.bf16.mxu0 %v5029_v30 }
 0xac6   : > { %5032 = vmatpush1.bf16.msra.mxu0 %v5031_v33 }
 0xb7b   : > { %v4181_v36 = vpop.f32.mrb[26].mxu0 }
 0xb7c   : > { %v4182_v37 = vpop.f32.mrb[27].mxu0 }
 0xb7d   : > { %v4183_v41 = vadd.f32 %v4182_v37, %v4181_v36 }
 0xb7f   : > { %v4184_v44 = vpop.f32.mrb[28].mxu0  ;;  %v2622_v62 = vadd.f32 %v4183_v41, %v3935_v48 }
 0xb80   : > { %v4185_v45 = vpop.f32.mrb[29].mxu0 }
 0xb81   : > { %v4186_v46 = vadd.f32 %v4185_v45, %v4184_v44 }
 0xb83   : > { %v4187_v58 = vpop.f32.mrb[30].mxu0  ;;  %v2627_v59 = vadd.f32 %v4186_v46, %v3935_v48 }
 0xb84   : > { %v4188_v60 = vpop.f32.mrb[31].mxu0  ;;  %v4545_v61 = vpop.f32.mrb[18].mxu1 }
 0xb85   : > { %v4189_v35 = vadd.f32 %v4188_v60, %v4187_v58  ;;  %v2712_v3 = vadd.f32 %v4545_v61, %v2627_v59  ;;  %v2706_v50 = vpop.f32.mrb[19].mxu1  ;;  %v6314_v60 = vadd.s32 32, %v6091_v52  ;;  %v6317_v61 = vadd.s32 40, %v6091_v52 }
 0xb86   : > { %v2707_v5 = vadd.f32 %v2706_v50, %v2622_v62  ;;  %v6322_v62 = vadd.s32 48, %v6091_v52 }
 0xb87   : > { %v4190_v6 = vpop.f32.mrb[32].mxu0  ;;  %v2632_v7 = vadd.f32 %v4189_v35, %v3935_v48  ;;  %v2726_v18 = vmax.f32 %v2712_v3, 0.0  ;;  %vm2878_vm6 = vcmp.eq.s32.totalorder %v6314_v60, %v6106_v57  ;;  %vm2879_vm7 = vcmp.eq.s32.totalorder %v6317_v61, %v6106_v57 }
 0xb88   : > { %v2725_v8 = vmax.f32 %v2707_v5, 0.0  ;;  %v4191_v39 = vpop.f32.mrb[33].mxu0  ;;  %v4548_v10 = vpop.f32.mrb[20].mxu1  ;;  %v3940_v35 = vsel %vm2878_vm6, 1.0, %v5647_v0  ;;  %v6332_v3 = vadd.s32 56, %v6091_v52  ;;  %vm2880_vm8 = vcmp.eq.s32.totalorder %v6322_v62, %v6106_v57 }
 0xb89   : > { %v4192_v15 = vadd.f32 %v4191_v39, %v4190_v6  ;;  %v2716_v38 = vpop.f32.mrb[21].mxu1  ;;  %vm2866_vm10 = vcmp.eq.s32.totalorder %v6314_v60, %v6094_v53  ;;  %vm2867_vm11 = vcmp.eq.s32.totalorder %v6317_v61, %v6094_v53  ;;  %vm2868_vm12 = vcmp.eq.s32.totalorder %v6322_v62, %v6094_v53  ;;  %v3436_v39 = vld [vmem:[#allocation16 + $0x88] sm:$0xff] }
 0xb8a   : > { %v2717_v16 = vadd.f32 %v2716_v38, %v2632_v7  ;;  %2838 = vmatmul.mubr.f32.vlgmr.msra.gmra.mrb[34].mxu0 %v2725_v8  ;;  %vm2881_vm9 = vcmp.eq.s32.totalorder %v6332_v3, %v6106_v57  ;;  %v3936_v57 = vsel %vm2866_vm10, 1.0, %v5647_v0  ;;  %vm2869_vm13 = vcmp.eq.s32.totalorder %v6332_v3, %v6094_v53  ;;  %v3435_v8 = vld [vmem:[#allocation16 + $0x80] sm:$0xff] }
 0xb8b   : > { %v2637_v17 = vadd.f32 %v4192_v15, %v3935_v48  ;;  %2843 = vmatprep.mubr.f32.mxu0 %v5647_v0  ;;  %v3943_v52 = vsel %vm2881_vm9, 1.0, %v5647_v0  ;;  %v3452_v15 = vld [vmem:[#allocation16 + $0x108] sm:$0xff]  ;;  %vm3140_vm15 = vcmp.eq.s32.totalorder %v6314_v60, %v6128_v25  ;;  %vm3142_vm2 = vcmp.eq.s32.totalorder %v6322_v62, %v6128_v25 }
 0xb8c   : > { %v2727_v20 = vmax.f32 %v2717_v16, 0.0  ;;  %vm3143_vm5 = vcmp.eq.s32.totalorder %v6332_v3, %v6128_v25 }
 0xb8d   : > { %v2722_v19 = vadd.f32 %v4548_v10, %v2637_v17  ;;  %v3451_v10 = vld [vmem:[#allocation16 + $0x100] sm:$0xff] }
 0xb8e   : > { %2844 = vmatmul.mubr.f32.gmra.mrb[36].mxu0 %v2726_v18  ;;  %v5081_v18 = vpack.c.bf16 %v3436_v39, %v3435_v8 }
 0xb8f   : > { %2849 = vmatprep.mubr.f32.mxu0 %v5647_v0  ;;  %v2728_v21 = vmax.f32 %v2722_v19, 0.0  ;;  %v5113_v19 = vpack.c.bf16 %v3452_v15, %v3451_v10  ;;  %v3427_v10 = vld [vmem:[#allocation16 + $0x40] sm:$0xff]  ;;  %v3428_v15 = vld [vmem:[#allocation16 + $0x48] sm:$0xff] }
 0xb92   : > { %2850 = vmatmul.mubr.f32.gmra.mrb[38].mxu0 %v2727_v20  ;;  %v3152_v20 = vadd.s32 1, %v6314_v60  ;;  %v3458_v60 = vld [vmem:[#allocation16 + $0x138] sm:$0xff] }
 0xb93   : > { %2855 = vmatprep.mubr.f32.mxu0 %v5647_v0 }
 0xb94   : > { %vm3156_vm0 = vcmp.eq.s32.totalorder %v6089_v51, %v3152_v20  ;;  %v3429_v20 = vld [vmem:[#allocation16 + $0x50] sm:$0xff] }
 0xb96   : > { %2856 = vmatmul.mubr.f32.gmra.mrb[40].mxu0 %v2728_v21  ;;  %v3419_v21 = vld [vmem:[#allocation16] sm:$0xff] }
 0xb97   : > { %4633 = vmatprep.mubr.msk.f32.mxu0 %vm3168_vm14, %v6143_v40 }
 0xc5d   : > { %v2839_v23 = vpop.f32.mrb[34].mxu0 }
 0xc5e   : > { %v2841_v26 = vpop.f32.mrb[35].mxu0  ;;  %v2840_v2 = vadd.f32 %v2839_v23, %v2766_v24  ;;  %v3437_v23 = vld [vmem:[#allocation16 + $0x90] sm:$0xff] }
 0xc5f   : > { %v2842_v31 = vadd.f32 %v2841_v26, %v2770_v27  ;;  %v3453_v26 = vld [vmem:[#allocation16 + $0x110] sm:$0xff] }
 0xc61   : > { %v2845_v28 = vpop.f32.mrb[36].mxu0 }
 0xc62   : > { %v2846_v29 = vadd.f32 %v2845_v28, %v2766_v24  ;;  %v2847_v30 = vpop.f32.mrb[37].mxu0  ;;  %v3153_v28 = vadd.s32 1, %v6317_v61 }
 0xc63   : > { %v2848_v32 = vadd.f32 %v2847_v30, %v2770_v27 }
 0xc64   : > { %v5041_v33 = vpack.c.bf16 %v2846_v29, %v2840_v2  ;;  %v5083_v2 = vpack.c.bf16 %v3420_v22, %v3419_v21  ;;  %v3154_v29 = vadd.s32 1, %v6322_v62  ;;  %vm3157_vm3 = vcmp.eq.s32.totalorder %v6089_v51, %v3153_v28  ;;  %v3430_v21 = vld [vmem:[#allocation16 + $0x58] sm:$0xff]  ;;  %v3447_v22 = vld [vmem:[#allocation16 + $0xe0] sm:$0xff] }
 0xc65   : > { %v5033_v36 = vpack.c.bf16 %v2848_v32, %v2842_v31  ;;  %v2851_v37 = vpop.f32.mrb[38].mxu0  ;;  %v3421_v31 = vld [vmem:[#allocation16 + $0x10] sm:$0xff]  ;;  %v3422_v32 = vld [vmem:[#allocation16 + $0x18] sm:$0xff]  ;;  %v5103_v28 = vpack.c.bf16 %v3430_v21, %v3429_v20 }
 0xc66   : > { %v2853_v41 = vpop.f32.mrb[39].mxu0  ;;  %v2852_v45 = vadd.f32 %v2851_v37, %v2766_v24  ;;  %v3440_v37 = vld [vmem:[#allocation16 + $0xa8] sm:$0xff]  ;;  %vm3158_vm4 = vcmp.eq.s32.totalorder %v6089_v51, %v3154_v29  ;;  %v3431_v29 = vld [vmem:[#allocation16 + $0x60] sm:$0xff] }
 0xc67   : > { %5034 = vmatprep.subr.bf16.mxu1 %v5033_v36  ;;  %v2854_v54 = vadd.f32 %v2853_v41, %v2770_v27  ;;  %v3455_v41 = vld [vmem:[#allocation16 + $0x120] sm:$0xff] }
 0xc68   : > { %5036 = vmatpush3.bf16.msra.mxu1 %v5033_v36 }
 0xc69   : > { %v2857_v44 = vpop.f32.mrb[40].mxu0 }
 0xc6a   : > { %v2858_v46 = vadd.f32 %v2857_v44, %v2766_v24  ;;  %v2859_v48 = vpop.f32.mrb[41].mxu0  ;;  %v3438_v24 = vld [vmem:[#allocation16 + $0x98] sm:$0xff]  ;;  %v3456_v44 = vld [vmem:[#allocation16 + $0x128] sm:$0xff] }
 0xc6b   : > { %v2860_v58 = vadd.f32 %v2859_v48, %v2770_v27  ;;  %v3454_v27 = vld [vmem:[#allocation16 + $0x118] sm:$0xff]  ;;  %v5085_v30 = vpack.c.bf16 %v3438_v24, %v3437_v23  ;;  %v3423_v48 = vld [vmem:[#allocation16 + $0x20] sm:$0xff]  ;;  %v3448_v24 = vld [vmem:[#allocation16 + $0xe8] sm:$0xff] }
 0xc6c   : > { %v5045_v59 = vpack.c.bf16 %v2858_v46, %v2852_v45  ;;  %v5117_v36 = vpack.c.bf16 %v3454_v27, %v3453_v26  ;;  %v3960_v45 = vsel %vm3140_vm15, 1.0, %v5647_v0  ;;  %v3463_v26 = vld [vmem:[#allocation16 + $0x160] sm:$0xff]  ;;  %v3464_v27 = vld [vmem:[#allocation16 + $0x168] sm:$0xff] }
 0xc6d   : > { %v5037_v56 = vpack.c.bf16 %v2860_v58, %v2854_v54  ;;  %v3424_v54 = vld [vmem:[#allocation16 + $0x28] sm:$0xff]  ;;  %v3441_v58 = vld [vmem:[#allocation16 + $0xb0] sm:$0xff] }
 0xc6f   : > { %5038 = vmatprep.subr.bf16.mxu1 %v5037_v56 }
 0xc70   : > { %5040 = vmatpush3.bf16.msra.mxu1 %v5037_v56  ;;  %v3457_v56 = vld [vmem:[#allocation16 + $0x130] sm:$0xff] }
 0xc71   : > { %5042 = vmatprep.subr.bf16.mxu1 %v5041_v33 }
 0xc73   : > { %4558 = vmatmul.mubr.msk.f32.vlgmr.msra.gmra.mrb[22].mxu1 %vm2309_vm1, %v6164_v49  ;;  %v3941_v49 = vsel %vm2879_vm7, 1.0, %v5647_v0 }
 0xc74   : > { %5044 = vmatpush3.bf16.msra.mxu1 %v5041_v33  ;;  %4560 = vmatprep.mubr.msk.f32.mxu1 %vm2309_vm1, %v6220_v11  ;;  %v3942_v11 = vsel %vm2880_vm8, 1.0, %v5647_v0  ;;  %v3439_v33 = vld [vmem:[#allocation16 + $0xa0] sm:$0xff] }
 0xc75   : > { %5046 = vmatprep.subr.bf16.mxu1 %v5045_v59  ;;  %v5089_v46 = vpack.c.bf16 %v3440_v37, %v3439_v33  ;;  %v3433_v37 = vld [vmem:[#allocation16 + $0x70] sm:$0xff] }
 0xc77   : > { %4561 = vmatmul.mubr.msk.f32.gmra.mrb[24].mxu1 %vm2309_vm1, %v6229_v12  ;;  %v3939_v12 = vsel %vm2869_vm13, 1.0, %v5647_v0 }
 0xc78   : > { %5048 = vmatpush3.bf16.msra.mxu1 %v5045_v59  ;;  %4563 = vmatprep.mubr.msk.f32.mxu1 %vm2309_vm1, %v3940_v35  ;;  %v3442_v59 = vld [vmem:[#allocation16 + $0xb8] sm:$0xff] }
 0xc79   : > { %v5093_v62 = vpack.c.bf16 %v3442_v59, %v3441_v58 }
 0xc7b   : > { %4564 = vmatmul.mubr.msk.f32.gmra.mrb[26].mxu1 %vm2309_vm1, %v3941_v49  ;;  %v3962_v49 = vsel %vm3142_vm2, 1.0, %v5647_v0 }
 0xc7c   : > { %4566 = vmatprep.mubr.msk.f32.mxu1 %vm2309_vm1, %v3942_v11  ;;  %v3425_v11 = vld [vmem:[#allocation16 + $0x30] sm:$0xff] }
 0xc7f   : > { %4567 = vmatmul.mubr.msk.f32.gmra.mrb[28].mxu1 %vm2309_vm1, %v3943_v52  ;;  %v3426_v52 = vld [vmem:[#allocation16 + $0x38] sm:$0xff] }
 0xc80   : > { %4577 = vmatprep.mubr.msk.f32.mxu1 %vm2309_vm1, %v6115_v63  ;;  %v3937_v63 = vsel %vm2867_vm11, 1.0, %v5647_v0  ;;  %v5095_v8 = vpack.c.bf16 %v3426_v52, %v3425_v11  ;;  %v3984_v11 = vld [vmem:[%s6600_s6] ss:$0 sm:$0xff] }
 0xc83   : > { %4578 = vmatmul.mubr.msk.f32.vlgmr.msra.gmra.mrb[22].mxu1 %vm2309_vm1, %v6173_v55  ;;  %v3938_v55 = vsel %vm2868_vm12, 1.0, %v5647_v0 }
 0xc84   : > { %4580 = vmatprep.mubr.msk.f32.mxu1 %vm2309_vm1, %v6238_v13 }
 0xc87   : > { %4581 = vmatmul.mubr.msk.f32.gmra.mrb[24].mxu1 %vm2309_vm1, %v6247_v14 }
 0xc88   : > { %4583 = vmatprep.mubr.msk.f32.mxu1 %vm2309_vm1, %v3936_v57  ;;  %v3443_v57 = vld [vmem:[#allocation16 + $0xc0] sm:$0xff] }
 0xc8b   : > { %4584 = vmatmul.mubr.msk.f32.gmra.mrb[26].mxu1 %vm2309_vm1, %v3937_v63  ;;  %v5125_v63 = vpack.c.bf16 %v3458_v60, %v3457_v56 }
 0xc8c   : > { %4586 = vmatprep.mubr.msk.f32.mxu1 %vm2309_vm1, %v3938_v55  ;;  %v3444_v55 = vld [vmem:[#allocation16 + $0xc8] sm:$0xff] }
 0xc8d   : > { %v5097_v39 = vpack.c.bf16 %v3444_v55, %v3443_v57 }
 0xc8f   : > { %4587 = vmatmul.mubr.msk.f32.gmra.mrb[28].mxu1 %vm2309_vm1, %v3939_v12  ;;  %vm3141_vm1 = vcmp.eq.s32.totalorder %v6317_v61, %v6128_v25  ;;  %v5091_v61 = vpack.c.bf16 %v3424_v54, %v3423_v48  ;;  %v3459_v12 = vld [vmem:[#allocation16 + $0x140] sm:$0xff]  ;;  %v3446_v25 = vld [vmem:[#allocation16 + $0xd8] sm:$0xff] }
 0xc90   : > { %4605 = vmatprep.mubr.msk.f32.mxu1 %vm3168_vm14, %v6134_v34  ;;  %v3961_v35 = vsel %vm3141_vm1, 1.0, %v5647_v0 }
 0xd56   : > { %v6375_v13 = vpop.f32.mrb[22].mxu1 }
 0xd57   : > { %v6377_v14 = vpop.f32.mrb[23].mxu1 }
 0xd58   : > { %v5049_v53 = vpack.c.bf16 %v6375_v13, %v6377_v14 }
 0xd5a   : > { %v6381_v50 = vpop.f32.mrb[24].mxu1  ;;  %5050 = vmatprep.subr.bf16.mxu1 %v5049_v53  ;;  %5066 = vmatprep.subr.bf16.mxu0 %v5049_v53 }
 0xd5b   : > { %v6383_v5 = vpop.f32.mrb[25].mxu1  ;;  %5052 = vmatpush3.bf16.msra.mxu1 %v5049_v53  ;;  %5068 = vmatpush3.bf16.msra.mxu0 %v5049_v53  ;;  %v3460_v53 = vld [vmem:[#allocation16 + $0x148] sm:$0xff] }
 0xd5c   : > { %v5053_v34 = vpack.c.bf16 %v6381_v50, %v6383_v5 }
 0xd5e   : > { %v6387_v6 = vpop.f32.mrb[26].mxu1  ;;  %5054 = vmatprep.subr.bf16.mxu1 %v5053_v34  ;;  %5070 = vmatprep.subr.bf16.mxu0 %v5053_v34 }
 0xd5f   : > { %v6389_v40 = vpop.f32.mrb[27].mxu1  ;;  %5056 = vmatpush3.bf16.msra.mxu1 %v5053_v34  ;;  %5072 = vmatpush3.bf16.msra.mxu0 %v5053_v34  ;;  %v3963_v34 = vsel %vm3143_vm5, 1.0, %v5647_v0 }
 0xd60   : > { %v5057_v7 = vpack.c.bf16 %v6387_v6, %v6389_v40 }
 0xd62   : > { %v6393_v38 = vpop.f32.mrb[28].mxu1  ;;  %5058 = vmatprep.subr.bf16.mxu1 %v5057_v7  ;;  %5074 = vmatprep.subr.bf16.mxu0 %v5057_v7 }
 0xd63   : > { %v6395_v16 = vpop.f32.mrb[29].mxu1  ;;  %5060 = vmatpush3.bf16.msra.mxu1 %v5057_v7  ;;  %5076 = vmatpush3.bf16.msra.mxu0 %v5057_v7 }
 0xd64   : > { %v5061_v17 = vpack.c.bf16 %v6393_v38, %v6395_v16 }
 0xd66   : > { %5062 = vmatprep.subr.bf16.mxu1 %v5061_v17  ;;  %5078 = vmatprep.subr.bf16.mxu0 %v5061_v17 }
 0xd67   : > { %5064 = vmatpush3.bf16.msra.mxu1 %v5061_v17  ;;  %5080 = vmatpush3.bf16.msra.mxu0 %v5061_v17  ;;  %v3445_v17 = vld [vmem:[#allocation16 + $0xd0] sm:$0xff] }
 0xd68   : > { %5082 = vmatprep.subr.bf16.mxu1 %v5081_v18  ;;  %5114 = vmatprep.subr.bf16.mxu0 %v5113_v19  ;;  %v5129_v18 = vpack.c.bf16 %v3460_v53, %v3459_v12 }
 0xd6a   : > { %4606 = vmatmul.mubr.msk.f32.vlgmr.msra.gmra.mrb[30].mxu1 %vm3168_vm14, %v6186_v1  ;;  %4634 = vmatmul.mubr.msk.f32.vlgmr.msra.gmra.mrb[42].mxu0 %vm3168_vm14, %v6194_v43  ;;  %v3964_v1 = vsel %vm3156_vm0, 1.0, %v5647_v0  ;;  %v3155_v43 = vadd.s32 1, %v6332_v3  ;;  %v3461_v3 = vld [vmem:[#allocation16 + $0x150] sm:$0xff] }
 0xd6b   : > { %4608 = vmatprep.mubr.msk.f32.mxu1 %vm3168_vm14, %v6265_v42  ;;  %4636 = vmatprep.mubr.msk.f32.mxu0 %vm3168_vm14, %v6284_v4  ;;  %v5087_v42 = vpack.c.bf16 %v3422_v32, %v3421_v31  ;;  %v5121_v4 = vpack.c.bf16 %v3456_v44, %v3455_v41  ;;  %v3449_v31 = vld [vmem:[#allocation16 + $0xf0] sm:$0xff]  ;;  %v3450_v32 = vld [vmem:[#allocation16 + $0xf8] sm:$0xff] }
 0xd6c   : > { %5084 = vmatpush3.bf16.msra.mxu1 %v5083_v2  ;;  %5116 = vmatpush3.bf16.msra.mxu0 %v5113_v19  ;;  %vm3159_vm6 = vcmp.eq.s32.totalorder %v6089_v51, %v3155_v43  ;;  %v3462_v19 = vld [vmem:[#allocation16 + $0x158] sm:$0xff]  ;;  %v5101_v51 = vpack.c.bf16 %v3446_v25, %v3445_v17  ;;  %v5105_v2 = vpack.c.bf16 %v3448_v24, %v3447_v22 }
 0xd6d   : > { %5086 = vmatprep.subr.bf16.mxu1 %v5085_v30  ;;  %5118 = vmatprep.subr.bf16.mxu0 %v5117_v36  ;;  %v3967_v7 = vsel %vm3159_vm6, 1.0, %v5647_v0  ;;  %v5133_v23 = vpack.c.bf16 %v3462_v19, %v3461_v3  ;;  %v5137_v30 = vpack.c.bf16 %v3464_v27, %v3463_v26  ;;  %v3434_v41 = vld [vmem:[#allocation16 + $0x78] sm:$0xff] }
 0xd6e   : > { %4609 = vmatmul.mubr.msk.f32.gmra.mrb[32].mxu1 %vm3168_vm14, %v6275_v47  ;;  %4637 = vmatmul.mubr.msk.f32.gmra.mrb[44].mxu0 %vm3168_vm14, %v6292_v9  ;;  %v3965_v47 = vsel %vm3157_vm3, 1.0, %v5647_v0  ;;  %v3966_v9 = vsel %vm3158_vm4, 1.0, %v5647_v0  ;;  %v5099_v0 = vpack.c.bf16 %v3428_v15, %v3427_v10  ;;  %v5111_v44 = vpack.c.bf16 %v3434_v41, %v3433_v37 }
 0xd6f   : > { %4611 = vmatprep.mubr.msk.f32.mxu1 %vm3168_vm14, %v3960_v45  ;;  %4639 = vmatprep.mubr.msk.f32.mxu0 %vm3168_vm14, %v3964_v1  ;;  %v3465_v45 = vld [vmem:[#allocation16 + $0x170] sm:$0xff]  ;;  %v3466_v1 = vld [vmem:[#allocation16 + $0x178] sm:$0xff] }
 0xd70   : > { %5088 = vmatpush3.bf16.msra.mxu1 %v5087_v42  ;;  %5120 = vmatpush3.bf16.msra.mxu0 %v5117_v36  ;;  %v5109_v36 = vpack.c.bf16 %v3450_v32, %v3449_v31  ;;  %v5141_v43 = vpack.c.bf16 %v3466_v1, %v3465_v45 }
 0xd71   : > { %5090 = vmatprep.subr.bf16.mxu1 %v5089_v46  ;;  %5122 = vmatprep.subr.bf16.mxu0 %v5121_v4 }
 0xd72   : > { %4612 = vmatmul.mubr.msk.f32.gmra.mrb[34].mxu1 %vm3168_vm14, %v3961_v35  ;;  %4640 = vmatmul.mubr.msk.f32.gmra.mrb[46].mxu0 %vm3168_vm14, %v3965_v47 }
 0xd73   : > { %4614 = vmatprep.mubr.msk.f32.mxu1 %vm3168_vm14, %v3962_v49  ;;  %4642 = vmatprep.mubr.msk.f32.mxu0 %vm3168_vm14, %v3966_v9 }
 0xd74   : > { %5092 = vmatpush3.bf16.msra.mxu1 %v5091_v61  ;;  %5124 = vmatpush3.bf16.msra.mxu0 %v5121_v4 }
 0xd75   : > { %5094 = vmatprep.subr.bf16.mxu1 %v5093_v62  ;;  %5126 = vmatprep.subr.bf16.mxu0 %v5125_v63 }
 0xd76   : > { %4615 = vmatmul.mubr.msk.f32.gmra.mrb[36].mxu1 %vm3168_vm14, %v3963_v34  ;;  %4643 = vmatmul.mubr.msk.f32.gmra.mrb[48].mxu0 %vm3168_vm14, %v3967_v7 }
 0xd77   : > { %3538 = vmatprep.mubr.f32.mxu1 %v6377_v14  ;;  %v3432_v14 = vld [vmem:[#allocation16 + $0x68] sm:$0xff] }
 0xd78   : > { %5096 = vmatpush3.bf16.msra.mxu1 %v5095_v8  ;;  %5128 = vmatpush3.bf16.msra.mxu0 %v5125_v63  ;;  %v5107_v33 = vpack.c.bf16 %v3432_v14, %v3431_v29 }
 0xd79   : > { %5098 = vmatprep.subr.bf16.mxu1 %v5097_v39  ;;  %5130 = vmatprep.subr.bf16.mxu0 %v5129_v18 }
 0xd7c   : > { %5100 = vmatpush3.bf16.msra.mxu1 %v5099_v0  ;;  %5132 = vmatpush3.bf16.msra.mxu0 %v5129_v18 }
 0xd7d   : > { %5102 = vmatprep.subr.bf16.mxu1 %v5101_v51  ;;  %5134 = vmatprep.subr.bf16.mxu0 %v5133_v23 }
 0xd80   : > { %5104 = vmatpush3.bf16.msra.mxu1 %v5103_v28  ;;  %5136 = vmatpush3.bf16.msra.mxu0 %v5133_v23 }
 0xd81   : > { %5106 = vmatprep.subr.bf16.mxu1 %v5105_v2  ;;  %5138 = vmatprep.subr.bf16.mxu0 %v5137_v30 }
 0xd84   : > { %5108 = vmatpush3.bf16.msra.mxu1 %v5107_v33  ;;  %5140 = vmatpush3.bf16.msra.mxu0 %v5137_v30 }
 0xd85   : > { %5110 = vmatprep.subr.bf16.mxu1 %v5109_v36  ;;  %5142 = vmatprep.subr.bf16.mxu0 %v5141_v43 }
 0xd88   : > { %5112 = vmatpush3.bf16.msra.mxu1 %v5111_v44  ;;  %5144 = vmatpush3.bf16.msra.mxu0 %v5141_v43 }
 0xe3d   : > { %v4607_v42 = vpop.f32.mrb[30].mxu1  ;;  %v4635_v46 = vpop.f32.mrb[42].mxu0 }
 0xe3e   : > { %v3255_v48 = vpop.f32.mrb[31].mxu1  ;;  %v3380_v54 = vpop.f32.mrb[43].mxu0 }
 0xe3f   : > { %3539 = vmatmul.mubr.f32.vlgmr.msra.gmra.mrb[38].mxu1 %v3255_v48  ;;  %4677 = vmatprep.mubr.f32.mxu0 %v3380_v54 }
 0xe40   : > { %3543 = vmatprep.mubr.f32.mxu1 %v6375_v13  ;;  %4678 = vmatmul.mubr.f32.vlgmr.msra.gmra.mrb[50].mxu0 %v4635_v46 }
 0xe41   : > { %v4610_v58 = vpop.f32.mrb[32].mxu1  ;;  %v4638_v4 = vpop.f32.mrb[44].mxu0 }
 0xe42   : > { %v3265_v59 = vpop.f32.mrb[33].mxu1  ;;  %v3390_v56 = vpop.f32.mrb[45].mxu0 }
 0xe43   : > { %3544 = vmatmul.mubr.f32.gmra.mrb[40].mxu1 %v4607_v42  ;;  %4680 = vmatprep.mubr.f32.mxu0 %v3390_v56 }
 0xe44   : > { %3548 = vmatprep.mubr.f32.mxu1 %v6383_v5  ;;  %4681 = vmatmul.mubr.f32.gmra.mrb[52].mxu0 %v4638_v4 }
 0xe45   : > { %v4613_v60 = vpop.f32.mrb[34].mxu1  ;;  %v4641_v35 = vpop.f32.mrb[46].mxu0 }
 0xe46   : > { %v3275_v49 = vpop.f32.mrb[35].mxu1  ;;  %v3400_v47 = vpop.f32.mrb[47].mxu0 }
 0xe47   : > { %3549 = vmatmul.mubr.f32.gmra.mrb[42].mxu1 %v3265_v59  ;;  %4683 = vmatprep.mubr.f32.mxu0 %v3400_v47 }
 0xe48   : > { %3553 = vmatprep.mubr.f32.mxu1 %v6381_v50  ;;  %4684 = vmatmul.mubr.f32.gmra.mrb[54].mxu0 %v4641_v35 }
 0xe49   : > { %v4616_v13 = vpop.f32.mrb[36].mxu1  ;;  %v4644_v9 = vpop.f32.mrb[48].mxu0 }
 0xe4a   : > { %v3285_v61 = vpop.f32.mrb[37].mxu1  ;;  %v3410_v62 = vpop.f32.mrb[49].mxu0 }
 0xe4b   : > { %3554 = vmatmul.mubr.f32.gmra.mrb[44].mxu1 %v4610_v58  ;;  %4686 = vmatprep.mubr.f32.mxu0 %v3410_v62 }
 0xe4c   : > { %3558 = vmatprep.mubr.f32.mxu1 %v6389_v40  ;;  %4687 = vmatmul.mubr.f32.gmra.mrb[56].mxu0 %v4644_v9 }
 0xe4f   : > { %3559 = vmatmul.mubr.f32.gmra.mrb[46].mxu1 %v3275_v49 }
 0xe50   : > { %3563 = vmatprep.mubr.f32.mxu1 %v6387_v6 }
 0xe53   : > { %3564 = vmatmul.mubr.f32.gmra.mrb[48].mxu1 %v4613_v60 }
 0xe54   : > { %3568 = vmatprep.mubr.f32.mxu1 %v6395_v16 }
 0xe57   : > { %3569 = vmatmul.mubr.f32.gmra.mrb[50].mxu1 %v3285_v61 }
 0xe58   : > { %3573 = vmatprep.mubr.f32.mxu1 %v6393_v38 }
 0xe5b   : > { %3574 = vmatmul.mubr.f32.gmra.mrb[52].mxu1 %v4616_v13 }
 0xf12   : > { %v4301_v50 = vpop.f32.mrb[38].mxu1 }
 0xf13   : > { %v4302_v5 = vpop.f32.mrb[39].mxu1  ;;  %v4679_v52 = vpop.f32.mrb[50].mxu0 }
 0xf14   : > { %v4303_v40 = vadd.f32 %v4302_v5, %v4301_v50  ;;  %v3645_v57 = vpop.f32.mrb[51].mxu0 }
 0xf16   : > { %v4304_v63 = vpop.f32.mrb[40].mxu1  ;;  %v3541_v55 = vadd.f32 %v4303_v40, %v3984_v11 }
 0xf17   : > { %v4305_v6 = vpop.f32.mrb[41].mxu1  ;;  %v4682_v12 = vpop.f32.mrb[52].mxu0 }
 0xf18   : > { %v4306_v53 = vadd.f32 %v4305_v6, %v4304_v63  ;;  %v3646_v16 = vadd.f32 %v3645_v57, %v3541_v55  ;;  %v3655_v34 = vpop.f32.mrb[53].mxu0 }
 0xf1a   : > { %v3546_v7 = vadd.f32 %v4306_v53, %v3984_v11  ;;  %v3684_v38 = vmax.f32 %v3646_v16, 0.0  ;;  %v4307_v8 = vpop.f32.mrb[42].mxu1 }
 0xf1b   : > { %v4308_v39 = vpop.f32.mrb[43].mxu1  ;;  %v4685_v10 = vpop.f32.mrb[54].mxu0 }
 0xf1c   : > { %v3651_v15 = vadd.f32 %v4679_v52, %v3546_v7  ;;  %3692 = vst [vmem:[%s6475_s8] sm:$0xff] %v3684_v38  ;;  %v4309_v17 = vadd.f32 %v4308_v39, %v4307_v8  ;;  %v3665_v18 = vpop.f32.mrb[55].mxu0 }
 0xf1e   : > { %v3685_v25 = vmax.f32 %v3651_v15, 0.0  ;;  %v4310_v3 = vpop.f32.mrb[44].mxu1  ;;  %v3551_v19 = vadd.f32 %v4309_v17, %v3984_v11 }
 0xf1f   : > { %v4311_v0 = vpop.f32.mrb[45].mxu1  ;;  %v4688_v51 = vpop.f32.mrb[56].mxu0 }
 0xf20   : > { %3693 = vst [vmem:[%s6475_s8 + $0x8] sm:$0xff] %v3685_v25  ;;  %v4312_v20 = vadd.f32 %v4311_v0, %v4310_v3  ;;  %v3656_v21 = vadd.f32 %v3655_v34, %v3551_v19  ;;  %v3675_v22 = vpop.f32.mrb[57].mxu0 }
 0xf22   : > { %v3556_v23 = vadd.f32 %v4312_v20, %v3984_v11  ;;  %v3686_v24 = vmax.f32 %v3656_v21, 0.0  ;;  %v4313_v26 = vpop.f32.mrb[46].mxu1 }
 0xf23   : > { %v4314_v27 = vpop.f32.mrb[47].mxu1 }
 0xf24   : > { %v3661_v28 = vadd.f32 %v4682_v12, %v3556_v23  ;;  %3694 = vst [vmem:[%s6475_s8 + $0x10] sm:$0xff] %v3686_v24  ;;  %v4315_v2 = vadd.f32 %v4314_v27, %v4313_v26 }
 0xf26   : > { %v3687_v29 = vmax.f32 %v3661_v28, 0.0  ;;  %v4316_v14 = vpop.f32.mrb[48].mxu1  ;;  %v3561_v30 = vadd.f32 %v4315_v2, %v3984_v11 }
 0xf27   : > { %v4317_v31 = vpop.f32.mrb[49].mxu1 }
 0xf28   : > { %3695 = vst [vmem:[%s6475_s8 + $0x18] sm:$0xff] %v3687_v29  ;;  %v4318_v32 = vadd.f32 %v4317_v31, %v4316_v14  ;;  %v3666_v33 = vadd.f32 %v3665_v18, %v3561_v30 }
 0xf2a   : > { %v3566_v36 = vadd.f32 %v4318_v32, %v3984_v11  ;;  %v3688_v37 = vmax.f32 %v3666_v33, 0.0  ;;  %v4319_v41 = vpop.f32.mrb[50].mxu1 }
 0xf2b   : > { %v4320_v44 = vpop.f32.mrb[51].mxu1 }
 0xf2c   : > { %v3671_v45 = vadd.f32 %v4685_v10, %v3566_v36  ;;  %3696 = vst [vmem:[%s6475_s8 + $0x20] sm:$0xff] %v3688_v37  ;;  %v4321_v1 = vadd.f32 %v4320_v44, %v4319_v41 }
 0xf2e   : > { %v3689_v43 = vmax.f32 %v3671_v45, 0.0  ;;  %v4322_v42 = vpop.f32.mrb[52].mxu1  ;;  %v3571_v46 = vadd.f32 %v4321_v1, %v3984_v11 }
 0xf2f   : > { %v4323_v48 = vpop.f32.mrb[53].mxu1 }
 0xf30   : > { %3697 = vst [vmem:[%s6475_s8 + $0x28] sm:$0xff] %v3689_v43  ;;  %v4324_v54 = vadd.f32 %v4323_v48, %v4322_v42  ;;  %v3676_v58 = vadd.f32 %v3675_v22, %v3571_v46 }
 0xf32   : > { %v3576_v4 = vadd.f32 %v4324_v54, %v3984_v11  ;;  %v3690_v59 = vmax.f32 %v3676_v58, 0.0 }
 0xf34   : > { %v3681_v56 = vadd.f32 %v4688_v51, %v3576_v4  ;;  %3698 = vst [vmem:[%s6475_s8 + $0x30] sm:$0xff] %v3690_v59 }
 0xf36   : > { %v3691_v60 = vmax.f32 %v3681_v56, 0.0 }
 0xf38   : > { %3699 = vst [vmem:[%s6475_s8 + $0x38] sm:$0xff] %v3691_v60 }
 0xf39   : > { %5563 = shalt.err (!%p5560_p10)
}
 0xf3a   : > { %s5564_s6 = scalar_lea.hbm %s6491_s1, 1024  ;;  %s5568_s30 = scalar_lea.hbm %s6601_s19, 2048 }
 0xf3b   : > { %p5565_p11 = scmp.ne.s32.totalorder %s6491_s1, %s5564_s6  ;;  %p5569_p7 = scmp.lt.u32.totalorder %s6491_s1, %s6601_s19 }
 0xf3c   : > { %p5570_p6 = scmp.lt.u32.totalorder %s5568_s30, %s5564_s6  ;;  %p5572_p12 = scmp.lt.u32.totalorder %s5564_s6, %s6491_s1 }
 0xf3d   : > { %p5566_p8 = pnand %p5565_p11, %p6602_p1 }
 0xf3e   : > { %p5571_p9 = por %p5570_p6, %p5569_p7 }
 0xf3f   : > { %p5567_p5 = pneg %p5566_p8 }
 0xf40   : > { %p5573_p13 = por %p5572_p12, %p5571_p9 }
 0xf42   : > { %p5574_p0 = pnand %p5573_p13, %p5567_p5 }
 0xf44   : > { %5577 = shalt.err (!%p5574_p0)
}
 0xf45   : > { %s5651_s12 = smov 128   ;;  %s5652_s0 = smov 8  }
 0xf46   : > { %5194 = dma.vmem_to_hbm [thread:$0]  (%p6602_p1), %s6485_s23, 1024, %s6491_s1, %s3701_s4, %s5651_s12, %s5651_s12, %s5652_s0  }
 0xf47 PF: > { %s3729_s14 = sand.u32 1, %s5620_s24   ;;  %p6603_p2 = scmp.ne.s32.totalorder %s6582_s21, 0 }
 0xf48   : > { %p6604_p3 = scmp.ge.s32.totalorder %s5632_s27, 2  ;;  %s3730_s5 = scalar_lea.sflag [#allocation4], %s3729_s14 }
 0xf4a   : > { %p5226_p4 = pnand %p6604_p3, %p6603_p2 }
 0xf4c   : > { %5615 = dma.done.wait (!%p5226_p4), %s3730_s5, 1024  }
 0xf4d   : > { %5617 = vsyncadd (!%p5226_p4), %s3730_s5, 4294966272  ;;  %p34_p10 = scmp.ge.s32.totalorder %s5979_s18, 4   ;;  %s6605_s24 = smov %s5624_s25 }
 0xf4e   : > { %s6606_s25 = smov %s5628_s26  ;;  %s6607_s26 = smov %s5990_s17 }
 0xf4f   : > { %s6608_s27 = smov %s5979_s18  ;;  %36 = sbr.rel (!%p34_p10) target bundleno = 22 (0x16), region = 165 }
 0xf56   :  { %3735 = vsyncpa [#allocation3], 1 }
 0xf57   :  { %3737 = vsyncpa [#allocation3 + $0x1], 1 }
 0xf58   :  { %3738 = vsyncpa [#allocation6], 1 }
 0xf59   :  { %3739 = vsyncpa [#allocation9], 1 }
 0xf5a   :  { %3740 = vsyncpa [#allocation12], 1 }
 0xf5b   :  { %3741 = vsyncpa [#allocation15], 1 }
 0xf5c   :  { %3742 = vsyncpa [#allocation4], 1 }
 0xf5d   :  { %3744 = vsyncpa [#allocation4 + $0x1], 1 }

</bundles_post_ra>
